<compile_context>
chip_gen: v7x
topology: tpu7x:2x2x1
jax: 0.10.0
libtpu: 0.0.40
codegen_flags: <defaults>
</compile_context>

<pallas_src>
import numpy as np
import jax
import jax.numpy as jnp
from jax.experimental import pallas as pl
from jax.experimental.pallas import tpu as pltpu  # noqa: F401  (kept per template)

EPS = 1e-5

ARG_ORDER = ("w1c", "b1", "g1", "be1", "cg1", "cb1", "pw1",
             "m2", "w2c", "b2", "g2", "be2", "cg2", "cb2",
             "sh2", "wfc", "bf1", "g3", "be3", "wf2", "bf2")


# ------------------------------ fused kernel -------------------------------

def netb_fused_kernel(xc_ref, w1c_ref, b1_ref, g1_ref, be1_ref,
                      cg1_ref, cb1_ref, pw1_ref,
                      m2_ref, w2c_ref, b2_ref, g2_ref, be2_ref,
                      cg2_ref, cb2_ref,
                      sh2_ref, wfc_ref, bf1_ref, g3_ref, be3_ref,
                      wf2_ref, bf2_ref, o_ref):
    f32 = jnp.float32

    def mm(a, b):
        return jnp.dot(a, b, preferred_element_type=f32)

    def bn_relu_grouped(y, cg_ref, cb_ref, gamma, beta):
        # y: (rows, J*C). Training-mode BN per channel c over all rows and all
        # J lane groups (== over N, H, W).  Single pass over y: sum and
        # sum-of-squares, gathered per channel with tiny 0/1 matmuls, then a
        # fused scale/shift broadcast + ReLU.
        cg = cg_ref[...].astype(f32)
        cb = cb_ref[...].astype(f32)
        cnt = y.shape[0] * (y.shape[1] // cg.shape[1])
        s = jnp.sum(y, axis=0, keepdims=True)                  # (1, lanes)
        s2 = jnp.sum(y * y, axis=0, keepdims=True)             # (1, lanes)
        mean_c = mm(s, cg) / cnt                               # (1, C)
        var_c = mm(s2, cg) / cnt - mean_c * mean_c
        scale_c = gamma * jax.lax.rsqrt(var_c + EPS)           # (1, C)
        shift_c = beta - mean_c * scale_c                      # (1, C)
        scale_b = mm(scale_c, cb)                              # (1, lanes)
        shift_b = mm(shift_c, cb)
        return jnp.maximum(y * scale_b + shift_b, 0.0)

    n = o_ref.shape[0]

    # ---- conv1 (1->16, k=5) + bn1 + relu -----------------------------------
    # Input lanes are the 5 row-shifted copies concatenated -> one matmul.
    y = mm(xc_ref[...], w1c_ref[...]) + b1_ref[...]            # (24N, 384)
    y = bn_relu_grouped(y, cg1_ref, cb1_ref, g1_ref[...], be1_ref[...])

    # ---- avg_pool2d(2): lane half via pw1; row half (x0.25) folded into M2 --
    yp = mm(y, pw1_ref[...].astype(f32))                       # (24N, 192)

    # ---- conv2 (16->16, k=5): one stacked row-shift, 5 banded matmuls ------
    sh = mm(m2_ref[...].astype(f32), yp)                       # (40N, 192)
    nr = 8 * n
    acc = None
    for di in range(5):
        t = mm(sh[di * nr:(di + 1) * nr, :], w2c_ref[di])      # (8N, 128)
        acc = t if acc is None else acc + t
    y2 = acc + b2_ref[...]
    y2 = bn_relu_grouped(y2, cg2_ref, cb2_ref, g2_ref[...], be2_ref[...])

    # ---- avg_pool2d(2) + flatten + fc1 (pool folded into the fc1 weight) ---
    z = mm(sh2_ref[...].astype(f32), y2)                       # (4N, 128), rows (i_out, n)
    x2 = jnp.concatenate(
        [z[i * n:(i + 1) * n, :] for i in range(4)], axis=1)   # (N, 512), 128-aligned concat
    h = mm(x2, wfc_ref[...]) + bf1_ref[...]                    # (N, 100)

    # ---- bn3 (per feature over the batch) + relu ---------------------------
    mu = jnp.mean(h, axis=0, keepdims=True)
    var = jnp.mean(h * h, axis=0, keepdims=True) - mu * mu
    h = jnp.maximum((h - mu) * jax.lax.rsqrt(var + EPS) * g3_ref[...]
                    + be3_ref[...], 0.0)

    # ---- fc2 ---------------------------------------------------------------
    o_ref[...] = mm(h, wf2_ref[...]) + bf2_ref[...]


# ------------------------------ call wrapper -------------------------------

def network_b_forward(x_nchw, prep):
    n = x_nchw.shape[0]
    # 5 row-shifted copies of the input, concatenated along lanes, so conv1 is
    # a single K=140 matmul in the kernel (replaces the O(N^2) row-shift mats).
    x_cat = jnp.concatenate(
        [x_nchw[:, 0, di:di + 24, :].reshape(n * 24, 28) for di in range(5)],
        axis=1)                                                # (24N, 140)
    args = (x_cat,) + tuple(prep[k] for k in ARG_ORDER)
    # Single whole-array VMEM invocation: no grid -> no pipeline bookkeeping /
    # double buffering (total operand footprint ~1.3 MB, well under VMEM).
    return pl.pallas_call(
        netb_fused_kernel,
        out_shape=jax.ShapeDtypeStruct((n, 10), jnp.float32),
    )(*args)


# ------------------- one-time structured operand building ------------------

def prepare_inputs(p, n):
    """Build the structured constant operands of the fused kernel (run once)."""
    f32 = np.float32
    eye16 = np.eye(16, dtype=f32)

    def band(w_in, w_out):                         # [dj, jo+dj, jo] = 1
        d = np.zeros((5, w_in, w_out), f32)
        for dj in range(5):
            d[dj, np.arange(w_out) + dj, np.arange(w_out)] = 1.0
        return d

    # conv1 banded weights, concatenated over the 5 row shifts: (140, 384).
    w1r = np.asarray(p["w1"]).reshape(5, 5, 16)                # (di, dj, c)
    w1c = np.einsum("qwj,dqc->dwjc", band(28, 24), w1r).reshape(5 * 28, 24 * 16)

    # conv2 banded weights per row shift: (5, 192, 128).
    w2r = np.asarray(p["w2"]).reshape(5, 5, 16, 16)            # (di, dj, ci, co)
    w2c = np.einsum("qwj,dqio->dwijo", band(12, 8), w2r).reshape(5, 192, 128)

    # Per-channel gather / broadcast matrices for grouped BN stats (0/1).
    cg1 = np.kron(np.ones((24, 1), f32), eye16)                # (384, 16)
    cg2 = np.kron(np.ones((8, 1), f32), eye16)                 # (128, 16)

    # pool1 lane half: 0/1 column-pair sum, channels kept: (384, 192).
    pm24 = np.zeros((24, 12), f32)
    pm24[np.arange(24), np.arange(24) // 2] = 1.0
    pw1 = np.kron(pm24, eye16)

    # pool1 row half (x0.25) fused with conv2's 5 stacked row shifts:
    # row (di, n, io) averages conv1 rows 2*(io+di), 2*(io+di)+1 of image n.
    m2 = np.zeros((40 * n, 24 * n), f32)
    for di in range(5):
        for b in range(n):
            for io in range(8):
                r = (di * n + b) * 8 + io
                c0 = b * 24 + 2 * (io + di)
                m2[r, c0] = 0.25
                m2[r, c0 + 1] = 0.25

    # pool2 row half: 0/1 row-pair sum, rows reordered to (i_out, n): (4N, 8N).
    sh2 = np.zeros((4 * n, 8 * n), f32)
    for io in range(4):
        for b in range(n):
            sh2[io * n + b, b * 8 + 2 * io] = 1.0
            sh2[io * n + b, b * 8 + 2 * io + 1] = 1.0

    # fc1 weight with pool2's lane half (and the whole 0.25 factor) plus the
    # PyTorch NCHW flatten folded in:
    #   kernel lane (i_out*128 + j*16 + c)  ->  flatten idx c*16 + i_out*4 + j//2
    wf1r = np.asarray(p["wf1"]).reshape(16, 4, 4, 100)         # (c, io, jo, f)
    wt = np.repeat(np.transpose(wf1r, (1, 2, 0, 3)), 2, axis=1)  # (io, j, c, f)
    wfc = (0.25 * wt).reshape(4 * 8 * 16, 100)                 # (512, 100)

    def bf16(a):                                    # 0/1/0.25: exact in bf16
        return jnp.asarray(a, dtype=jnp.bfloat16)

    return {
        "w1c": jnp.asarray(w1c),
        "b1": jnp.tile(p["b1"], (1, 24)), "g1": p["g1"], "be1": p["be1"],
        "cg1": bf16(cg1), "cb1": bf16(cg1.T), "pw1": bf16(pw1),
        "m2": bf16(m2), "w2c": jnp.asarray(w2c),
        "b2": jnp.tile(p["b2"], (1, 8)), "g2": p["g2"], "be2": p["be2"],
        "cg2": bf16(cg2), "cb2": bf16(cg2.T),
        "sh2": bf16(sh2), "wfc": jnp.asarray(wfc),
        "bf1": p["bf1"], "g3": p["g3"], "be3": p["be3"],
        "wf2": p["wf2"], "bf2": p["bf2"],
    }


# --------------------------- pure-JAX reference -----------------------------

def _bn_relu_ref(y, g, b):
    axes = tuple(range(y.ndim - 1))
    m = jnp.mean(y, axis=axes, keepdims=True)
    v = jnp.mean((y - m) ** 2, axis=axes, keepdims=True)
    shape = (1,) * (y.ndim - 1) + (g.shape[-1],)
    out = (y - m) * jax.lax.rsqrt(v + EPS) * g.reshape(shape) + b.reshape(shape)
    return jnp.maximum(out, 0.0)


def reference_forward(x_nchw, p):
    N = x_nchw.shape[0]
    x = jnp.transpose(x_nchw, (0, 2, 3, 1))

    def conv(x, w_mat, k, cin, cout, bias):
        w = w_mat.reshape(k, k, cin, cout)
        y = jax.lax.conv_general_dilated(
            x, w, (1, 1), "VALID",
            dimension_numbers=("NHWC", "HWIO", "NHWC"),
            precision=jax.lax.Precision.HIGHEST)
        return y + bias.reshape(1, 1, 1, cout)

    def pool(y):
        N_, H, W, C = y.shape
        return y.reshape(N_, H // 2, 2, W // 2, 2, C).mean(axis=(2, 4))

    y = _bn_relu_ref(conv(x, p["w1"], 5, 1, 16, p["b1"]), p["g1"], p["be1"])
    y = pool(y)
    y = _bn_relu_ref(conv(y, p["w2"], 5, 16, 16, p["b2"]), p["g2"], p["be2"])
    y = pool(y)
    flat = jnp.transpose(y, (0, 3, 1, 2)).reshape(N, 256)
    y = _bn_relu_ref(flat @ p["wf1"] + p["bf1"], p["g3"], p["be3"])
    return y @ p["wf2"] + p["bf2"]


# --------------------------------- main -------------------------------------

def init_params(key):
    ks = jax.random.split(key, 6)

    def u(k, shape, fan_in):
        bound = 1.0 / jnp.sqrt(fan_in)
        return jax.random.uniform(k, shape, jnp.float32, -bound, bound)

    return {
        # conv1: weight as im2col matrix (k*k*Cin, Cout) = (25, 16), rows (di,dj)
        "w1": u(ks[0], (25, 16), 25.0),  "b1": u(ks[1], (1, 16), 25.0),
        "g1": jnp.ones((1, 16), jnp.float32), "be1": jnp.zeros((1, 16), jnp.float32),
        # conv2: (k*k*Cin, Cout) = (400, 16), rows (di,dj,cin)
        "w2": u(ks[2], (400, 16), 400.0), "b2": u(ks[3], (1, 16), 400.0),
        "g2": jnp.ones((1, 16), jnp.float32), "be2": jnp.zeros((1, 16), jnp.float32),
        # fc1: (256, 100) in PyTorch NCHW flatten order
        "wf1": u(ks[4], (256, 100), 256.0), "bf1": u(ks[5], (1, 100), 256.0),
        "g3": jnp.ones((1, 100), jnp.float32), "be3": jnp.zeros((1, 100), jnp.float32),
        # fc2: (100, 10)
        "wf2": u(jax.random.fold_in(key, 7), (100, 10), 100.0),
        "bf2": u(jax.random.fold_in(key, 8), (1, 10), 100.0),
    }


if __name__ == "__main__":
    key = jax.random.PRNGKey(0)
    params = init_params(key)

    # 28x28 inputs are required by the 16*4*4 flatten; small batch of 8 keeps
    # every in-kernel row slice sublane-aligned.
    x = jax.random.normal(jax.random.fold_in(key, 99), (8, 1, 28, 28),
                          dtype=jnp.float32)

    prep = prepare_inputs(params, x.shape[0])          # one-time weight prep
    fwd = jax.jit(network_b_forward)
    out = jax.block_until_ready(fwd(x, prep))

    ref = jax.block_until_ready(reference_forward(x, params))
    assert out.shape == (8, 10)
    # Tolerance tightened from 1e-2 per review; the whole path is f32.
    assert jnp.allclose(out, ref, atol=1e-3, rtol=1e-3), "mismatch vs reference"

    print("KERNEL_OK")
</pallas_src>

<mosaic_0001>
module attributes {stable_mosaic.version = 11 : i64} {
  func.func @netb_fused_kernel(%arg0: memref<192x140xf32, #tpu.memory_space<vmem>>, %arg1: memref<140x384xf32, #tpu.memory_space<vmem>>, %arg2: memref<1x384xf32, #tpu.memory_space<vmem>>, %arg3: memref<1x16xf32, #tpu.memory_space<vmem>>, %arg4: memref<1x16xf32, #tpu.memory_space<vmem>>, %arg5: memref<384x16xbf16, #tpu.memory_space<vmem>>, %arg6: memref<16x384xbf16, #tpu.memory_space<vmem>>, %arg7: memref<384x192xbf16, #tpu.memory_space<vmem>>, %arg8: memref<320x192xbf16, #tpu.memory_space<vmem>>, %arg9: memref<5x192x128xf32, #tpu.memory_space<vmem>>, %arg10: memref<1x128xf32, #tpu.memory_space<vmem>>, %arg11: memref<1x16xf32, #tpu.memory_space<vmem>>, %arg12: memref<1x16xf32, #tpu.memory_space<vmem>>, %arg13: memref<128x16xbf16, #tpu.memory_space<vmem>>, %arg14: memref<16x128xbf16, #tpu.memory_space<vmem>>, %arg15: memref<32x64xbf16, #tpu.memory_space<vmem>>, %arg16: memref<512x100xf32, #tpu.memory_space<vmem>>, %arg17: memref<1x100xf32, #tpu.memory_space<vmem>>, %arg18: memref<1x100xf32, #tpu.memory_space<vmem>>, %arg19: memref<1x100xf32, #tpu.memory_space<vmem>>, %arg20: memref<100x10xf32, #tpu.memory_space<vmem>>, %arg21: memref<1x10xf32, #tpu.memory_space<vmem>>, %arg22: memref<8x10xf32, #tpu.memory_space<vmem>>) attributes {dimension_semantics = [], scalar_prefetch = 0 : i64, scratch_operands = 0 : i64, tpu.core_type = #tpu.core_type<tc>} {
    %c0 = arith.constant 0 : index
    %c0_0 = arith.constant 0 : index
    %0 = vector.load %arg0[%c0, %c0_0] : memref<192x140xf32, #tpu.memory_space<vmem>>, vector<192x140xf32>
    %c0_1 = arith.constant 0 : index
    %c0_2 = arith.constant 0 : index
    %1 = vector.load %arg1[%c0_1, %c0_2] : memref<140x384xf32, #tpu.memory_space<vmem>>, vector<140x384xf32>
    %cst = arith.constant dense<0.000000e+00> : vector<192x384xf32>
    %2 = tpu.matmul %0, %1, %cst {dimension_numbers = #tpu.dot_dimension_numbers<[1], [0], [0], [1], [0, 0, 1, 1], [], []>} : vector<192x140xf32>, vector<140x384xf32>, vector<192x384xf32> -> vector<192x384xf32>
    %c0_3 = arith.constant 0 : index
    %c0_4 = arith.constant 0 : index
    %3 = vector.load %arg2[%c0_3, %c0_4] : memref<1x384xf32, #tpu.memory_space<vmem>>, vector<1x384xf32>
    %4 = vector.broadcast %3 : vector<1x384xf32> to vector<192x384xf32>
    %5 = arith.addf %2, %4 : vector<192x384xf32>
    %c0_5 = arith.constant 0 : index
    %c0_6 = arith.constant 0 : index
    %6 = vector.load %arg3[%c0_5, %c0_6] : memref<1x16xf32, #tpu.memory_space<vmem>>, vector<1x16xf32>
    %c0_7 = arith.constant 0 : index
    %c0_8 = arith.constant 0 : index
    %7 = vector.load %arg4[%c0_7, %c0_8] : memref<1x16xf32, #tpu.memory_space<vmem>>, vector<1x16xf32>
    %c0_9 = arith.constant 0 : index
    %c0_10 = arith.constant 0 : index
    %8 = vector.load %arg5[%c0_9, %c0_10] : memref<384x16xbf16, #tpu.memory_space<vmem>>, vector<384x16xbf16>
    %9 = arith.extf %8 : vector<384x16xbf16> to vector<384x16xf32>
    %c0_11 = arith.constant 0 : index
    %c0_12 = arith.constant 0 : index
    %10 = vector.load %arg6[%c0_11, %c0_12] : memref<16x384xbf16, #tpu.memory_space<vmem>>, vector<16x384xbf16>
    %11 = arith.extf %10 : vector<16x384xbf16> to vector<16x384xf32>
    %cst_13 = arith.constant dense<0.000000e+00> : vector<384xf32>
    %12 = vector.multi_reduction <add>, %5, %cst_13 [0] : vector<192x384xf32> to vector<384xf32>
    %13 = vector.shape_cast %12 : vector<384xf32> to vector<1x384xf32>
    %14 = arith.mulf %5, %5 : vector<192x384xf32>
    %cst_14 = arith.constant dense<0.000000e+00> : vector<384xf32>
    %15 = vector.multi_reduction <add>, %14, %cst_14 [0] : vector<192x384xf32> to vector<384xf32>
    %16 = vector.shape_cast %15 : vector<384xf32> to vector<1x384xf32>
    %cst_15 = arith.constant dense<0.000000e+00> : vector<1x16xf32>
    %17 = tpu.matmul %13, %9, %cst_15 {dimension_numbers = #tpu.dot_dimension_numbers<[1], [0], [0], [1], [0, 0, 1, 1], [], []>} : vector<1x384xf32>, vector<384x16xf32>, vector<1x16xf32> -> vector<1x16xf32>
    %cst_16 = arith.constant 4.608000e+03 : f32
    %18 = vector.broadcast %cst_16 : f32 to vector<1x16xf32>
    %19 = arith.divf %17, %18 : vector<1x16xf32>
    %cst_17 = arith.constant dense<0.000000e+00> : vector<1x16xf32>
    %20 = tpu.matmul %16, %9, %cst_17 {dimension_numbers = #tpu.dot_dimension_numbers<[1], [0], [0], [1], [0, 0, 1, 1], [], []>} : vector<1x384xf32>, vector<384x16xf32>, vector<1x16xf32> -> vector<1x16xf32>
    %cst_18 = arith.constant 4.608000e+03 : f32
    %21 = vector.broadcast %cst_18 : f32 to vector<1x16xf32>
    %22 = arith.divf %20, %21 : vector<1x16xf32>
    %23 = arith.mulf %19, %19 : vector<1x16xf32>
    %24 = arith.subf %22, %23 : vector<1x16xf32>
    %cst_19 = arith.constant 9.99999974E-6 : f32
    %25 = vector.broadcast %cst_19 : f32 to vector<1x16xf32>
    %26 = arith.addf %24, %25 : vector<1x16xf32>
    %27 = math.rsqrt %26 : vector<1x16xf32>
    %28 = arith.mulf %6, %27 : vector<1x16xf32>
    %29 = arith.mulf %19, %28 : vector<1x16xf32>
    %30 = arith.subf %7, %29 : vector<1x16xf32>
    %cst_20 = arith.constant dense<0.000000e+00> : vector<1x384xf32>
    %31 = tpu.matmul %28, %11, %cst_20 {dimension_numbers = #tpu.dot_dimension_numbers<[1], [0], [0], [1], [0, 0, 1, 1], [], []>} : vector<1x16xf32>, vector<16x384xf32>, vector<1x384xf32> -> vector<1x384xf32>
    %cst_21 = arith.constant dense<0.000000e+00> : vector<1x384xf32>
    %32 = tpu.matmul %30, %11, %cst_21 {dimension_numbers = #tpu.dot_dimension_numbers<[1], [0], [0], [1], [0, 0, 1, 1], [], []>} : vector<1x16xf32>, vector<16x384xf32>, vector<1x384xf32> -> vector<1x384xf32>
    %33 = vector.broadcast %31 : vector<1x384xf32> to vector<192x384xf32>
    %34 = arith.mulf %5, %33 : vector<192x384xf32>
    %35 = vector.broadcast %32 : vector<1x384xf32> to vector<192x384xf32>
    %36 = arith.addf %34, %35 : vector<192x384xf32>
    %cst_22 = arith.constant 0.000000e+00 : f32
    %37 = vector.broadcast %cst_22 : f32 to vector<192x384xf32>
    %38 = arith.maximumf %36, %37 : vector<192x384xf32>
    %c0_23 = arith.constant 0 : index
    %c0_24 = arith.constant 0 : index
    %39 = vector.load %arg7[%c0_23, %c0_24] : memref<384x192xbf16, #tpu.memory_space<vmem>>, vector<384x192xbf16>
    %40 = arith.extf %39 : vector<384x192xbf16> to vector<384x192xf32>
    %cst_25 = arith.constant dense<0.000000e+00> : vector<192x192xf32>
    %41 = tpu.matmul %38, %40, %cst_25 {dimension_numbers = #tpu.dot_dimension_numbers<[1], [0], [0], [1], [0, 0, 1, 1], [], []>} : vector<192x384xf32>, vector<384x192xf32>, vector<192x192xf32> -> vector<192x192xf32>
    %c0_26 = arith.constant 0 : index
    %c0_27 = arith.constant 0 : index
    %42 = vector.load %arg8[%c0_26, %c0_27] : memref<320x192xbf16, #tpu.memory_space<vmem>>, vector<320x192xbf16>
    %43 = arith.extf %42 : vector<320x192xbf16> to vector<320x192xf32>
    %cst_28 = arith.constant dense<0.000000e+00> : vector<320x192xf32>
    %44 = tpu.matmul %43, %41, %cst_28 {dimension_numbers = #tpu.dot_dimension_numbers<[1], [0], [0], [1], [0, 0, 1, 1], [], []>} : vector<320x192xf32>, vector<192x192xf32>, vector<320x192xf32> -> vector<320x192xf32>
    %45 = vector.extract_strided_slice %44 {offsets = [0, 0], sizes = [64, 192], strides = [1, 1]} : vector<320x192xf32> to vector<64x192xf32>
    %c0_29 = arith.constant 0 : index
    %c0_30 = arith.constant 0 : index
    %c0_31 = arith.constant 0 : index
    %46 = vector.load %arg9[%c0_29, %c0_30, %c0_31] : memref<5x192x128xf32, #tpu.memory_space<vmem>>, vector<1x192x128xf32>
    %47 = vector.shape_cast %46 : vector<1x192x128xf32> to vector<192x128xf32>
    %cst_32 = arith.constant dense<0.000000e+00> : vector<64x128xf32>
    %48 = tpu.matmul %45, %47, %cst_32 {dimension_numbers = #tpu.dot_dimension_numbers<[1], [0], [0], [1], [0, 0, 1, 1], [], []>} : vector<64x192xf32>, vector<192x128xf32>, vector<64x128xf32> -> vector<64x128xf32>
    %49 = vector.extract_strided_slice %44 {offsets = [64, 0], sizes = [64, 192], strides = [1, 1]} : vector<320x192xf32> to vector<64x192xf32>
    %c1 = arith.constant 1 : index
    %c0_33 = arith.constant 0 : index
    %c0_34 = arith.constant 0 : index
    %50 = vector.load %arg9[%c1, %c0_33, %c0_34] : memref<5x192x128xf32, #tpu.memory_space<vmem>>, vector<1x192x128xf32>
    %51 = vector.shape_cast %50 : vector<1x192x128xf32> to vector<192x128xf32>
    %cst_35 = arith.constant dense<0.000000e+00> : vector<64x128xf32>
    %52 = tpu.matmul %49, %51, %cst_35 {dimension_numbers = #tpu.dot_dimension_numbers<[1], [0], [0], [1], [0, 0, 1, 1], [], []>} : vector<64x192xf32>, vector<192x128xf32>, vector<64x128xf32> -> vector<64x128xf32>
    %53 = arith.addf %48, %52 : vector<64x128xf32>
    %54 = vector.extract_strided_slice %44 {offsets = [128, 0], sizes = [64, 192], strides = [1, 1]} : vector<320x192xf32> to vector<64x192xf32>
    %c2 = arith.constant 2 : index
    %c0_36 = arith.constant 0 : index
    %c0_37 = arith.constant 0 : index
    %55 = vector.load %arg9[%c2, %c0_36, %c0_37] : memref<5x192x128xf32, #tpu.memory_space<vmem>>, vector<1x192x128xf32>
    %56 = vector.shape_cast %55 : vector<1x192x128xf32> to vector<192x128xf32>
    %cst_38 = arith.constant dense<0.000000e+00> : vector<64x128xf32>
    %57 = tpu.matmul %54, %56, %cst_38 {dimension_numbers = #tpu.dot_dimension_numbers<[1], [0], [0], [1], [0, 0, 1, 1], [], []>} : vector<64x192xf32>, vector<192x128xf32>, vector<64x128xf32> -> vector<64x128xf32>
    %58 = arith.addf %53, %57 : vector<64x128xf32>
    %59 = vector.extract_strided_slice %44 {offsets = [192, 0], sizes = [64, 192], strides = [1, 1]} : vector<320x192xf32> to vector<64x192xf32>
    %c3 = arith.constant 3 : index
    %c0_39 = arith.constant 0 : index
    %c0_40 = arith.constant 0 : index
    %60 = vector.load %arg9[%c3, %c0_39, %c0_40] : memref<5x192x128xf32, #tpu.memory_space<vmem>>, vector<1x192x128xf32>
    %61 = vector.shape_cast %60 : vector<1x192x128xf32> to vector<192x128xf32>
    %cst_41 = arith.constant dense<0.000000e+00> : vector<64x128xf32>
    %62 = tpu.matmul %59, %61, %cst_41 {dimension_numbers = #tpu.dot_dimension_numbers<[1], [0], [0], [1], [0, 0, 1, 1], [], []>} : vector<64x192xf32>, vector<192x128xf32>, vector<64x128xf32> -> vector<64x128xf32>
    %63 = arith.addf %58, %62 : vector<64x128xf32>
    %64 = vector.extract_strided_slice %44 {offsets = [256, 0], sizes = [64, 192], strides = [1, 1]} : vector<320x192xf32> to vector<64x192xf32>
    %c4 = arith.constant 4 : index
    %c0_42 = arith.constant 0 : index
    %c0_43 = arith.constant 0 : index
    %65 = vector.load %arg9[%c4, %c0_42, %c0_43] : memref<5x192x128xf32, #tpu.memory_space<vmem>>, vector<1x192x128xf32>
    %66 = vector.shape_cast %65 : vector<1x192x128xf32> to vector<192x128xf32>
    %cst_44 = arith.constant dense<0.000000e+00> : vector<64x128xf32>
    %67 = tpu.matmul %64, %66, %cst_44 {dimension_numbers = #tpu.dot_dimension_numbers<[1], [0], [0], [1], [0, 0, 1, 1], [], []>} : vector<64x192xf32>, vector<192x128xf32>, vector<64x128xf32> -> vector<64x128xf32>
    %68 = arith.addf %63, %67 : vector<64x128xf32>
    %c0_45 = arith.constant 0 : index
    %c0_46 = arith.constant 0 : index
    %69 = vector.load %arg10[%c0_45, %c0_46] : memref<1x128xf32, #tpu.memory_space<vmem>>, vector<1x128xf32>
    %70 = vector.broadcast %69 : vector<1x128xf32> to vector<64x128xf32>
    %71 = arith.addf %68, %70 : vector<64x128xf32>
    %c0_47 = arith.constant 0 : index
    %c0_48 = arith.constant 0 : index
    %72 = vector.load %arg11[%c0_47, %c0_48] : memref<1x16xf32, #tpu.memory_space<vmem>>, vector<1x16xf32>
    %c0_49 = arith.constant 0 : index
    %c0_50 = arith.constant 0 : index
    %73 = vector.load %arg12[%c0_49, %c0_50] : memref<1x16xf32, #tpu.memory_space<vmem>>, vector<1x16xf32>
    %c0_51 = arith.constant 0 : index
    %c0_52 = arith.constant 0 : index
    %74 = vector.load %arg13[%c0_51, %c0_52] : memref<128x16xbf16, #tpu.memory_space<vmem>>, vector<128x16xbf16>
    %75 = arith.extf %74 : vector<128x16xbf16> to vector<128x16xf32>
    %c0_53 = arith.constant 0 : index
    %c0_54 = arith.constant 0 : index
    %76 = vector.load %arg14[%c0_53, %c0_54] : memref<16x128xbf16, #tpu.memory_space<vmem>>, vector<16x128xbf16>
    %77 = arith.extf %76 : vector<16x128xbf16> to vector<16x128xf32>
    %cst_55 = arith.constant dense<0.000000e+00> : vector<128xf32>
    %78 = vector.multi_reduction <add>, %71, %cst_55 [0] : vector<64x128xf32> to vector<128xf32>
    %79 = vector.shape_cast %78 : vector<128xf32> to vector<1x128xf32>
    %80 = arith.mulf %71, %71 : vector<64x128xf32>
    %cst_56 = arith.constant dense<0.000000e+00> : vector<128xf32>
    %81 = vector.multi_reduction <add>, %80, %cst_56 [0] : vector<64x128xf32> to vector<128xf32>
    %82 = vector.shape_cast %81 : vector<128xf32> to vector<1x128xf32>
    %cst_57 = arith.constant dense<0.000000e+00> : vector<1x16xf32>
    %83 = tpu.matmul %79, %75, %cst_57 {dimension_numbers = #tpu.dot_dimension_numbers<[1], [0], [0], [1], [0, 0, 1, 1], [], []>} : vector<1x128xf32>, vector<128x16xf32>, vector<1x16xf32> -> vector<1x16xf32>
    %cst_58 = arith.constant 5.120000e+02 : f32
    %84 = vector.broadcast %cst_58 : f32 to vector<1x16xf32>
    %85 = arith.divf %83, %84 : vector<1x16xf32>
    %cst_59 = arith.constant dense<0.000000e+00> : vector<1x16xf32>
    %86 = tpu.matmul %82, %75, %cst_59 {dimension_numbers = #tpu.dot_dimension_numbers<[1], [0], [0], [1], [0, 0, 1, 1], [], []>} : vector<1x128xf32>, vector<128x16xf32>, vector<1x16xf32> -> vector<1x16xf32>
    %cst_60 = arith.constant 5.120000e+02 : f32
    %87 = vector.broadcast %cst_60 : f32 to vector<1x16xf32>
    %88 = arith.divf %86, %87 : vector<1x16xf32>
    %89 = arith.mulf %85, %85 : vector<1x16xf32>
    %90 = arith.subf %88, %89 : vector<1x16xf32>
    %cst_61 = arith.constant 9.99999974E-6 : f32
    %91 = vector.broadcast %cst_61 : f32 to vector<1x16xf32>
    %92 = arith.addf %90, %91 : vector<1x16xf32>
    %93 = math.rsqrt %92 : vector<1x16xf32>
    %94 = arith.mulf %72, %93 : vector<1x16xf32>
    %95 = arith.mulf %85, %94 : vector<1x16xf32>
    %96 = arith.subf %73, %95 : vector<1x16xf32>
    %cst_62 = arith.constant dense<0.000000e+00> : vector<1x128xf32>
    %97 = tpu.matmul %94, %77, %cst_62 {dimension_numbers = #tpu.dot_dimension_numbers<[1], [0], [0], [1], [0, 0, 1, 1], [], []>} : vector<1x16xf32>, vector<16x128xf32>, vector<1x128xf32> -> vector<1x128xf32>
    %cst_63 = arith.constant dense<0.000000e+00> : vector<1x128xf32>
    %98 = tpu.matmul %96, %77, %cst_63 {dimension_numbers = #tpu.dot_dimension_numbers<[1], [0], [0], [1], [0, 0, 1, 1], [], []>} : vector<1x16xf32>, vector<16x128xf32>, vector<1x128xf32> -> vector<1x128xf32>
    %99 = vector.broadcast %97 : vector<1x128xf32> to vector<64x128xf32>
    %100 = arith.mulf %71, %99 : vector<64x128xf32>
    %101 = vector.broadcast %98 : vector<1x128xf32> to vector<64x128xf32>
    %102 = arith.addf %100, %101 : vector<64x128xf32>
    %cst_64 = arith.constant 0.000000e+00 : f32
    %103 = vector.broadcast %cst_64 : f32 to vector<64x128xf32>
    %104 = arith.maximumf %102, %103 : vector<64x128xf32>
    %c0_65 = arith.constant 0 : index
    %c0_66 = arith.constant 0 : index
    %105 = vector.load %arg15[%c0_65, %c0_66] : memref<32x64xbf16, #tpu.memory_space<vmem>>, vector<32x64xbf16>
    %106 = arith.extf %105 : vector<32x64xbf16> to vector<32x64xf32>
    %cst_67 = arith.constant dense<0.000000e+00> : vector<32x128xf32>
    %107 = tpu.matmul %106, %104, %cst_67 {dimension_numbers = #tpu.dot_dimension_numbers<[1], [0], [0], [1], [0, 0, 1, 1], [], []>} : vector<32x64xf32>, vector<64x128xf32>, vector<32x128xf32> -> vector<32x128xf32>
    %108 = vector.extract_strided_slice %107 {offsets = [0, 0], sizes = [8, 128], strides = [1, 1]} : vector<32x128xf32> to vector<8x128xf32>
    %109 = vector.extract_strided_slice %107 {offsets = [8, 0], sizes = [8, 128], strides = [1, 1]} : vector<32x128xf32> to vector<8x128xf32>
    %110 = vector.extract_strided_slice %107 {offsets = [16, 0], sizes = [8, 128], strides = [1, 1]} : vector<32x128xf32> to vector<8x128xf32>
    %111 = vector.extract_strided_slice %107 {offsets = [24, 0], sizes = [8, 128], strides = [1, 1]} : vector<32x128xf32> to vector<8x128xf32>
    %112 = tpu.concatenate %108, %109, %110, %111 in 1 : vector<8x128xf32>, vector<8x128xf32>, vector<8x128xf32>, vector<8x128xf32> -> vector<8x512xf32>
    %c0_68 = arith.constant 0 : index
    %c0_69 = arith.constant 0 : index
    %113 = vector.load %arg16[%c0_68, %c0_69] : memref<512x100xf32, #tpu.memory_space<vmem>>, vector<512x100xf32>
    %cst_70 = arith.constant dense<0.000000e+00> : vector<8x100xf32>
    %114 = tpu.matmul %112, %113, %cst_70 {dimension_numbers = #tpu.dot_dimension_numbers<[1], [0], [0], [1], [0, 0, 1, 1], [], []>} : vector<8x512xf32>, vector<512x100xf32>, vector<8x100xf32> -> vector<8x100xf32>
    %c0_71 = arith.constant 0 : index
    %c0_72 = arith.constant 0 : index
    %115 = vector.load %arg17[%c0_71, %c0_72] : memref<1x100xf32, #tpu.memory_space<vmem>>, vector<1x100xf32>
    %116 = vector.broadcast %115 : vector<1x100xf32> to vector<8x100xf32>
    %117 = arith.addf %114, %116 : vector<8x100xf32>
    %cst_73 = arith.constant dense<0.000000e+00> : vector<100xf32>
    %118 = vector.multi_reduction <add>, %117, %cst_73 [0] : vector<8x100xf32> to vector<100xf32>
    %119 = vector.shape_cast %118 : vector<100xf32> to vector<1x100xf32>
    %cst_74 = arith.constant 8.000000e+00 : f32
    %120 = vector.broadcast %cst_74 : f32 to vector<1x100xf32>
    %121 = arith.divf %119, %120 : vector<1x100xf32>
    %122 = arith.mulf %117, %117 : vector<8x100xf32>
    %cst_75 = arith.constant dense<0.000000e+00> : vector<100xf32>
    %123 = vector.multi_reduction <add>, %122, %cst_75 [0] : vector<8x100xf32> to vector<100xf32>
    %124 = vector.shape_cast %123 : vector<100xf32> to vector<1x100xf32>
    %cst_76 = arith.constant 8.000000e+00 : f32
    %125 = vector.broadcast %cst_76 : f32 to vector<1x100xf32>
    %126 = arith.divf %124, %125 : vector<1x100xf32>
    %127 = arith.mulf %121, %121 : vector<1x100xf32>
    %128 = arith.subf %126, %127 : vector<1x100xf32>
    %129 = vector.broadcast %121 : vector<1x100xf32> to vector<8x100xf32>
    %130 = arith.subf %117, %129 : vector<8x100xf32>
    %cst_77 = arith.constant 9.99999974E-6 : f32
    %131 = vector.broadcast %cst_77 : f32 to vector<1x100xf32>
    %132 = arith.addf %128, %131 : vector<1x100xf32>
    %133 = math.rsqrt %132 : vector<1x100xf32>
    %134 = vector.broadcast %133 : vector<1x100xf32> to vector<8x100xf32>
    %135 = arith.mulf %130, %134 : vector<8x100xf32>
    %c0_78 = arith.constant 0 : index
    %c0_79 = arith.constant 0 : index
    %136 = vector.load %arg18[%c0_78, %c0_79] : memref<1x100xf32, #tpu.memory_space<vmem>>, vector<1x100xf32>
    %137 = vector.broadcast %136 : vector<1x100xf32> to vector<8x100xf32>
    %138 = arith.mulf %135, %137 : vector<8x100xf32>
    %c0_80 = arith.constant 0 : index
    %c0_81 = arith.constant 0 : index
    %139 = vector.load %arg19[%c0_80, %c0_81] : memref<1x100xf32, #tpu.memory_space<vmem>>, vector<1x100xf32>
    %140 = vector.broadcast %139 : vector<1x100xf32> to vector<8x100xf32>
    %141 = arith.addf %138, %140 : vector<8x100xf32>
    %cst_82 = arith.constant 0.000000e+00 : f32
    %142 = vector.broadcast %cst_82 : f32 to vector<8x100xf32>
    %143 = arith.maximumf %141, %142 : vector<8x100xf32>
    %c0_83 = arith.constant 0 : index
    %c0_84 = arith.constant 0 : index
    %144 = vector.load %arg20[%c0_83, %c0_84] : memref<100x10xf32, #tpu.memory_space<vmem>>, vector<100x10xf32>
    %cst_85 = arith.constant dense<0.000000e+00> : vector<8x10xf32>
    %145 = tpu.matmul %143, %144, %cst_85 {dimension_numbers = #tpu.dot_dimension_numbers<[1], [0], [0], [1], [0, 0, 1, 1], [], []>} : vector<8x100xf32>, vector<100x10xf32>, vector<8x10xf32> -> vector<8x10xf32>
    %c0_86 = arith.constant 0 : index
    %c0_87 = arith.constant 0 : index
    %146 = vector.load %arg21[%c0_86, %c0_87] : memref<1x10xf32, #tpu.memory_space<vmem>>, vector<1x10xf32>
    %147 = vector.broadcast %146 : vector<1x10xf32> to vector<8x10xf32>
    %148 = arith.addf %145, %147 : vector<8x10xf32>
    %c0_88 = arith.constant 0 : index
    %c0_89 = arith.constant 0 : index
    %149 = vector.load %arg22[%c0_88, %c0_89] : memref<8x10xf32, #tpu.memory_space<vmem>>, vector<8x10xf32>
    tpu.vector_store %arg22[%c0_88, %c0_89], %148 {strides = array<i32>} : memref<8x10xf32, #tpu.memory_space<vmem>>, vector<8x10xf32>,
    return
  }
}

</mosaic_0001>

<bundles_post_ra>
// kernel: network_b_forward.1
= control target key start
LH: loop header
LB: loop body
LE: loop exit
PB: predicated region body
PF: predicated region fallthrough
CT: control target
= control target key end

     0   :  { %s9282_s0 = inlined_call_operand.vmem [shape: f32[192,140], index: 0, kind: input, shape index: {}]   ;;  %s9283_s1 = inlined_call_operand.vmem [shape: f32[140,384], index: 1, kind: input, shape index: {}]   ;;  %s9284_s2 = inlined_call_operand.vmem [shape: f32[1,384], index: 2, kind: input, shape index: {}]   ;;  %s9285_s3 = inlined_call_operand.vmem [shape: f32[1,16], index: 3, kind: input, shape index: {}]   ;;  %s9286_s4 = inlined_call_operand.vmem [shape: f32[1,16], index: 4, kind: input, shape index: {}]   ;;  %s9287_s5 = inlined_call_operand.vmem [shape: bf16[384,16], index: 5, kind: input, shape index: {}]   ;;  %s9288_s6 = inlined_call_operand.vmem [shape: bf16[16,384], index: 6, kind: input, shape index: {}]   ;;  %s9289_s7 = inlined_call_operand.vmem [shape: bf16[384,192], index: 7, kind: input, shape index: {}]   ;;  %s9290_s8 = inlined_call_operand.vmem [shape: bf16[320,192], index: 8, kind: input, shape index: {}]   ;;  %s9291_s9 = inlined_call_operand.vmem [shape: f32[5,192,128], index: 9, kind: input, shape index: {}]   ;;  %s9292_s10 = inlined_call_operand.vmem [shape: f32[1,128], index: 10, kind: input, shape index: {}]   ;;  %s9293_s11 = inlined_call_operand.vmem [shape: f32[1,16], index: 11, kind: input, shape index: {}]   ;;  %s9294_s12 = inlined_call_operand.vmem [shape: f32[1,16], index: 12, kind: input, shape index: {}]   ;;  %s9295_s13 = inlined_call_operand.vmem [shape: bf16[128,16], index: 13, kind: input, shape index: {}]   ;;  %s9296_s14 = inlined_call_operand.vmem [shape: bf16[16,128], index: 14, kind: input, shape index: {}]   ;;  %s9297_s15 = inlined_call_operand.vmem [shape: bf16[32,64], index: 15, kind: input, shape index: {}]   ;;  %s9298_s16 = inlined_call_operand.vmem [shape: f32[512,100], index: 16, kind: input, shape index: {}]   ;;  %s9299_s17 = inlined_call_operand.vmem [shape: f32[1,100], index: 17, kind: input, shape index: {}]   ;;  %s9300_s18 = inlined_call_operand.vmem [shape: f32[1,100], index: 18, kind: input, shape index: {}]   ;;  %s9301_s19 = inlined_call_operand.vmem [shape: f32[1,100], index: 19, kind: input, shape index: {}]   ;;  %s9302_s20 = inlined_call_operand.vmem [shape: f32[100,10], index: 20, kind: input, shape index: {}]   ;;  %s9303_s21 = inlined_call_operand.vmem [shape: f32[1,10], index: 21, kind: input, shape index: {}]   ;;  %s9304_s22 = inlined_call_operand.hbm [shape: f32[8,10], index: 22, kind: output, shape index: {}]  }
   0x1   :  { %9376 = sst [smem:[#allocation65_spill]] %s9282_s0 }
   0x2   :  { %9377 = sst [smem:[#allocation66_spill]] %s9283_s1 }
   0x3   :  { %9378 = sst [smem:[#allocation67_spill]] %s9284_s2 }
   0x4   :  { %9379 = sst [smem:[#allocation68_spill]] %s9285_s3 }
   0x5   :  { %9380 = sst [smem:[#allocation69_spill]] %s9286_s4 }
   0x6   :  { %9381 = sst [smem:[#allocation70_spill]] %s9287_s5 }
   0x7   :  { %9382 = sst [smem:[#allocation71_spill]] %s9288_s6 }
   0x8   :  { %s9383_s29 = sld [smem:[#allocation66_spill]]  ;;  %v9311_v3 = vmov 0.0|0.0   ;;  %vm191_vm0 = vcmask 97280   ;;  %s9384_s24 = sld [smem:[#allocation65_spill]]  ;;  %vm264_vm1 = vcmask 1043456   ;;  %vm6389_vm2 = vmmov 1  }
   0x9   :  { %5545 = vmatprep.subr.bf16.mxu1 %v9311_v3  ;;  %vm5540_vm3 = vmpackc.low %vm264_vm1, %vm6389_vm2 }
   0xe   :  { %v121_v0 = vld [vmem:[%s9383_s29 + $0x8] sm:$0xff]  ;;  %v124_v1 = vld [vmem:[%s9383_s29 + $0x20] sm:$0xff]  ;;  %v122_v2 = vld [vmem:[%s9383_s29 + $0x10] sm:$0xff] }
   0xf   :  { %v5507_v4 = vpack.c.bf16 %v124_v1, %v121_v0  ;;  %v125_v5 = vld [vmem:[%s9383_s29 + $0x28] sm:$0xff]  ;;  %v120_v6 = vld [vmem:[%s9383_s29] sm:$0xff]  ;;  %v123_v7 = vld [vmem:[%s9383_s29 + $0x18] sm:$0xff] }
  0x10   :  { %v5546_v8 = vpack.c.bf16 %v125_v5, %v122_v2  ;;  %v5509_v9 = vpack.c.bf16 %v123_v7, %v120_v6  ;;  %v127_v10 = vld [vmem:[%s9383_s29 + $0x38] sm:$0xff]  ;;  %v130_v11 = vld [vmem:[%s9383_s29 + $0x50] sm:$0xff]  ;;  %v128_v12 = vld [vmem:[%s9383_s29 + $0x40] sm:$0xff] }
  0x11   :  { %5508 = vmatprep.subr.bf16.mxu0 %v5507_v4  ;;  %v5511_v13 = vpack.c.bf16 %v130_v11, %v127_v10  ;;  %v131_v14 = vld [vmem:[%s9383_s29 + $0x58] sm:$0xff]  ;;  %v126_v15 = vld [vmem:[%s9383_s29 + $0x30] sm:$0xff]  ;;  %v129_v16 = vld [vmem:[%s9383_s29 + $0x48] sm:$0xff] }
  0x12   :  { %5547 = vmatpush1.bf16.msra.mxu1 %v5546_v8  ;;  %5510 = vmatpush1.bf16.msra.mxu0 %v5509_v9  ;;  %v5549_v17 = vpack.c.bf16 %v131_v14, %v128_v12  ;;  %v5513_v18 = vpack.c.bf16 %v129_v16, %v126_v15  ;;  %v133_v19 = vld [vmem:[%s9383_s29 + $0x68] sm:$0xff]  ;;  %v136_v20 = vld [vmem:[%s9383_s29 + $0x80] sm:$0xff]  ;;  %v134_v21 = vld [vmem:[%s9383_s29 + $0x70] sm:$0xff] }
  0x13   :  { %5548 = vmatprep.subr.bf16.mxu1 %v9311_v3  ;;  %5512 = vmatprep.subr.bf16.mxu0 %v5511_v13  ;;  %v5515_v22 = vpack.c.bf16 %v136_v20, %v133_v19  ;;  %v137_v23 = vld [vmem:[%s9383_s29 + $0x88] sm:$0xff]  ;;  %v132_v24 = vld [vmem:[%s9383_s29 + $0x60] sm:$0xff]  ;;  %v135_v25 = vld [vmem:[%s9383_s29 + $0x78] sm:$0xff] }
  0x14   :  { %v139_v26 = vld [vmem:[%s9383_s29 + $0x98] sm:$0xff]  ;;  %v142_v27 = vld [vmem:[%s9383_s29 + $0xb0] sm:$0xff]  ;;  %v5552_v28 = vpack.c.bf16 %v137_v23, %v134_v21  ;;  %v5517_v29 = vpack.c.bf16 %v135_v25, %v132_v24  ;;  %v140_v30 = vld [vmem:[%s9383_s29 + $0xa0] sm:$0xff] }
  0x15   :  { %v5519_v31 = vpack.c.bf16 %v142_v27, %v139_v26  ;;  %v143_v32 = vld [vmem:[%s9383_s29 + $0xb8] sm:$0xff]  ;;  %v138_v33 = vld [vmem:[%s9383_s29 + $0x90] sm:$0xff]  ;;  %v141_v34 = vld [vmem:[%s9383_s29 + $0xa8] sm:$0xff] }
  0x16   :  { %5550 = vmatpush1.bf16.msra.mxu1 %v5549_v17  ;;  %5514 = vmatpush1.bf16.msra.mxu0 %v5513_v18  ;;  %v145_v35 = vld [vmem:[%s9383_s29 + $0xc8] sm:$0xff]  ;;  %v148_v36 = vld [vmem:[%s9383_s29 + $0xe0] sm:$0xff]  ;;  %v5555_v37 = vpack.c.bf16 %v143_v32, %v140_v30  ;;  %v5521_v38 = vpack.c.bf16 %v141_v34, %v138_v33  ;;  %v146_v39 = vld [vmem:[%s9383_s29 + $0xd0] sm:$0xff] }
  0x17   :  { %5551 = vmatprep.subr.bf16.mxu1 %v9311_v3  ;;  %5516 = vmatprep.subr.bf16.mxu0 %v5515_v22  ;;  %v5523_v40 = vpack.c.bf16 %v148_v36, %v145_v35  ;;  %v149_v41 = vld [vmem:[%s9383_s29 + $0xe8] sm:$0xff]  ;;  %v144_v42 = vld [vmem:[%s9383_s29 + $0xc0] sm:$0xff]  ;;  %v147_v43 = vld [vmem:[%s9383_s29 + $0xd8] sm:$0xff] }
  0x18   :  { %v151_v44 = vld [vmem:[%s9383_s29 + $0xf8] sm:$0xff]  ;;  %v154_v45 = vld [vmem:[%s9383_s29 + $0x110] sm:$0xff]  ;;  %v5558_v46 = vpack.c.bf16 %v149_v41, %v146_v39  ;;  %v5525_v47 = vpack.c.bf16 %v147_v43, %v144_v42  ;;  %v152_v48 = vld [vmem:[%s9383_s29 + $0x100] sm:$0xff] }
  0x19   :  { %v5527_v49 = vpack.c.bf16 %v154_v45, %v151_v44  ;;  %v155_v50 = vld [vmem:[%s9383_s29 + $0x118] sm:$0xff]  ;;  %v150_v51 = vld [vmem:[%s9383_s29 + $0xf0] sm:$0xff]  ;;  %v153_v52 = vld [vmem:[%s9383_s29 + $0x108] sm:$0xff] }
  0x1a   :  { %5553 = vmatpush1.bf16.msra.mxu1 %v5552_v28  ;;  %5518 = vmatpush1.bf16.msra.mxu0 %v5517_v29  ;;  %v157_v53 = vld [vmem:[%s9383_s29 + $0x128] sm:$0xff]  ;;  %v160_v54 = vld [vmem:[%s9383_s29 + $0x140] sm:$0xff]  ;;  %v5561_v56 = vpack.c.bf16 %v155_v50, %v152_v48  ;;  %v5529_v57 = vpack.c.bf16 %v153_v52, %v150_v51  ;;  %v158_v58 = vld [vmem:[%s9383_s29 + $0x130] sm:$0xff] }
  0x1b   :  { %5554 = vmatprep.subr.bf16.mxu1 %v9311_v3  ;;  %5520 = vmatprep.subr.bf16.mxu0 %v5519_v31  ;;  %v73_v55 = vld [vmem:[%s9384_s24 + $0x8] sm:$0xff]  ;;  %v5531_v59 = vpack.c.bf16 %v160_v54, %v157_v53  ;;  %v156_v61 = vld [vmem:[%s9383_s29 + $0x120] sm:$0xff]  ;;  %v159_v62 = vld [vmem:[%s9383_s29 + $0x138] sm:$0xff] }
  0x1c   :  { %4654 = vmatprep.mubr.msk.f32.mxu1 %vm191_vm0, %v73_v55  ;;  %4629 = vmatprep.mubr.msk.f32.mxu0 %vm191_vm0, %v73_v55  ;;  %v161_v60 = vld [vmem:[%s9383_s29 + $0x148] sm:$0xff]  ;;  %v163_v63 = vld [vmem:[%s9383_s29 + $0x158] sm:$0xff]  ;;  %v166_v0 = vld [vmem:[%s9383_s29 + $0x170] sm:$0xff]  ;;  %v5533_v2 = vpack.c.bf16 %v159_v62, %v156_v61 }
  0x1d   :  { %v5564_v1 = vpack.c.bf16 %v161_v60, %v158_v58  ;;  %v164_v4 = vld [vmem:[%s9383_s29 + $0x160] sm:$0xff]  ;;  %v5535_v5 = vpack.c.bf16 %v166_v0, %v163_v63  ;;  %v167_v6 = vld [vmem:[%s9383_s29 + $0x178] sm:$0xff]  ;;  %v162_v7 = vld [vmem:[%s9383_s29 + $0x150] sm:$0xff] }
  0x1e   :  { %5556 = vmatpush1.bf16.msra.mxu1 %v5555_v37  ;;  %5522 = vmatpush1.bf16.msra.mxu0 %v5521_v38  ;;  %v165_v8 = vld [vmem:[%s9383_s29 + $0x168] sm:$0xff]  ;;  %v172_v10 = vld [vmem:[%s9383_s29 + $0x1a0] sm:$0xf]  ;;  %v5567_v11 = vpack.c.bf16 %v167_v6, %v164_v4  ;;  %v170_v13 = vld [vmem:[%s9383_s29 + $0x190] sm:$0xff] }
  0x1f   :  { %5557 = vmatprep.subr.bf16.mxu1 %v9311_v3  ;;  %5524 = vmatprep.subr.bf16.mxu0 %v5523_v40  ;;  %v169_v9 = vld [vmem:[%s9383_s29 + $0x188] sm:$0xff]  ;;  %v5537_v12 = vpack.c.bf16 %v165_v8, %v162_v7  ;;  %v168_v16 = vld [vmem:[%s9383_s29 + $0x180] sm:$0xff]  ;;  %v171_v17 = vld [vmem:[%s9383_s29 + $0x198] sm:$0xf] }
  0x20   :  { %v5539_v14 = vpack.c.bf16 %v172_v10, %v169_v9  ;;  %v173_v15 = vld [vmem:[%s9383_s29 + $0x1a8] sm:$0xf]  ;;  %v5542_v19 = vpack.c.bf16 %v171_v17, %v168_v16  ;;  %v72_v20 = vld [vmem:[%s9384_s24] sm:$0xff]  ;;  %v75_v21 = vld [vmem:[%s9384_s24 + $0x18] sm:$0xff] }
  0x21   :  { %v5570_v18 = vpack.c.bf16 %v173_v15, %v170_v13  ;;  %v74_v22 = vld [vmem:[%s9384_s24 + $0x10] sm:$0xff]  ;;  %v77_v23 = vld [vmem:[%s9384_s24 + $0x28] sm:$0xff]  ;;  %v76_v24 = vld [vmem:[%s9384_s24 + $0x20] sm:$0xff] }
  0x22   :  { %5559 = vmatpush1.bf16.msra.mxu1 %v5558_v46  ;;  %5526 = vmatpush1.bf16.msra.mxu0 %v5525_v47  ;;  %v79_v25 = vld [vmem:[%s9384_s24 + $0x38] sm:$0xff]  ;;  %v78_v26 = vld [vmem:[%s9384_s24 + $0x30] sm:$0xff]  ;;  %v81_v27 = vld [vmem:[%s9384_s24 + $0x48] sm:$0xff] }
  0x23   :  { %5560 = vmatprep.subr.bf16.mxu1 %v9311_v3  ;;  %5528 = vmatprep.subr.bf16.mxu0 %v5527_v49  ;;  %v80_v28 = vld [vmem:[%s9384_s24 + $0x40] sm:$0xff] }
  0x26   :  { %5562 = vmatpush1.bf16.msra.mxu1 %v5561_v56  ;;  %5530 = vmatpush1.bf16.msra.mxu0 %v5529_v57 }
  0x27   :  { %5563 = vmatprep.subr.bf16.mxu1 %v9311_v3  ;;  %5532 = vmatprep.subr.bf16.mxu0 %v5531_v59 }
  0x2a   :  { %5565 = vmatpush1.bf16.msra.mxu1 %v5564_v1  ;;  %5534 = vmatpush1.bf16.msra.mxu0 %v5533_v2 }
  0x2b   :  { %5566 = vmatprep.subr.bf16.mxu1 %v9311_v3  ;;  %5536 = vmatprep.subr.bf16.mxu0 %v5535_v5 }
  0x2e   :  { %5568 = vmatpush1.bf16.msra.mxu1 %v5567_v11  ;;  %5538 = vmatpush1.bf16.msra.mxu0 %v5537_v12 }
  0x2f   :  { %5569 = vmatprep.subr.bf16.mxu1 %v9311_v3  ;;  %5541 = vmatprep.subr.msk.bf16.mxu0 %vm5540_vm3, %v5539_v14 }
  0x32   :  { %5572 = vmatpush1.bf16.msk.msra.mxu1 %vm5540_vm3, %v5570_v18  ;;  %5544 = vmatpush1.bf16.msk.msra.mxu0 %vm5540_vm3, %v5542_v19 }
  0x33   :  { %5605 = vmatprep.subr.bf16.mxu1 %v9311_v3 }
  0x35   :  { %548 = vmatmul.mubr.f32.vlgmr.msra.gmra.mrb[0].mxu1 %v72_v20  ;;  %339 = vmatmul.mubr.f32.vlgmr.msra.gmra.mrb[0].mxu0 %v72_v20 }
  0x36   :  { %4655 = vmatprep.mubr.msk.f32.mxu1 %vm191_vm0, %v75_v21  ;;  %4630 = vmatprep.mubr.msk.f32.mxu0 %vm191_vm0, %v75_v21 }
  0x39   :  { %553 = vmatmul.mubr.f32.gmra.mrb[2].mxu1 %v74_v22  ;;  %345 = vmatmul.mubr.f32.gmra.mrb[2].mxu0 %v74_v22 }
  0x3a   :  { %4656 = vmatprep.mubr.msk.f32.mxu1 %vm191_vm0, %v77_v23  ;;  %4631 = vmatprep.mubr.msk.f32.mxu0 %vm191_vm0, %v77_v23 }
  0x3d   :  { %558 = vmatmul.mubr.f32.gmra.mrb[4].mxu1 %v76_v24  ;;  %351 = vmatmul.mubr.f32.gmra.mrb[4].mxu0 %v76_v24 }
  0x3e   :  { %4657 = vmatprep.mubr.msk.f32.mxu1 %vm191_vm0, %v79_v25  ;;  %4632 = vmatprep.mubr.msk.f32.mxu0 %vm191_vm0, %v79_v25 }
  0x41   :  { %563 = vmatmul.mubr.f32.gmra.mrb[6].mxu1 %v78_v26  ;;  %357 = vmatmul.mubr.f32.gmra.mrb[6].mxu0 %v78_v26 }
  0x42   :  { %4658 = vmatprep.mubr.msk.f32.mxu1 %vm191_vm0, %v81_v27  ;;  %4633 = vmatprep.mubr.msk.f32.mxu0 %vm191_vm0, %v81_v27 }
  0x43   :  { %27 = vsyncpa [#allocation3], 0  ;;  %v83_v29 = vld [vmem:[%s9384_s24 + $0x58] sm:$0xff]  ;;  %v82_v30 = vld [vmem:[%s9384_s24 + $0x50] sm:$0xff]  ;;  %s9385_s27 = sld [smem:[#allocation70_spill]]  ;;  %vm6390_vm4 = vmmov 0  }
  0x44   :  { %v85_v31 = vld [vmem:[%s9384_s24 + $0x68] sm:$0xff]  ;;  %v84_v32 = vld [vmem:[%s9384_s24 + $0x60] sm:$0xff]  ;;  %v87_v33 = vld [vmem:[%s9384_s24 + $0x78] sm:$0xff]  ;;  %s9395_s0 = sld [smem:[#allocation67_spill]]  ;;  %s9458_s1 = sld [smem:[#allocation71_spill]]  ;;  %vm1312_vm5 = vcmask 130048  }
  0x45   :  { %568 = vmatmul.mubr.f32.gmra.mrb[8].mxu1 %v80_v28  ;;  %363 = vmatmul.mubr.f32.gmra.mrb[8].mxu0 %v80_v28  ;;  %v86_v34 = vld [vmem:[%s9384_s24 + $0x70] sm:$0xff]  ;;  %v89_v35 = vld [vmem:[%s9384_s24 + $0x88] sm:$0xff]  ;;  %v88_v36 = vld [vmem:[%s9384_s24 + $0x80] sm:$0xff]  ;;  %v9309_v28 = vmov 0.0   ;;  %s9459_s28 = sld [smem:[#allocation68_spill]]  ;;  %vm2523_vm6 = vcmask 523264  }
  0x46   :  { %4659 = vmatprep.mubr.msk.f32.mxu1 %vm191_vm0, %v83_v29  ;;  %4634 = vmatprep.mubr.msk.f32.mxu0 %vm191_vm0, %v83_v29  ;;  %v91_v37 = vld [vmem:[%s9384_s24 + $0x98] sm:$0xff]  ;;  %v90_v38 = vld [vmem:[%s9384_s24 + $0x90] sm:$0xff]  ;;  %v93_v39 = vld [vmem:[%s9384_s24 + $0xa8] sm:$0xff]  ;;  %vm4473_vm7 = vcmask 818176   ;;  %s6392_s30 = smov [#allocation2]   ;;  %vm4611_vm8 = vcmask 80896  }
  0x47   :  { %v92_v40 = vld [vmem:[%s9384_s24 + $0xa0] sm:$0xff]  ;;  %v95_v41 = vld [vmem:[%s9384_s24 + $0xb8] sm:$0xff]  ;;  %v94_v42 = vld [vmem:[%s9384_s24 + $0xb0] sm:$0xff]  ;;  %s4619_s4 = sshll.u32 %s6392_s30, 4  ;;  %s4620_s4 = int_to_ptr.vmem [resolvable:$true] %s4619_s4 }
  0x48   :  { %v97_v43 = vld [vmem:[%s9384_s24 + $0xc8] sm:$0xff]  ;;  %v96_v44 = vld [vmem:[%s9384_s24 + $0xc0] sm:$0xff]  ;;  %v99_v45 = vld [vmem:[%s9384_s24 + $0xd8] sm:$0xff]  ;;  %p6369_p1 = scmp.lt.s32.totalorder %s4620_s4, %s4620_s4 }
  0x49   :  { %573 = vmatmul.mubr.f32.gmra.mrb[10].mxu1 %v82_v30  ;;  %369 = vmatmul.mubr.f32.gmra.mrb[10].mxu0 %v82_v30  ;;  %v98_v46 = vld [vmem:[%s9384_s24 + $0xd0] sm:$0xff]  ;;  %v101_v47 = vld [vmem:[%s9384_s24 + $0xe8] sm:$0xff]  ;;  %v100_v48 = vld [vmem:[%s9384_s24 + $0xe0] sm:$0xff] }
  0x4a   :  { %4660 = vmatprep.mubr.msk.f32.mxu1 %vm191_vm0, %v85_v31  ;;  %4635 = vmatprep.mubr.msk.f32.mxu0 %vm191_vm0, %v85_v31  ;;  %v103_v49 = vld [vmem:[%s9384_s24 + $0xf8] sm:$0xff]  ;;  %v102_v50 = vld [vmem:[%s9384_s24 + $0xf0] sm:$0xff]  ;;  %v105_v51 = vld [vmem:[%s9384_s24 + $0x108] sm:$0xff] }
  0x4b   :  { %v104_v52 = vld [vmem:[%s9384_s24 + $0x100] sm:$0xff]  ;;  %v107_v53 = vld [vmem:[%s9384_s24 + $0x118] sm:$0xff]  ;;  %v106_v54 = vld [vmem:[%s9384_s24 + $0x110] sm:$0xff] }
  0x4c   :  { %v109_v55 = vld [vmem:[%s9384_s24 + $0x128] sm:$0xff]  ;;  %v108_v56 = vld [vmem:[%s9384_s24 + $0x120] sm:$0xff]  ;;  %v111_v57 = vld [vmem:[%s9384_s24 + $0x138] sm:$0xff] }
  0x4d   :  { %578 = vmatmul.mubr.f32.gmra.mrb[12].mxu1 %v84_v32  ;;  %375 = vmatmul.mubr.f32.gmra.mrb[12].mxu0 %v84_v32  ;;  %v110_v58 = vld [vmem:[%s9384_s24 + $0x130] sm:$0xff]  ;;  %v113_v59 = vld [vmem:[%s9384_s24 + $0x148] sm:$0xff]  ;;  %v112_v60 = vld [vmem:[%s9384_s24 + $0x140] sm:$0xff] }
  0x4e   :  { %4661 = vmatprep.mubr.msk.f32.mxu1 %vm191_vm0, %v87_v33  ;;  %4636 = vmatprep.mubr.msk.f32.mxu0 %vm191_vm0, %v87_v33  ;;  %v115_v61 = vld [vmem:[%s9384_s24 + $0x158] sm:$0xff]  ;;  %v114_v62 = vld [vmem:[%s9384_s24 + $0x150] sm:$0xff]  ;;  %v117_v63 = vld [vmem:[%s9384_s24 + $0x168] sm:$0xff] }
  0x4f   :  { %v116_v0 = vld [vmem:[%s9384_s24 + $0x160] sm:$0xff]  ;;  %v119_v1 = vld [vmem:[%s9384_s24 + $0x178] sm:$0xff]  ;;  %v118_v2 = vld [vmem:[%s9384_s24 + $0x170] sm:$0xff] }
  0x50   :  { %v5018_v4 = vld [vmem:[%s9385_s27 + $0x40] sm:$0xff]   ;;  %v6892_v7 = vld [vmem:[%s9385_s27 + $0x48] sm:$0xff]   ;;  %v6911_v10 = vld [vmem:[%s9385_s27 + $0x50] sm:$0xff]  }
  0x51   :  { %583 = vmatmul.mubr.f32.gmra.mrb[14].mxu1 %v86_v34  ;;  %381 = vmatmul.mubr.f32.gmra.mrb[14].mxu0 %v86_v34  ;;  %v6879_v5 = vld [vmem:[%s9385_s27] sm:$0xff]   ;;  %v6898_v8 = vld [vmem:[%s9385_s27 + $0x8] sm:$0xff]   ;;  %v6917_v11 = vld [vmem:[%s9385_s27 + $0x10] sm:$0xff]  }
  0x52   :  { %4662 = vmatprep.mubr.msk.f32.mxu1 %vm191_vm0, %v89_v35  ;;  %4637 = vmatprep.mubr.msk.f32.mxu0 %vm191_vm0, %v89_v35  ;;  %v6885_v6 = vld [vmem:[%s9385_s27 + $0x80] sm:$0xff]   ;;  %v6904_v9 = vld [vmem:[%s9385_s27 + $0x88] sm:$0xff]   ;;  %v6923_v12 = vld [vmem:[%s9385_s27 + $0x90] sm:$0xff]  }
  0x53   :  { %5574 = vmatprep.subr.bf16.mxu0 %v5018_v4  ;;  %5607 = vmatpush3.bf16.msra.mxu1 %v6885_v6  ;;  %v6930_v13 = vld [vmem:[%s9385_s27 + $0x58] sm:$0xff]   ;;  %v6949_v16 = vld [vmem:[%s9385_s27 + $0x60] sm:$0xff]   ;;  %v6968_v19 = vld [vmem:[%s9385_s27 + $0x68] sm:$0xff]  }
  0x54   :  { %5576 = vmatpush3.bf16.msra.mxu0 %v6879_v5  ;;  %5608 = vmatprep.subr.bf16.mxu1 %v9311_v3  ;;  %v6936_v14 = vld [vmem:[%s9385_s27 + $0x18] sm:$0xff]   ;;  %v6955_v17 = vld [vmem:[%s9385_s27 + $0x20] sm:$0xff]   ;;  %9386 = vst [vmem:[#allocation5_spill] sm:$0xff] %v6968_v19  ;;  %v6974_v20 = vld [vmem:[%s9385_s27 + $0x28] sm:$0xff]  }
  0x55   :  { %588 = vmatmul.mubr.f32.gmra.mrb[16].mxu1 %v88_v36  ;;  %387 = vmatmul.mubr.f32.gmra.mrb[16].mxu0 %v88_v36  ;;  %v6942_v15 = vld [vmem:[%s9385_s27 + $0x98] sm:$0xff]   ;;  %v6961_v18 = vld [vmem:[%s9385_s27 + $0xa0] sm:$0xff]   ;;  %9387 = vst [vmem:[#allocation6_spill] sm:$0xff] %v6974_v20  ;;  %v6980_v21 = vld [vmem:[%s9385_s27 + $0xa8] sm:$0xff]  }
  0x56   :  { %4663 = vmatprep.mubr.msk.f32.mxu1 %vm191_vm0, %v91_v37  ;;  %4638 = vmatprep.mubr.msk.f32.mxu0 %vm191_vm0, %v91_v37  ;;  %9388 = vst [vmem:[#allocation7_spill] sm:$0xff] %v6980_v21  ;;  %v6987_v22 = vld [vmem:[%s9385_s27 + $0x70] sm:$0xff]   ;;  %v7006_v25 = vld [vmem:[%s9385_s27 + $0xb8] sm:$0xff]  }
  0x57   :  { %5578 = vmatprep.subr.bf16.mxu0 %v6892_v7  ;;  %5610 = vmatpush3.bf16.msra.mxu1 %v6904_v9  ;;  %9389 = vst [vmem:[#allocation8_spill] sm:$0xff] %v6987_v22  ;;  %v6993_v23 = vld [vmem:[%s9385_s27 + $0x30] sm:$0xff]   ;;  %9392 = vst [vmem:[#allocation11_spill] sm:$0xff] %v7006_v25  ;;  %v7012_v26 = vld [vmem:[%s9385_s27 + $0x78] sm:$0xff]  }
  0x58   :  { %5580 = vmatpush3.bf16.msra.mxu0 %v6898_v8  ;;  %5611 = vmatprep.subr.bf16.mxu1 %v9311_v3  ;;  %9390 = vst [vmem:[#allocation9_spill] sm:$0xff] %v6993_v23  ;;  %v6999_v24 = vld [vmem:[%s9385_s27 + $0xb0] sm:$0xff]   ;;  %9393 = vst [vmem:[#allocation12_spill] sm:$0xff] %v7012_v26  ;;  %v7019_v27 = vld [vmem:[%s9385_s27 + $0x38] sm:$0xff]   ;;  %s9460_s27 = sld [smem:[#allocation69_spill]] }
  0x59   :  { %593 = vmatmul.mubr.f32.gmra.mrb[18].mxu1 %v90_v38  ;;  %393 = vmatmul.mubr.f32.gmra.mrb[18].mxu0 %v90_v38  ;;  %9391 = vst [vmem:[#allocation10_spill] sm:$0xff] %v6999_v24  ;;  %9394 = vst [vmem:[#allocation13_spill] sm:$0xff] %v7019_v27 }
  0x5a   :  { %4664 = vmatprep.mubr.msk.f32.mxu1 %vm191_vm0, %v93_v39  ;;  %4639 = vmatprep.mubr.msk.f32.mxu0 %vm191_vm0, %v93_v39 }
  0x5b   :  { %5582 = vmatprep.subr.bf16.mxu0 %v6911_v10  ;;  %5613 = vmatpush3.bf16.msra.mxu1 %v6923_v12 }
  0x5c   :  { %5584 = vmatpush3.bf16.msra.mxu0 %v6917_v11  ;;  %5614 = vmatprep.subr.bf16.mxu1 %v9311_v3 }
  0x5d   :  { %598 = vmatmul.mubr.f32.gmra.mrb[20].mxu1 %v92_v40  ;;  %399 = vmatmul.mubr.f32.gmra.mrb[20].mxu0 %v92_v40 }
  0x5e   :  { %4665 = vmatprep.mubr.msk.f32.mxu1 %vm191_vm0, %v95_v41  ;;  %4640 = vmatprep.mubr.msk.f32.mxu0 %vm191_vm0, %v95_v41 }
  0x5f   :  { %5586 = vmatprep.subr.bf16.mxu0 %v6930_v13  ;;  %5616 = vmatpush3.bf16.msra.mxu1 %v6942_v15 }
  0x60   :  { %5588 = vmatpush3.bf16.msra.mxu0 %v6936_v14  ;;  %5617 = vmatprep.subr.bf16.mxu1 %v9311_v3 }
  0x61   :  { %603 = vmatmul.mubr.f32.gmra.mrb[22].mxu1 %v94_v42  ;;  %405 = vmatmul.mubr.f32.gmra.mrb[22].mxu0 %v94_v42 }
  0x62   :  { %4666 = vmatprep.mubr.msk.f32.mxu1 %vm191_vm0, %v97_v43  ;;  %4641 = vmatprep.mubr.msk.f32.mxu0 %vm191_vm0, %v97_v43 }
  0x63   :  { %5590 = vmatprep.subr.bf16.mxu0 %v6949_v16  ;;  %5619 = vmatpush3.bf16.msra.mxu1 %v6961_v18 }
  0x64   :  { %5592 = vmatpush3.bf16.msra.mxu0 %v6955_v17  ;;  %5620 = vmatprep.subr.bf16.mxu1 %v9311_v3 }
  0x65   :  { %608 = vmatmul.mubr.f32.gmra.mrb[24].mxu1 %v96_v44  ;;  %411 = vmatmul.mubr.f32.gmra.mrb[24].mxu0 %v96_v44 }
  0x66   :  { %4667 = vmatprep.mubr.msk.f32.mxu1 %vm191_vm0, %v99_v45  ;;  %4642 = vmatprep.mubr.msk.f32.mxu0 %vm191_vm0, %v99_v45 }
  0x67   :  { %5594 = vmatprep.subr.bf16.mxu0 %v6968_v19  ;;  %5622 = vmatpush3.bf16.msra.mxu1 %v6980_v21 }
  0x68   :  { %5596 = vmatpush3.bf16.msra.mxu0 %v6974_v20  ;;  %5623 = vmatprep.subr.bf16.mxu1 %v9311_v3 }
  0x69   :  { %613 = vmatmul.mubr.f32.gmra.mrb[26].mxu1 %v98_v46  ;;  %417 = vmatmul.mubr.f32.gmra.mrb[26].mxu0 %v98_v46 }
  0x6a   :  { %4668 = vmatprep.mubr.msk.f32.mxu1 %vm191_vm0, %v101_v47  ;;  %4643 = vmatprep.mubr.msk.f32.mxu0 %vm191_vm0, %v101_v47 }
  0x6b   :  { %5598 = vmatprep.subr.bf16.mxu0 %v6987_v22  ;;  %5625 = vmatpush3.bf16.msra.mxu1 %v6999_v24 }
  0x6c   :  { %5600 = vmatpush3.bf16.msra.mxu0 %v6993_v23  ;;  %5626 = vmatprep.subr.bf16.mxu1 %v9311_v3 }
  0x6d   :  { %618 = vmatmul.mubr.f32.gmra.mrb[28].mxu1 %v100_v48  ;;  %423 = vmatmul.mubr.f32.gmra.mrb[28].mxu0 %v100_v48 }
  0x6e   :  { %4669 = vmatprep.mubr.msk.f32.mxu1 %vm191_vm0, %v103_v49  ;;  %4644 = vmatprep.mubr.msk.f32.mxu0 %vm191_vm0, %v103_v49  ;;  %v176_v49 = vlaneseq }
  0x6f   :  { %5628 = vmatpush3.bf16.msra.mxu1 %v7006_v25  ;;  %5602 = vmatprep.subr.bf16.mxu0 %v7012_v26 }
  0x70   :  { %5661 = vmatprep.subr.bf16.mxu1 %v9311_v3  ;;  %5604 = vmatpush3.bf16.msra.mxu0 %v7019_v27 }
  0x71   :  { %623 = vmatmul.mubr.f32.gmra.mrb[30].mxu1 %v102_v50  ;;  %429 = vmatmul.mubr.f32.gmra.mrb[30].mxu0 %v102_v50 }
  0x72   :  { %4670 = vmatprep.mubr.msk.f32.mxu1 %vm191_vm0, %v105_v51  ;;  %4645 = vmatprep.mubr.msk.f32.mxu0 %vm191_vm0, %v105_v51 }
  0x73   :  { %5630 = vmatprep.subr.bf16.mxu0 %v5018_v4 }
  0x75   :  { %628 = vmatmul.mubr.f32.gmra.mrb[32].mxu1 %v104_v52  ;;  %435 = vmatmul.mubr.f32.gmra.mrb[32].mxu0 %v104_v52 }
  0x76   :  { %4671 = vmatprep.mubr.msk.f32.mxu1 %vm191_vm0, %v107_v53  ;;  %4646 = vmatprep.mubr.msk.f32.mxu0 %vm191_vm0, %v107_v53 }
  0x79   :  { %633 = vmatmul.mubr.f32.gmra.mrb[34].mxu1 %v106_v54  ;;  %441 = vmatmul.mubr.f32.gmra.mrb[34].mxu0 %v106_v54  ;;  %v177_v54 = vshrl.u32 %v176_v49, 7 }
  0x7a   :  { %4672 = vmatprep.mubr.msk.f32.mxu1 %vm191_vm0, %v109_v55  ;;  %4647 = vmatprep.mubr.msk.f32.mxu0 %vm191_vm0, %v109_v55 }
  0x7b   :  { %v186_v55 = vsub.s32 2, %v177_v54 }
  0x7d   :  { %638 = vmatmul.mubr.f32.gmra.mrb[36].mxu1 %v108_v56  ;;  %447 = vmatmul.mubr.f32.gmra.mrb[36].mxu0 %v108_v56 }
  0x7e   :  { %4673 = vmatprep.mubr.msk.f32.mxu1 %vm191_vm0, %v111_v57  ;;  %4648 = vmatprep.mubr.msk.f32.mxu0 %vm191_vm0, %v111_v57 }
  0x81   :  { %643 = vmatmul.mubr.f32.gmra.mrb[38].mxu1 %v110_v58  ;;  %453 = vmatmul.mubr.f32.gmra.mrb[38].mxu0 %v110_v58 }
  0x82   :  { %4674 = vmatprep.mubr.msk.f32.mxu1 %vm191_vm0, %v113_v59  ;;  %4649 = vmatprep.mubr.msk.f32.mxu0 %vm191_vm0, %v113_v59 }
  0x85   :  { %648 = vmatmul.mubr.f32.gmra.mrb[40].mxu1 %v112_v60  ;;  %459 = vmatmul.mubr.f32.gmra.mrb[40].mxu0 %v112_v60  ;;  %v174_v60 = vld [vmem:[%s9395_s0] sm:$0x7] }
  0x86   :  { %4675 = vmatprep.mubr.msk.f32.mxu1 %vm191_vm0, %v115_v61  ;;  %4650 = vmatprep.mubr.msk.f32.mxu0 %vm191_vm0, %v115_v61  ;;  %v7045_v61 = vsub.s32 0, %v177_v54 }
  0x88   :  { %9396 = vst [vmem:[#allocation14_spill] sm:$0xff] %v7045_v61 }
  0x89   :  { %653 = vmatmul.mubr.f32.gmra.mrb[42].mxu1 %v114_v62  ;;  %465 = vmatmul.mubr.f32.gmra.mrb[42].mxu0 %v114_v62  ;;  %v182_v62 = vsub.s32 1, %v177_v54 }
  0x8a   :  { %4676 = vmatprep.mubr.msk.f32.mxu1 %vm191_vm0, %v117_v63  ;;  %4651 = vmatprep.mubr.msk.f32.mxu0 %vm191_vm0, %v117_v63  ;;  %v7047_v63 = vrot.slane %v174_v60, %v186_v55 }
  0x8d   :  { %658 = vmatmul.mubr.f32.gmra.mrb[44].mxu1 %v116_v0  ;;  %471 = vmatmul.mubr.f32.gmra.mrb[44].mxu0 %v116_v0 }
  0x8e   :  { %4677 = vmatprep.mubr.msk.f32.mxu1 %vm191_vm0, %v119_v1  ;;  %4652 = vmatprep.mubr.msk.f32.mxu0 %vm191_vm0, %v119_v1 }
  0x91   :  { %663 = vmatmul.mubr.f32.gmra.mrb[46].mxu1 %v118_v2  ;;  %477 = vmatmul.mubr.f32.gmra.mrb[46].mxu0 %v118_v2 }
  0x92   :  { %5320 = vmatprep.mubr.msk.f32.mxu1 %vm6390_vm4, %v9309_v28 }
 0x108   :  { %v340_v29 = vpop.f32.mrb[0].mxu0  ;;  %v549_v30 = vpop.f32.mrb[0].mxu1 }
 0x109   :  { %v342_v31 = vpop.f32.mrb[1].mxu0  ;;  %v551_v32 = vpop.f32.mrb[1].mxu1 }
 0x10a   :  { %v7056_v32 = vrot.slane %v174_v60, %v7045_v61 }
 0x10c   :  { %v346_v33 = vpop.f32.mrb[2].mxu0  ;;  %v554_v34 = vpop.f32.mrb[2].mxu1 }
 0x10d   :  { %v348_v35 = vpop.f32.mrb[3].mxu0  ;;  %v556_v36 = vpop.f32.mrb[3].mxu1  ;;  %v7073_v55 = vadd.f32 %v346_v33, %v7056_v32 }
 0x10e   :  { %v7058_v36 = vrot.slane %v174_v60, %v182_v62  ;;  %v7079_v60 = vadd.f32 %v340_v29, %v7056_v32 }
 0x10f   :  { %9399 = vst [vmem:[#allocation17_spill] sm:$0xff] %v7073_v55  ;;  %v866_v3 = vmul.f32 %v7073_v55, %v7073_v55 }
 0x110   :  { %v559_v37 = vpop.f32.mrb[4].mxu1  ;;  %v352_v38 = vpop.f32.mrb[4].mxu0  ;;  %v863_v27 = vmul.f32 %v7079_v60, %v7079_v60  ;;  %v776_v24 = vadd.f32 %v7073_v55, %v7079_v60 }
 0x111   :  { %v354_v39 = vpop.f32.mrb[5].mxu0  ;;  %v561_v40 = vpop.f32.mrb[5].mxu1 }
 0x112   :  { %v7061_v40 = vadd.f32 %v549_v30, %v7047_v63  ;;  %v7082_v30 = vadd.f32 %v342_v31, %v7058_v36  ;;  %v7099_v29 = vadd.f32 %v354_v39, %v7058_v36  ;;  %v935_v22 = vadd.f32 %v866_v3, %v863_v27 }
 0x114   :  { %v564_v41 = vpop.f32.mrb[6].mxu1  ;;  %v358_v42 = vpop.f32.mrb[6].mxu0  ;;  %9397 = vst [vmem:[#allocation15_spill] sm:$0xff] %v7061_v40  ;;  %9401 = vst [vmem:[#allocation19_spill] sm:$0xff] %v7082_v30 }
 0x115   :  { %v360_v43 = vpop.f32.mrb[7].mxu0  ;;  %v566_v44 = vpop.f32.mrb[7].mxu1  ;;  %9404 = vst [vmem:[#allocation22_spill] sm:$0xff] %v7099_v29  ;;  %v7114_v39 = vadd.f32 %v564_v41, %v7047_v63  ;;  %v7119_v26 = vadd.f32 %v358_v42, %v7056_v32  ;;  %v870_v42 = vmul.f32 %v7099_v29, %v7099_v29 }
 0x116   :  { %v7064_v44 = vadd.f32 %v554_v34, %v7047_v63  ;;  %v865_v34 = vmul.f32 %v7061_v40, %v7061_v40  ;;  %v7122_v23 = vadd.f32 %v360_v43, %v7058_v36 }
 0x117   :  { %9405 = vst [vmem:[#allocation23_spill] sm:$0xff] %v7114_v39 }
 0x118   :  { %v7024_v45 = vpop.f32.mrb[8].mxu1  ;;  %v7026_v46 = vpop.f32.mrb[8].mxu0  ;;  %9398 = vst [vmem:[#allocation16_spill] sm:$0xff] %v7064_v44  ;;  %v868_v62 = vmul.f32 %v7064_v44, %v7064_v44  ;;  %v834_v61 = vadd.f32 %v7064_v44, %v7061_v40  ;;  %9406 = vst [vmem:[#allocation24_spill] sm:$0xff] %v7122_v23 }
 0x119   :  { %v7028_v47 = vpop.f32.mrb[9].mxu0  ;;  %v571_v48 = vpop.f32.mrb[9].mxu1  ;;  %v7141_v19 = vadd.f32 %v7024_v45, %v7047_v63  ;;  %v872_v45 = vmul.f32 %v7119_v26, %v7119_v26 }
 0x11a   :  { %v993_v25 = vadd.f32 %v868_v62, %v865_v34 }
 0x11b   :  { %9407 = vst [vmem:[#allocation25_spill] sm:$0xff] %v7141_v19 }
 0x11c   :  { %v7030_v50 = vpop.f32.mrb[10].mxu1  ;;  %v7032_v51 = vpop.f32.mrb[10].mxu0 }
 0x11d   :  { %v7034_v52 = vpop.f32.mrb[11].mxu0  ;;  %v576_v53 = vpop.f32.mrb[11].mxu1 }
 0x120   :  { %v7036_v56 = vpop.f32.mrb[12].mxu1  ;;  %v7038_v57 = vpop.f32.mrb[12].mxu0 }
 0x121   :  { %v7040_v58 = vpop.f32.mrb[13].mxu0  ;;  %v581_v59 = vpop.f32.mrb[13].mxu1 }
 0x122   :  { %v7076_v59 = vadd.f32 %v348_v35, %v7058_v36  ;;  %v7096_v35 = vadd.f32 %v352_v38, %v7056_v32  ;;  %v864_v38 = vmul.f32 %v7082_v30, %v7082_v30 }
 0x124   :  { %v7049_v0 = vpop.f32.mrb[14].mxu1  ;;  %v7051_v1 = vpop.f32.mrb[14].mxu0  ;;  %9400 = vst [vmem:[#allocation18_spill] sm:$0xff] %v7076_v59  ;;  %9403 = vst [vmem:[#allocation21_spill] sm:$0xff] %v7096_v35  ;;  %v805_v41 = vadd.f32 %v7076_v59, %v7082_v30  ;;  %v869_v34 = vmul.f32 %v7096_v35, %v7096_v35  ;;  %v777_v55 = vadd.f32 %v776_v24, %v7096_v35 }
 0x125   :  { %v7053_v2 = vpop.f32.mrb[15].mxu0  ;;  %v586_v4 = vpop.f32.mrb[15].mxu1  ;;  %v7148_v30 = vadd.f32 %v7026_v46, %v7056_v32  ;;  %v873_v24 = vmul.f32 %v7122_v23, %v7122_v23  ;;  %v7175_v35 = vadd.f32 %v7032_v51, %v7056_v32  ;;  %v7189_v51 = vadd.f32 %v7036_v56, %v7047_v63 }
 0x126   :  { %v7089_v4 = vadd.f32 %v559_v37, %v7047_v63  ;;  %v867_v37 = vmul.f32 %v7076_v59, %v7076_v59  ;;  %v874_v59 = vmul.f32 %v7114_v39, %v7114_v39  ;;  %v806_v27 = vadd.f32 %v805_v41, %v7099_v29 }
 0x127   :  { %9408 = vst [vmem:[#allocation26_spill] sm:$0xff] %v7148_v30  ;;  %v778_v41 = vadd.f32 %v777_v55, %v7119_v26  ;;  %v877_v29 = vmul.f32 %v7141_v19, %v7141_v19  ;;  %9410 = vst [vmem:[#allocation28_spill] sm:$0xff] %v7175_v35 }
 0x128   :  { %v7066_v48 = vpop.f32.mrb[16].mxu1  ;;  %v7068_v49 = vpop.f32.mrb[16].mxu0  ;;  %9402 = vst [vmem:[#allocation20_spill] sm:$0xff] %v7089_v4  ;;  %v964_v20 = vadd.f32 %v867_v37, %v864_v38  ;;  %v835_v21 = vadd.f32 %v834_v61, %v7089_v4  ;;  %v936_v38 = vadd.f32 %v935_v22, %v869_v34  ;;  %v807_v22 = vadd.f32 %v806_v27, %v7122_v23 }
 0x129   :  { %v7070_v53 = vpop.f32.mrb[17].mxu0  ;;  %v591_v54 = vpop.f32.mrb[17].mxu1  ;;  %9411 = vst [vmem:[#allocation29_spill] sm:$0xff] %v7189_v51  ;;  %v7200_v27 = vadd.f32 %v7038_v57, %v7056_v32 }
 0x12a   :  { %v965_v46 = vadd.f32 %v964_v20, %v870_v42  ;;  %v7179_v20 = vadd.f32 %v7034_v52, %v7058_v36  ;;  %v937_v34 = vadd.f32 %v936_v38, %v872_v45 }
 0x12b   :  { %9412 = vst [vmem:[#allocation30_spill] sm:$0xff] %v7200_v27 }
 0x12c   :  { %v7091_v33 = vpop.f32.mrb[18].mxu1  ;;  %v7093_v54 = vpop.f32.mrb[18].mxu0  ;;  %v966_v42 = vadd.f32 %v965_v46, %v873_v24  ;;  %v878_v46 = vmul.f32 %v7175_v35, %v7175_v35 }
 0x12d   :  { %v7101_v31 = vpop.f32.mrb[19].mxu0  ;;  %v596_v28 = vpop.f32.mrb[19].mxu1 }
 0x12e   :  { %v871_v28 = vmul.f32 %v7089_v4, %v7089_v4  ;;  %v836_v4 = vadd.f32 %v835_v21, %v7114_v39 }
 0x130   :  { %v7124_v44 = vpop.f32.mrb[20].mxu1  ;;  %v7126_v40 = vpop.f32.mrb[20].mxu0  ;;  %v994_v3 = vadd.f32 %v993_v25, %v871_v28 }
 0x131   :  { %v7136_v62 = vpop.f32.mrb[21].mxu0  ;;  %v601_v43 = vpop.f32.mrb[21].mxu1 }
 0x132   :  { %v7152_v43 = vadd.f32 %v7028_v47, %v7058_v36  ;;  %v7166_v47 = vadd.f32 %v7030_v50, %v7047_v63  ;;  %v995_v21 = vadd.f32 %v994_v3, %v874_v59  ;;  %v875_v50 = vmul.f32 %v7148_v30, %v7148_v30 }
 0x133   :  { %v779_v59 = vadd.f32 %v778_v41, %v7148_v30  ;;  %v879_v41 = vmul.f32 %v7179_v20, %v7179_v20 }
 0x134   :  { %v7159_v61 = vpop.f32.mrb[22].mxu1  ;;  %v7161_v37 = vpop.f32.mrb[22].mxu0  ;;  %9409 = vst [vmem:[#allocation27_spill] sm:$0xff] %v7166_v47  ;;  %v876_v55 = vmul.f32 %v7152_v43, %v7152_v43  ;;  %v880_v3 = vmul.f32 %v7166_v47, %v7166_v47  ;;  %v996_v24 = vadd.f32 %v995_v21, %v877_v29  ;;  %v808_v38 = vadd.f32 %v807_v22, %v7152_v43 }
 0x135   :  { %v7168_v25 = vpop.f32.mrb[23].mxu0  ;;  %v606_v28 = vpop.f32.mrb[23].mxu1  ;;  %v780_v23 = vadd.f32 %v779_v59, %v7175_v35  ;;  %v883_v29 = vmul.f32 %v7189_v51, %v7189_v51  ;;  %v7223_v21 = vadd.f32 %v7051_v1, %v7056_v32  ;;  %v7227_v22 = vadd.f32 %v7053_v2, %v7058_v36 }
 0x136   :  { %v837_v28 = vadd.f32 %v836_v4, %v7141_v19  ;;  %v7204_v4 = vadd.f32 %v7040_v58, %v7058_v36  ;;  %v938_v19 = vadd.f32 %v937_v34, %v875_v50  ;;  %v967_v30 = vadd.f32 %v966_v42, %v876_v55 }
 0x137   :  { %v7216_v58 = vadd.f32 %v7049_v0, %v7047_v63  ;;  %9415 = vst [vmem:[#allocation33_spill] sm:$0xff] %v7223_v21  ;;  %v997_v34 = vadd.f32 %v996_v24, %v880_v3  ;;  %v809_v0 = vadd.f32 %v808_v38, %v7179_v20  ;;  %v881_v42 = vmul.f32 %v7200_v27, %v7200_v27 }
 0x138   :  { %v7191_v39 = vpop.f32.mrb[24].mxu1  ;;  %v7193_v52 = vpop.f32.mrb[24].mxu0  ;;  %9413 = vst [vmem:[#allocation31_spill] sm:$0xff] %v7204_v4  ;;  %v838_v57 = vadd.f32 %v837_v28, %v7166_v47  ;;  %v882_v28 = vmul.f32 %v7204_v4, %v7204_v4  ;;  %v968_v47 = vadd.f32 %v967_v30, %v879_v41  ;;  %v7243_v35 = vadd.f32 %v7066_v48, %v7047_v63 }
 0x139   :  { %v7206_v45 = vpop.f32.mrb[25].mxu0  ;;  %v611_v56 = vpop.f32.mrb[25].mxu1  ;;  %9414 = vst [vmem:[#allocation32_spill] sm:$0xff] %v7216_v58  ;;  %v781_v3 = vadd.f32 %v780_v23, %v7200_v27  ;;  %v886_v24 = vmul.f32 %v7216_v58, %v7216_v58  ;;  %v7250_v38 = vadd.f32 %v7068_v49, %v7056_v32  ;;  %v810_v30 = vadd.f32 %v809_v0, %v7204_v4 }
 0x13a   :  { %v939_v56 = vadd.f32 %v938_v19, %v878_v46  ;;  %v839_v2 = vadd.f32 %v838_v57, %v7189_v51  ;;  %9416 = vst [vmem:[#allocation34_spill] sm:$0xff] %v7243_v35  ;;  %v998_v19 = vadd.f32 %v997_v34, %v883_v29  ;;  %v884_v48 = vmul.f32 %v7223_v21, %v7223_v21 }
 0x13b   :  { %9417 = vst [vmem:[#allocation35_spill] sm:$0xff] %v7250_v38  ;;  %v885_v23 = vmul.f32 %v7227_v22, %v7227_v22  ;;  %v969_v49 = vadd.f32 %v968_v47, %v882_v28  ;;  %v782_v0 = vadd.f32 %v781_v3, %v7223_v21  ;;  %v889_v27 = vmul.f32 %v7243_v35, %v7243_v35 }
 0x13c   :  { %v7229_v50 = vpop.f32.mrb[26].mxu1  ;;  %v7231_v55 = vpop.f32.mrb[26].mxu0  ;;  %v940_v57 = vadd.f32 %v939_v56, %v881_v42  ;;  %v840_v51 = vadd.f32 %v839_v2, %v7216_v58  ;;  %v7277_v4 = vadd.f32 %v7093_v54, %v7056_v32  ;;  %v7281_v47 = vadd.f32 %v7101_v31, %v7058_v36 }
 0x13d   :  { %v7238_v59 = vpop.f32.mrb[27].mxu0  ;;  %v616_v1 = vpop.f32.mrb[27].mxu1  ;;  %v999_v42 = vadd.f32 %v998_v19, %v886_v24  ;;  %v887_v28 = vmul.f32 %v7250_v38, %v7250_v38  ;;  %v970_v3 = vadd.f32 %v969_v49, %v885_v23  ;;  %v7291_v54 = vadd.f32 %v7124_v44, %v7047_v63 }
 0x13e   :  { %v7254_v1 = vadd.f32 %v7070_v53, %v7058_v36  ;;  %v7268_v53 = vadd.f32 %v7091_v33, %v7047_v63  ;;  %9420 = vst [vmem:[#allocation38_spill] sm:$0xff] %v7277_v4  ;;  %9421 = vst [vmem:[#allocation39_spill] sm:$0xff] %v7281_v47  ;;  %v811_v33 = vadd.f32 %v810_v30, %v7227_v22 }
 0x13f   :  { %v941_v2 = vadd.f32 %v940_v57, %v884_v48  ;;  %9422 = vst [vmem:[#allocation40_spill] sm:$0xff] %v7291_v54  ;;  %v783_v24 = vadd.f32 %v782_v0, %v7250_v38  ;;  %v7302_v30 = vadd.f32 %v7126_v40, %v7056_v32  ;;  %v1000_v23 = vadd.f32 %v999_v42, %v889_v27 }
 0x140   :  { %9418 = vst [vmem:[#allocation36_spill] sm:$0xff] %v7254_v1  ;;  %v7261_v46 = vpop.f32.mrb[28].mxu1  ;;  %v7263_v41 = vpop.f32.mrb[28].mxu0  ;;  %9419 = vst [vmem:[#allocation37_spill] sm:$0xff] %v7268_v53  ;;  %v888_v56 = vmul.f32 %v7254_v1, %v7254_v1  ;;  %v892_v19 = vmul.f32 %v7268_v53, %v7268_v53  ;;  %v812_v57 = vadd.f32 %v811_v33, %v7254_v1 }
 0x141   :  { %v7270_v29 = vpop.f32.mrb[29].mxu0  ;;  %v621_v34 = vpop.f32.mrb[29].mxu1  ;;  %9423 = vst [vmem:[#allocation41_spill] sm:$0xff] %v7302_v30  ;;  %v890_v49 = vmul.f32 %v7277_v4, %v7277_v4  ;;  %v891_v0 = vmul.f32 %v7281_v47, %v7281_v47  ;;  %v7317_v40 = vadd.f32 %v7159_v61, %v7047_v63  ;;  %v784_v42 = vadd.f32 %v783_v24, %v7277_v4 }
 0x142   :  { %v841_v34 = vadd.f32 %v840_v51, %v7243_v35  ;;  %v7306_v51 = vadd.f32 %v7136_v62, %v7058_v36  ;;  %v942_v35 = vadd.f32 %v941_v2, %v887_v28  ;;  %v971_v38 = vadd.f32 %v970_v3, %v888_v56 }
 0x143   :  { %9424 = vst [vmem:[#allocation42_spill] sm:$0xff] %v7317_v40  ;;  %v7321_v62 = vadd.f32 %v7161_v37, %v7056_v32  ;;  %v895_v33 = vmul.f32 %v7291_v54, %v7291_v54  ;;  %v1001_v61 = vadd.f32 %v1000_v23, %v892_v19  ;;  %v813_v2 = vadd.f32 %v812_v57, %v7281_v47 }
 0x144   :  { %v7293_v58 = vpop.f32.mrb[30].mxu1  ;;  %v7295_v31 = vpop.f32.mrb[30].mxu0  ;;  %v842_v27 = vadd.f32 %v841_v34, %v7268_v53  ;;  %v893_v37 = vmul.f32 %v7302_v30, %v7302_v30  ;;  %v894_v3 = vmul.f32 %v7306_v51, %v7306_v51  ;;  %v943_v53 = vadd.f32 %v942_v35, %v890_v49 }
 0x145   :  { %v7308_v48 = vpop.f32.mrb[31].mxu0  ;;  %v626_v44 = vpop.f32.mrb[31].mxu1  ;;  %9425 = vst [vmem:[#allocation43_spill] sm:$0xff] %v7321_v62  ;;  %v972_v4 = vadd.f32 %v971_v38, %v891_v0  ;;  %v7346_v1 = vadd.f32 %v7206_v45, %v7058_v36  ;;  %v785_v23 = vadd.f32 %v784_v42, %v7302_v30  ;;  %v898_v57 = vmul.f32 %v7317_v40, %v7317_v40 }
 0x146   :  { %v7329_v44 = vadd.f32 %v7168_v25, %v7058_v36  ;;  %v7342_v25 = vadd.f32 %v7191_v39, %v7047_v63  ;;  %v843_v19 = vadd.f32 %v842_v27, %v7291_v54  ;;  %v1002_v35 = vadd.f32 %v1001_v61, %v895_v33 }
 0x147   :  { %9428 = vst [vmem:[#allocation46_spill] sm:$0xff] %v7346_v1  ;;  %v814_v38 = vadd.f32 %v813_v2, %v7306_v51  ;;  %v7359_v45 = vadd.f32 %v7193_v52, %v7056_v32  ;;  %v944_v27 = vadd.f32 %v943_v53, %v893_v37  ;;  %v973_v42 = vadd.f32 %v972_v4, %v894_v3 }
 0x148   :  { %9426 = vst [vmem:[#allocation44_spill] sm:$0xff] %v7329_v44  ;;  %v7331_v28 = vpop.f32.mrb[32].mxu1  ;;  %v7333_v56 = vpop.f32.mrb[32].mxu0  ;;  %9427 = vst [vmem:[#allocation45_spill] sm:$0xff] %v7342_v25  ;;  %v897_v39 = vmul.f32 %v7329_v44, %v7329_v44  ;;  %v844_v54 = vadd.f32 %v843_v19, %v7317_v40  ;;  %v786_v30 = vadd.f32 %v785_v23, %v7321_v62 }
 0x149   :  { %v438_v34 = vpop.f32.mrb[33].mxu0  ;;  %v631_v24 = vpop.f32.mrb[33].mxu1  ;;  %9429 = vst [vmem:[#allocation47_spill] sm:$0xff] %v7359_v45  ;;  %v815_v33 = vadd.f32 %v814_v38, %v7329_v44  ;;  %v901_v61 = vmul.f32 %v7342_v25, %v7342_v25  ;;  %v900_v2 = vmul.f32 %v7346_v1, %v7346_v1  ;;  %v7370_v52 = vadd.f32 %v7238_v59, %v7058_v36 }
 0x14a   :  { %v896_v24 = vmul.f32 %v7321_v62, %v7321_v62  ;;  %v1003_v53 = vadd.f32 %v1002_v35, %v898_v57  ;;  %v7376_v37 = vadd.f32 %v7229_v50, %v7047_v63  ;;  %v974_v3 = vadd.f32 %v973_v42, %v897_v39 }
 0x14b   :  { %9430 = vst [vmem:[#allocation48_spill] sm:$0xff] %v7370_v52  ;;  %v845_v19 = vadd.f32 %v844_v54, %v7342_v25  ;;  %v787_v23 = vadd.f32 %v786_v30, %v7359_v45  ;;  %v7386_v59 = vadd.f32 %v7270_v29, %v7058_v36  ;;  %v7390_v35 = vmul.f32 %v7359_v45, %v7359_v45 }
 0x14c   :  { %v634_v49 = vpop.f32.mrb[34].mxu1  ;;  %v442_v0 = vpop.f32.mrb[34].mxu0  ;;  %v7372_v4 = vadd.f32 %v944_v27, %v896_v24  ;;  %9431 = vst [vmem:[#allocation49_spill] sm:$0xff] %v7376_v37  ;;  %v816_v50 = vadd.f32 %v815_v33, %v7346_v1  ;;  %v7399_v54 = vadd.f32 %v7263_v41, %v7056_v32  ;;  %v7401_v29 = vadd.f32 %v1003_v53, %v901_v61 }
 0x14d   :  { %v444_v47 = vpop.f32.mrb[35].mxu0  ;;  %v636_v21 = vpop.f32.mrb[35].mxu1  ;;  %9432 = vst [vmem:[#allocation50_spill] sm:$0xff] %v7386_v59  ;;  %v975_v39 = vadd.f32 %v974_v3, %v900_v2  ;;  %v903_v27 = vmul.f32 %v7370_v52, %v7370_v52  ;;  %v7407_v42 = vadd.f32 %v7308_v48, %v7058_v36  ;;  %v846_v33 = vadd.f32 %v845_v19, %v7376_v37 }
 0x14e   :  { %v7380_v21 = vadd.f32 %v7231_v55, %v7056_v32  ;;  %v7395_v55 = vadd.f32 %v7261_v46, %v7047_v63  ;;  %v7413_v41 = vadd.f32 %v7293_v58, %v7047_v63  ;;  %v7417_v61 = vadd.f32 %v7295_v31, %v7056_v32 }
 0x14f   :  { %9434 = vst [vmem:[#allocation52_spill] sm:$0xff] %v7407_v42  ;;  %v7421_v2 = vmul.f32 %v7376_v37, %v7376_v37  ;;  %v817_v53 = vadd.f32 %v816_v50, %v7370_v52  ;;  %v906_v48 = vmul.f32 %v7386_v59, %v7386_v59  ;;  %v7427_v3 = vadd.f32 %v438_v34, %v7058_v36 }
 0x150   :  { %v639_v57 = vpop.f32.mrb[36].mxu1  ;;  %v448_v24 = vpop.f32.mrb[36].mxu0  ;;  %9433 = vst [vmem:[#allocation51_spill] sm:$0xff] %v7395_v55  ;;  %v788_v46 = vadd.f32 %v787_v23, %v7380_v21  ;;  %9435 = vst [vmem:[#allocation53_spill] sm:$0xff] %v7413_v41  ;;  %v847_v58 = vadd.f32 %v846_v33, %v7395_v55  ;;  %v7433_v31 = vadd.f32 %v7331_v28, %v7047_v63 }
 0x151   :  { %v450_v30 = vpop.f32.mrb[37].mxu0  ;;  %v641_v38 = vpop.f32.mrb[37].mxu1  ;;  %9436 = vst [vmem:[#allocation54_spill] sm:$0xff] %v7417_v61  ;;  %9437 = vst [vmem:[#allocation55_spill] sm:$0xff] %v7427_v3  ;;  %v7437_v37 = vadd.f32 %v7333_v56, %v7056_v32  ;;  %v976_v40 = vadd.f32 %v975_v39, %v903_v27  ;;  %v818_v34 = vadd.f32 %v817_v53, %v7386_v59 }
 0x152   :  { %v789_v38 = vadd.f32 %v788_v46, %v7399_v54  ;;  %9438 = vst [vmem:[#allocation56_spill] sm:$0xff] %v7433_v31  ;;  %v909_v52 = vmul.f32 %v7407_v42, %v7407_v42  ;;  %v7443_v33 = vadd.f32 %v444_v47, %v7058_v36  ;;  %v848_v46 = vadd.f32 %v847_v58, %v7413_v41 }
 0x153   :  { %9439 = vst [vmem:[#allocation57_spill] sm:$0xff] %v7437_v37  ;;  %v7448_v45 = vadd.f32 %v634_v49, %v7047_v63  ;;  %v7451_v56 = vadd.f32 %v442_v0, %v7056_v32  ;;  %v819_v39 = vadd.f32 %v818_v34, %v7407_v42  ;;  %v912_v27 = vmul.f32 %v7427_v3, %v7427_v3 }
 0x154   :  { %v644_v19 = vpop.f32.mrb[38].mxu1  ;;  %v454_v23 = vpop.f32.mrb[38].mxu0  ;;  %9440 = vst [vmem:[#allocation58_spill] sm:$0xff] %v7443_v33  ;;  %v790_v28 = vadd.f32 %v789_v38, %v7417_v61  ;;  %v7457_v53 = vadd.f32 %v450_v30, %v7058_v36  ;;  %v849_v58 = vadd.f32 %v848_v46, %v7433_v31  ;;  %v7462_v49 = vadd.f32 %v639_v57, %v7047_v63 }
 0x155   :  { %v456_v50 = vpop.f32.mrb[39].mxu0  ;;  %v646_v25 = vpop.f32.mrb[39].mxu1  ;;  %v7465_v0 = vadd.f32 %v448_v24, %v7056_v32  ;;  %v820_v42 = vadd.f32 %v819_v39, %v7427_v3  ;;  %v915_v30 = vmul.f32 %v7443_v33, %v7443_v33  ;;  %v7476_v57 = vadd.f32 %v644_v19, %v7047_v63 }
 0x156   :  { %v977_v25 = vadd.f32 %v976_v40, %v906_v48  ;;  %9441 = vst [vmem:[#allocation59_spill] sm:$0xff] %v7457_v53  ;;  %v791_v38 = vadd.f32 %v790_v28, %v7437_v37  ;;  %v7471_v1 = vadd.f32 %v456_v50, %v7058_v36  ;;  %v850_v46 = vadd.f32 %v849_v58, %v7448_v45 }
 0x157   :  { %v7479_v24 = vadd.f32 %v454_v23, %v7056_v32 }
 0x158   :  { %v649_v47 = vpop.f32.mrb[40].mxu1  ;;  %v460_v59 = vpop.f32.mrb[40].mxu0  ;;  %v978_v34 = vadd.f32 %v977_v25, %v909_v52  ;;  %9442 = vst [vmem:[#allocation60_spill] sm:$0xff] %v7471_v1  ;;  %v792_v28 = vadd.f32 %v791_v38, %v7451_v56  ;;  %v821_v52 = vadd.f32 %v820_v42, %v7443_v33  ;;  %v918_v25 = vmul.f32 %v7457_v53, %v7457_v53 }
 0x159   :  { %v462_v40 = vpop.f32.mrb[41].mxu0  ;;  %v651_v48 = vpop.f32.mrb[41].mxu1  ;;  %v851_v58 = vadd.f32 %v850_v46, %v7462_v49  ;;  %v7490_v19 = vadd.f32 %v649_v47, %v7047_v63  ;;  %v7493_v23 = vadd.f32 %v460_v59, %v7056_v32 }
 0x15a   :  { %v979_v48 = vadd.f32 %v978_v34, %v912_v27  ;;  %v7485_v39 = vadd.f32 %v462_v40, %v7058_v36  ;;  %v793_v38 = vadd.f32 %v792_v28, %v7465_v0  ;;  %v822_v33 = vadd.f32 %v821_v52, %v7457_v53 }
 0x15b   :  { %v921_v40 = vmul.f32 %v7471_v1, %v7471_v1  ;;  %v852_v46 = vadd.f32 %v851_v58, %v7476_v57 }
 0x15c   :  { %9443 = vst [vmem:[#allocation61_spill] sm:$0xff] %v7485_v39  ;;  %v654_v50 = vpop.f32.mrb[42].mxu1  ;;  %v466_v3 = vpop.f32.mrb[42].mxu0  ;;  %v980_v34 = vadd.f32 %v979_v48, %v915_v30  ;;  %v794_v28 = vadd.f32 %v793_v38, %v7479_v24  ;;  %v946_v30 = vadd.f32 %v7372_v4, %v7390_v35  ;;  %v823_v52 = vadd.f32 %v822_v33, %v7471_v1 }
 0x15d   :  { %v468_v27 = vpop.f32.mrb[43].mxu0  ;;  %v656_v42 = vpop.f32.mrb[43].mxu1  ;;  %v7504_v47 = vadd.f32 %v654_v50, %v7047_v63  ;;  %v7507_v59 = vadd.f32 %v466_v3, %v7056_v32  ;;  %v853_v58 = vadd.f32 %v852_v46, %v7490_v19  ;;  %v1005_v46 = vadd.f32 %v7401_v29, %v7421_v2 }
 0x15e   :  { %v7499_v62 = vadd.f32 %v468_v27, %v7058_v36  ;;  %v981_v48 = vadd.f32 %v980_v34, %v918_v25  ;;  %v924_v27 = vmul.f32 %v7485_v39, %v7485_v39  ;;  %v795_v38 = vadd.f32 %v794_v28, %v7493_v23 }
 0x15f   :  { %v824_v33 = vadd.f32 %v823_v52, %v7485_v39  ;;  %v902_v28 = vmul.f32 %v7380_v21, %v7380_v21 }
 0x160   :  { %9444 = vst [vmem:[#allocation62_spill] sm:$0xff] %v7499_v62  ;;  %v659_v42 = vpop.f32.mrb[44].mxu1  ;;  %v472_v53 = vpop.f32.mrb[44].mxu0  ;;  %v982_v35 = vadd.f32 %v981_v48, %v921_v40  ;;  %v927_v25 = vmul.f32 %v7499_v62, %v7499_v62  ;;  %v907_v40 = vmul.f32 %v7395_v55, %v7395_v55 }
 0x161   :  { %v7517_v50 = vadd.f32 %v659_v42, %v7047_v63  ;;  %v7520_v3 = vadd.f32 %v472_v53, %v7056_v32  ;;  %v474_v44 = vpop.f32.mrb[45].mxu0  ;;  %v661_v4 = vpop.f32.mrb[45].mxu1  ;;  %v854_v53 = vadd.f32 %v853_v58, %v7504_v47  ;;  %v796_v42 = vadd.f32 %v795_v38, %v7507_v59 }
 0x162   :  { %v7526_v34 = vadd.f32 %v474_v44, %v7058_v36  ;;  %v983_v48 = vadd.f32 %v982_v35, %v924_v27  ;;  %v825_v52 = vadd.f32 %v824_v33, %v7499_v62  ;;  %v905_v27 = vmul.f32 %v7399_v54, %v7399_v54 }
 0x163   :  { %v855_v29 = vadd.f32 %v854_v53, %v7517_v50  ;;  %v797_v2 = vadd.f32 %v796_v42, %v7520_v3  ;;  %v947_v53 = vadd.f32 %v946_v30, %v902_v28  ;;  %v910_v42 = vmul.f32 %v7413_v41, %v7413_v41 }
 0x164   :  { %9445 = vst [vmem:[#allocation63_spill] sm:$0xff] %v7526_v34  ;;  %v930_v44 = vmul.f32 %v7526_v34, %v7526_v34  ;;  %v664_v4 = vpop.f32.mrb[46].mxu1  ;;  %v478_v39 = vpop.f32.mrb[46].mxu0  ;;  %v984_v35 = vadd.f32 %v983_v48, %v927_v25  ;;  %v826_v33 = vadd.f32 %v825_v52, %v7526_v34  ;;  %v1006_v48 = vadd.f32 %v1005_v46, %v907_v40 }
 0x165   :  { %v7542_v1 = vadd.f32 %v664_v4, %v7047_v63  ;;  %v7545_v58 = vadd.f32 %v478_v39, %v7056_v32  ;;  %v480_v38 = vpop.f32.mrb[47].mxu0  ;;  %v666_v55 = vpop.f32.mrb[47].mxu1  ;;  %v948_v52 = vadd.f32 %v947_v53, %v905_v27  ;;  %v914_v46 = vmul.f32 %v7451_v56, %v7451_v56 }
 0x166   :  { %v7551_v62 = vadd.f32 %v480_v38, %v7058_v36  ;;  %v908_v55 = vmul.f32 %v7417_v61, %v7417_v61  ;;  %v985_v39 = vadd.f32 %v984_v35, %v930_v44  ;;  %v913_v36 = vmul.f32 %v7433_v31, %v7433_v31 }
 0x167   :  { %v856_v63 = vadd.f32 %v855_v29, %v7542_v1  ;;  %v798_v32 = vadd.f32 %v797_v2, %v7545_v58  ;;  %v911_v29 = vmul.f32 %v7437_v37, %v7437_v37  ;;  %v1007_v41 = vadd.f32 %v1006_v48, %v910_v42 }
 0x168   :  { %9446 = vst [vmem:[#allocation64_spill] sm:$0xff] %v7551_v62  ;;  %v827_v4 = vadd.f32 %v826_v33, %v7551_v62  ;;  %v933_v25 = vmul.f32 %v7551_v62, %v7551_v62  ;;  %v916_v44 = vmul.f32 %v7448_v45, %v7448_v45  ;;  %v949_v34 = vadd.f32 %v948_v52, %v908_v55 }
 0x169   :  { %v857_v30 = vrot.slane %v856_v63, 4  ;;  %v799_v28 = vrot.slane %v798_v32, 4  ;;  %v1008_v62 = vadd.f32 %v1007_v41, %v913_v36  ;;  %v919_v27 = vmul.f32 %v7462_v49, %v7462_v49 }
 0x16a   :  { %v828_v2 = vrot.slane %v827_v4, 4  ;;  %v986_v38 = vadd.f32 %v985_v39, %v933_v25  ;;  %v950_v61 = vadd.f32 %v949_v34, %v911_v29  ;;  %v917_v42 = vmul.f32 %v7465_v0, %v7465_v0 }
 0x16b   :  { %v858_v35 = vadd.f32 %v857_v30, %v856_v63  ;;  %v800_v33 = vadd.f32 %v799_v28, %v798_v32  ;;  %v1009_v63 = vadd.f32 %v1008_v62, %v916_v44  ;;  %v922_v32 = vmul.f32 %v7476_v57, %v7476_v57 }
 0x16c   :  { %v829_v40 = vadd.f32 %v828_v2, %v827_v4  ;;  %v987_v31 = vrot.slane %v986_v38, 4  ;;  %v951_v4 = vadd.f32 %v950_v61, %v914_v46  ;;  %v920_v41 = vmul.f32 %v7479_v24, %v7479_v24 }
 0x16d   :  { %v859_v53 = vrot.slane %v858_v35, 2  ;;  %v801_v37 = vrot.slane %v800_v33, 2  ;;  %v1010_v28 = vadd.f32 %v1009_v63, %v919_v27  ;;  %v925_v34 = vmul.f32 %v7490_v19, %v7490_v19 }
 0x16e   :  { %v830_v39 = vrot.slane %v829_v40, 2  ;;  %v988_v25 = vadd.f32 %v987_v31, %v986_v38  ;;  %v952_v2 = vadd.f32 %v951_v4, %v917_v42  ;;  %v923_v62 = vmul.f32 %v7493_v23, %v7493_v23 }
 0x16f   :  { %v860_v55 = vadd.f32 %v859_v53, %v858_v35  ;;  %v802_v48 = vadd.f32 %v801_v37, %v800_v33  ;;  %v1011_v44 = vadd.f32 %v1010_v28, %v922_v32  ;;  %v928_v37 = vmul.f32 %v7504_v47, %v7504_v47 }
 0x170   :  { %v831_v36 = vadd.f32 %v830_v39, %v829_v40  ;;  %v989_v30 = vrot.slane %v988_v25, 2  ;;  %v953_v35 = vadd.f32 %v952_v2, %v920_v41  ;;  %v926_v27 = vmul.f32 %v7507_v59, %v7507_v59  ;;  %v9454_v2 = vld [vmem:[#allocation9_spill] sm:$0xff] }
 0x171   :  { %v861_v52 = vrot.slane %v860_v55, 1  ;;  %v803_v29 = vrot.slane %v802_v48, 1  ;;  %v1012_v40 = vadd.f32 %v1011_v44, %v925_v34  ;;  %v931_v53 = vmul.f32 %v7517_v50, %v7517_v50  ;;  %v9457_v44 = vld [vmem:[#allocation13_spill] sm:$0xff] }
 0x172   :  { %v832_v31 = vrot.slane %v831_v36, 1  ;;  %v990_v38 = vadd.f32 %v989_v30, %v988_v25  ;;  %v954_v39 = vadd.f32 %v953_v35, %v923_v62  ;;  %v929_v32 = vmul.f32 %v7520_v3, %v7520_v3  ;;  %v6284_v35 = vld [vmem:[%s9458_s1] ss:$12 sps:$4 sm:$0xff]  }
 0x173   :  { %v862_v61 = vadd.f32 %v861_v52, %v860_v55  ;;  %v804_v42 = vadd.f32 %v803_v29, %v802_v48  ;;  %v1013_v63 = vadd.f32 %v1012_v40, %v928_v37  ;;  %v934_v55 = vmul.f32 %v7542_v1, %v7542_v1  ;;  %v9451_v52 = vld [vmem:[#allocation6_spill] sm:$0xff] }
 0x174   :  { %v833_v33 = vadd.f32 %v832_v31, %v831_v36  ;;  %v991_v46 = vrot.slane %v990_v38, 1  ;;  %v9447_v4 = vmov 0.0|0.0   ;;  %v955_v48 = vadd.f32 %v954_v39, %v926_v27  ;;  %v9453_v29 = vld [vmem:[#allocation10_spill] sm:$0xff]  ;;  %v9456_v31 = vld [vmem:[#allocation11_spill] sm:$0xff] }
 0x175   :  { %5321 = vmatmul.mubr.f32.vlgmr.msra.gmra.mrb[48].mxu1 %v862_v61  ;;  %v1014_v41 = vadd.f32 %v1013_v63, %v931_v53  ;;  %v9448_v36 = vmov 0.0   ;;  %v6282_v61 = vld [vmem:[%s9458_s1 + $0x4] ss:$12 sps:$4 sm:$0xff]  }
 0x176   :  { %5663 = vmatpush3.bf16.msra.mxu1 %v6885_v6  ;;  %1086 = vmatprep.mubr.f32.mxu0 %v833_v33  ;;  %v992_v25 = vadd.f32 %v991_v46, %v990_v38  ;;  %v932_v6 = vmul.f32 %v7545_v58, %v7545_v58  ;;  %v956_v30 = vadd.f32 %v955_v48, %v929_v32  ;;  %v6285_v33 = vld [vmem:[%s9458_s1 + $0x8] ss:$12 sps:$4 sm:$0xff]  }
 0x177   :  { %1087 = vmatmul.mubr.f32.vlgmr.msra.gmra.mrb[48].mxu0 %v804_v42  ;;  %5664 = vmatprep.subr.bf16.mxu1 %v9447_v4  ;;  %v1015_v28 = vadd.f32 %v1014_v41, %v934_v55 }
 0x178   :  { %5632 = vmatpush3.bf16.msra.mxu0 %v6879_v5  ;;  %1228 = vmatprep.mubr.f32.mxu0 %v992_v25  ;;  %v957_v5 = vadd.f32 %v956_v30, %v932_v6 }
 0x179   :  { %5634 = vmatprep.subr.bf16.mxu0 %v6892_v7  ;;  %5355 = vmatprep.mubr.msk.f32.mxu1 %vm6390_vm4, %v9448_v36  ;;  %v1016_v34 = vrot.slane %v1015_v28, 4 }
 0x17a   :  { %5666 = vmatpush3.bf16.msra.mxu1 %v6904_v9  ;;  %v958_v7 = vrot.slane %v957_v5, 4 }
 0x17b   :  { %5667 = vmatprep.subr.bf16.mxu1 %v9447_v4  ;;  %v1017_v9 = vadd.f32 %v1016_v34, %v1015_v28 }
 0x17c   :  { %5636 = vmatpush3.bf16.msra.mxu0 %v6898_v8  ;;  %v959_v8 = vadd.f32 %v958_v7, %v957_v5  ;;  %v668_v7 = vld [vmem:[%s9459_s28] sm:$0x1] }
 0x17d   :  { %5638 = vmatprep.subr.bf16.mxu0 %v6911_v10  ;;  %v1018_v10 = vrot.slane %v1017_v9, 2 }
 0x17e   :  { %5669 = vmatpush3.bf16.msra.mxu1 %v6923_v12  ;;  %v9449_v12 = vld [vmem:[#allocation5_spill] sm:$0xff] }
 0x17f   :  { %5670 = vmatprep.subr.bf16.mxu1 %v9447_v4 }
 0x180   :  { %5640 = vmatpush3.bf16.msra.mxu0 %v6917_v11  ;;  %v960_v11 = vrot.slane %v959_v8, 2 }
 0x181   :  { %5642 = vmatprep.subr.bf16.mxu0 %v6930_v13  ;;  %v9450_v13 = vld [vmem:[#allocation7_spill] sm:$0xff] }
 0x182   :  { %5672 = vmatpush3.bf16.msra.mxu1 %v6942_v15  ;;  %v1019_v15 = vadd.f32 %v1018_v10, %v1017_v9  ;;  %v669_v10 = vld [vmem:[%s9460_s27] sm:$0x1] }
 0x183   :  { %5673 = vmatprep.subr.bf16.mxu1 %v9447_v4 }
 0x184   :  { %5644 = vmatpush3.bf16.msra.mxu0 %v6936_v14  ;;  %v9452_v14 = vld [vmem:[#allocation8_spill] sm:$0xff] }
 0x185   :  { %5646 = vmatprep.subr.bf16.mxu0 %v6949_v16  ;;  %v961_v16 = vadd.f32 %v960_v11, %v959_v8 }
 0x186   :  { %5675 = vmatpush3.bf16.msra.mxu1 %v6961_v18  ;;  %v1020_v18 = vrot.slane %v1019_v15, 1 }
 0x187   :  { %5676 = vmatprep.subr.bf16.mxu1 %v9447_v4  ;;  %v962_v62 = vrot.slane %v961_v16, 1 }
 0x188   :  { %5648 = vmatpush3.bf16.msra.mxu0 %v6955_v17  ;;  %v9455_v17 = vld [vmem:[#allocation12_spill] sm:$0xff]  ;;  %v1021_v38 = vadd.f32 %v1020_v18, %v1019_v15  ;;  %v6295_v18 = vld [vmem:[%s9289_s7 + $0x34] ss:$8 sps:$4 sm:$0xff]  }
 0x189   :  { %5650 = vmatprep.subr.bf16.mxu0 %v9449_v12  ;;  %v963_v37 = vadd.f32 %v962_v62, %v961_v16  ;;  %v6288_v15 = vld [vmem:[%s9289_s7] ss:$8 sps:$4 sm:$0xff]   ;;  %v6292_v16 = vld [vmem:[%s9289_s7 + $0x24] ss:$8 sps:$4 sm:$0xff]  }
 0x18a   :  { %5678 = vmatpush3.bf16.msra.mxu1 %v9450_v13  ;;  %v6286_v13 = vld [vmem:[%s9289_s7 + $0x4] ss:$8 sps:$4 sm:$0xff]   ;;  %v6300_v62 = vld [vmem:[%s9289_s7 + $0x40] ss:$8 sps:$4 sm:$0xff]  }
 0x18b   :  { %5679 = vmatprep.subr.bf16.mxu1 %v9447_v4 }
 0x18c   :  { %5652 = vmatpush3.bf16.msra.mxu0 %v9451_v52  ;;  %v6289_v52 = vld [vmem:[%s9289_s7 + $0x14] ss:$8 sps:$4 sm:$0xff]  }
 0x18d   :  { %5654 = vmatprep.subr.bf16.mxu0 %v9452_v14  ;;  %v6291_v14 = vld [vmem:[%s9289_s7 + $0x10] ss:$8 sps:$4 sm:$0xff]  }
 0x18e   :  { %5681 = vmatpush3.bf16.msra.mxu1 %v9453_v29  ;;  %v6294_v29 = vld [vmem:[%s9289_s7 + $0x20] ss:$8 sps:$4 sm:$0xff]  }
 0x18f   :  { %5682 = vmatprep.subr.bf16.mxu1 %v9447_v4 }
 0x190   :  { %5656 = vmatpush3.bf16.msra.mxu0 %v9454_v2  ;;  %v6297_v2 = vld [vmem:[%s9289_s7 + $0x30] ss:$8 sps:$4 sm:$0xff]  }
 0x191   :  { %5658 = vmatprep.subr.bf16.mxu0 %v9455_v17  ;;  %v6298_v17 = vld [vmem:[%s9289_s7 + $0x44] ss:$8 sps:$4 sm:$0xff]  }
 0x192   :  { %5684 = vmatpush3.bf16.msra.mxu1 %v9456_v31  ;;  %v6301_v31 = vld [vmem:[%s9289_s7 + $0x54] ss:$8 sps:$4 sm:$0xff]  }
 0x193   :  { %5696 = vmatprep.subr.bf16.mxu1 %v9447_v4 }
 0x194   :  { %5660 = vmatpush3.bf16.msra.mxu0 %v9457_v44  ;;  %v6304_v44 = vld [vmem:[%s9289_s7 + $0x64] ss:$8 sps:$4 sm:$0xff]  }
 0x195   :  { %5356 = vmatmul.mubr.f32.vlgmr.msra.gmra.mrb[50].mxu1 %v1021_v38  ;;  %5686 = vmatprep.subr.bf16.mxu0 %v6282_v61  ;;  %v6303_v38 = vld [vmem:[%s9289_s7 + $0x50] ss:$8 sps:$4 sm:$0xff]  }
 0x196   :  { %5369 = vmatprep.mubr.msk.f32.mxu1 %vm6390_vm4, %v9448_v36  ;;  %5698 = vmatpush3.bf16.msra.mxu1 %v6285_v33 }
 0x197   :  { %1229 = vmatmul.mubr.f32.vlgmr.msra.gmra.mrb[50].mxu0 %v963_v37  ;;  %v6306_v37 = vld [vmem:[%s9289_s7 + $0x60] ss:$8 sps:$4 sm:$0xff]  }
 0x198   :  { %1380 = vmatprep.mubr.f32.mxu0 %v9448_v36  ;;  %5688 = vmatpush1.bf16.msra.mxu0 %v6284_v35 }
 0x199   :  { %5689 = vmatprep.subr.bf16.mxu0 %v9447_v4 }
 0x248   :  { %v1158_v46 = vpop.f32.mrb[48].mxu1 }
 0x249   :  { %v5322_v40 = vpop.f32.mrb[49].mxu1 }
 0x24a   :  { %v5074_v27 = vpop.f32.mrb[48].mxu0  ;;  %v6313_v40 = vld [vmem:[%s9289_s7 + $0x94] ss:$8 sps:$4 sm:$0xff]  }
 0x24b   :  { %v5075_v53 = vpop.f32.mrb[49].mxu0 }
 0x24c   :  { %v5076_v42 = vadd.f32 %v5075_v53, %v5074_v27  ;;  %v6315_v27 = vld [vmem:[%s9289_s7 + $0x90] ss:$8 sps:$4 sm:$0xff]   ;;  %v6316_v53 = vld [vmem:[%s9289_s7 + $0xa4] ss:$8 sps:$4 sm:$0xff]  }
 0x24e   :  { %v1159_v39 = vadd.f32 %v5076_v42, %v1158_v46  ;;  %v6312_v46 = vld [vmem:[%s9289_s7 + $0x80] ss:$8 sps:$4 sm:$0xff]  }
 0x24f   :  { %v6318_v42 = vld [vmem:[%s9289_s7 + $0xa0] ss:$8 sps:$4 sm:$0xff]  }
 0x250   :  { %v1163_v48 = vmul.f32 0.00021701389, %v1159_v39  ;;  %v6319_v39 = vld [vmem:[%s9289_s7 + $0xb4] ss:$8 sps:$4 sm:$0xff]  }
 0x252   :  { %v1305_v30 = vmul.f32 %v1163_v48, %v1163_v48 }
 0x268   :  { %v1300_v25 = vpop.f32.mrb[50].mxu1 }
 0x269   :  { %v5357_v63 = vpop.f32.mrb[51].mxu1 }
 0x26a   :  { %v5126_v32 = vpop.f32.mrb[50].mxu0  ;;  %v6322_v63 = vld [vmem:[%s9289_s7 + $0xc4] ss:$8 sps:$4 sm:$0xff]  }
 0x26b   :  { %v5127_v55 = vpop.f32.mrb[51].mxu0 }
 0x26c   :  { %v5128_v41 = vadd.f32 %v5127_v55, %v5126_v32  ;;  %v6324_v32 = vld [vmem:[%s9289_s7 + $0xc0] ss:$8 sps:$4 sm:$0xff]   ;;  %v6325_v55 = vld [vmem:[%s9289_s7 + $0xd4] ss:$8 sps:$4 sm:$0xff]  }
 0x26e   :  { %v1301_v6 = vadd.f32 %v5128_v41, %v1300_v25  ;;  %v6321_v25 = vld [vmem:[%s9289_s7 + $0xb0] ss:$8 sps:$4 sm:$0xff]   ;;  %v6328_v41 = vld [vmem:[%s9289_s7 + $0xe4] ss:$8 sps:$4 sm:$0xff]  }
 0x270   :  { %v1304_v28 = vmul.f32 0.00021701389, %v1301_v6  ;;  %v6330_v6 = vld [vmem:[%s9289_s7 + $0xe0] ss:$8 sps:$4 sm:$0xff]  }
 0x272   :  { %v1306_v5 = vsub.f32 %v1304_v28, %v1305_v30  ;;  %v6331_v30 = vld [vmem:[%s9289_s7 + $0xf4] ss:$8 sps:$4 sm:$0xff]   ;;  %v6333_v28 = vld [vmem:[%s9289_s7 + $0xf0] ss:$8 sps:$4 sm:$0xff]  }
 0x274   :  { %v1307_v34 = vadd.f32 1e-05, %v1306_v5  ;;  %v6334_v5 = vld [vmem:[%s9289_s7 + $0x104] ss:$8 sps:$4 sm:$0xff]  }
 0x276   :  { %6358 = vrsqrt.f32 %v1307_v34 }
 0x280   :  { %v6359_v9 = vpop.eup %6358 }
 0x281   :  { %v1309_v8 = vmul.f32 %v6359_v9, %v668_v7  ;;  %v9461_v9 = vld [vmem:[#allocation14_spill] sm:$0xff] }
 0x283   :  { %4678 = vmatmul.mubr.msk.f32.vlgmr.msra.gmra.mrb[52].mxu0 %vm1312_vm5, %v1309_v8  ;;  %v1310_v11 = vmul.f32 %v1309_v8, %v1163_v48  ;;  %v6327_v48 = vld [vmem:[%s9289_s7 + $0xd0] ss:$8 sps:$4 sm:$0xff]  }
 0x284   :  { %5691 = vmatpush3.bf16.msra.mxu0 %v6285_v33  ;;  %5362 = vmatprep.mubr.msk.f32.mxu0 %vm6390_vm4, %v9448_v36  ;;  %v6310_v33 = vld [vmem:[%s9289_s7 + $0x84] ss:$8 sps:$4 sm:$0xff]  }
 0x285   :  { %5693 = vmatprep.subr.bf16.mxu0 %v6282_v61  ;;  %v1311_v12 = vsub.f32 %v669_v10, %v1310_v11  ;;  %v6307_v61 = vld [vmem:[%s9289_s7 + $0x74] ss:$8 sps:$4 sm:$0xff]  }
 0x287   :  { %5363 = vmatmul.mubr.msk.f32.vlgmr.msra.gmra.mrb[54].mxu0 %vm1312_vm5, %v1309_v8  ;;  %5370 = vmatmul.mubr.msk.f32.vlgmr.msra.gmra.mrb[52].mxu1 %vm1312_vm5, %v1311_v12 }
 0x288   :  { %5695 = vmatpush1.bf16.msra.mxu0 %v6284_v35  ;;  %1524 = vmatprep.mubr.f32.mxu0 %v9448_v36  ;;  %v6309_v35 = vld [vmem:[%s9289_s7 + $0x70] ss:$8 sps:$4 sm:$0xff]  }
 0x289   :  { %5700 = vmatprep.subr.bf16.mxu0 %v6286_v13 }
 0x28b   :  { %4680 = vmatmul.mubr.msk.f32.vlgmr.msra.gmra.mrb[56].mxu0 %vm1312_vm5, %v1311_v12 }
 0x28c   :  { %5702 = vmatpush1.bf16.msra.mxu0 %v6288_v15 }
 0x28d   :  { %5704 = vmatprep.subr.bf16.mxu0 %v6289_v52 }
 0x290   :  { %5706 = vmatpush1.bf16.msra.mxu0 %v6291_v14  ;;  %v9462_v14 = vld [vmem:[#allocation17_spill] sm:$0xff] }
 0x291   :  { %5708 = vmatprep.subr.bf16.mxu0 %v6292_v16 }
 0x294   :  { %5710 = vmatpush1.bf16.msra.mxu0 %v6294_v29  ;;  %v9463_v29 = vld [vmem:[#allocation21_spill] sm:$0xff] }
 0x295   :  { %5712 = vmatprep.subr.bf16.mxu0 %v6295_v18 }
 0x298   :  { %5714 = vmatpush1.bf16.msra.mxu0 %v6297_v2 }
 0x299   :  { %5716 = vmatprep.subr.bf16.mxu0 %v6298_v17  ;;  %v9464_v17 = vld [vmem:[#allocation19_spill] sm:$0xff] }
 0x29c   :  { %5718 = vmatpush1.bf16.msra.mxu0 %v6300_v62 }
 0x29d   :  { %5720 = vmatprep.subr.bf16.mxu0 %v6301_v31  ;;  %v9465_v31 = vld [vmem:[#allocation18_spill] sm:$0xff] }
 0x2a0   :  { %5722 = vmatpush1.bf16.msra.mxu0 %v6303_v38 }
 0x2a1   :  { %5724 = vmatprep.subr.bf16.mxu0 %v6304_v44  ;;  %v9466_v44 = vld [vmem:[#allocation22_spill] sm:$0xff] }
 0x2a4   :  { %5726 = vmatpush1.bf16.msra.mxu0 %v6306_v37 }
 0x2a5   :  { %5728 = vmatprep.subr.bf16.mxu0 %v6307_v61 }
 0x2a8   :  { %5730 = vmatpush1.bf16.msra.mxu0 %v6309_v35 }
 0x2a9   :  { %5732 = vmatprep.subr.bf16.mxu0 %v6310_v33  ;;  %v9467_v33 = vld [vmem:[#allocation24_spill] sm:$0xff] }
 0x2ac   :  { %5734 = vmatpush1.bf16.msra.mxu0 %v6312_v46 }
 0x2ad   :  { %5736 = vmatprep.subr.bf16.mxu0 %v6313_v40 }
 0x2b0   :  { %5738 = vmatpush1.bf16.msra.mxu0 %v6315_v27  ;;  %v9468_v27 = vld [vmem:[#allocation26_spill] sm:$0xff] }
 0x2b1   :  { %5740 = vmatprep.subr.bf16.mxu0 %v6316_v53 }
 0x2b4   :  { %5742 = vmatpush1.bf16.msra.mxu0 %v6318_v42 }
 0x2b5   :  { %5744 = vmatprep.subr.bf16.mxu0 %v6319_v39 }
 0x2b8   :  { %5746 = vmatpush1.bf16.msra.mxu0 %v6321_v25 }
 0x2b9   :  { %5748 = vmatprep.subr.bf16.mxu0 %v6322_v63  ;;  %v9470_v63 = vld [vmem:[#allocation31_spill] sm:$0xff] }
 0x2bc   :  { %5750 = vmatpush1.bf16.msra.mxu0 %v6324_v32 }
 0x2bd   :  { %5752 = vmatprep.subr.bf16.mxu0 %v6325_v55 }
 0x2c0   :  { %5754 = vmatpush1.bf16.msra.mxu0 %v6327_v48 }
 0x2c1   :  { %5756 = vmatprep.subr.bf16.mxu0 %v6328_v41 }
 0x2c4   :  { %5758 = vmatpush1.bf16.msra.mxu0 %v6330_v6 }
 0x2c5   :  { %5760 = vmatprep.subr.bf16.mxu0 %v6331_v30 }
 0x2c8   :  { %5762 = vmatpush1.bf16.msra.mxu0 %v6333_v28 }
 0x2c9   :  { %5764 = vmatprep.subr.bf16.mxu0 %v6334_v5  ;;  %v9471_v5 = vld [vmem:[#allocation30_spill] sm:$0xff] }
 0x356   :  { %v1382_v34 = vpop.f32.mrb[52].mxu0 }
 0x357   :  { %v1384_v7 = vpop.f32.mrb[53].mxu0  ;;  %v7753_v8 = vrot.slane %v1382_v34, %v9461_v9 }
 0x358   :  { %v7756_v10 = vrot.slane %v1384_v7, %v9461_v9 }
 0x359   :  { %v1613_v52 = vmul.f32 %v7753_v8, %v7079_v60  ;;  %v1616_v16 = vmul.f32 %v7753_v8, %v9462_v14  ;;  %v1619_v18 = vmul.f32 %v7753_v8, %v9463_v29  ;;  %v1622_v61 = vmul.f32 %v7753_v8, %v7119_v26  ;;  %v9469_v26 = vld [vmem:[#allocation28_spill] sm:$0xff] }
 0x35a   :  { %v7758_v11 = vpop.f32.mrb[54].mxu0  ;;  %v7760_v12 = vpop.f32.mrb[52].mxu1  ;;  %v1614_v62 = vmul.f32 %v7756_v10, %v9464_v17  ;;  %v1617_v38 = vmul.f32 %v7756_v10, %v9465_v31  ;;  %v1620_v37 = vmul.f32 %v7756_v10, %v9466_v44  ;;  %v1623_v46 = vmul.f32 %v7756_v10, %v9467_v33  ;;  %v6336_v29 = vld [vmem:[%s9289_s7 + $0x100] ss:$8 sps:$4 sm:$0xff]   ;;  %v9474_v17 = vld [vmem:[#allocation35_spill] sm:$0xff] }
 0x35b   :  { %v5364_v13 = vpop.f32.mrb[55].mxu0  ;;  %v5371_v15 = vpop.f32.mrb[53].mxu1  ;;  %v1626_v40 = vmul.f32 %v7756_v10, %v7152_v43  ;;  %v1625_v53 = vmul.f32 %v7753_v8, %v9468_v27  ;;  %v1629_v39 = vmul.f32 %v7756_v10, %v7179_v20  ;;  %v1628_v25 = vmul.f32 %v7753_v8, %v9469_v26 }
 0x35c   :  { %v1632_v32 = vmul.f32 %v7756_v10, %v9470_v63  ;;  %v1631_v34 = vmul.f32 %v7753_v8, %v9471_v5  ;;  %v1635_v7 = vmul.f32 %v7756_v10, %v7227_v22  ;;  %v9472_v13 = vld [vmem:[#allocation33_spill] sm:$0xff]  ;;  %v6337_v22 = vld [vmem:[%s9289_s7 + $0x114] ss:$8 sps:$4 sm:$0xff]   ;;  %v1644_v26 = vmul.f32 %v7756_v10, %v7306_v51 }
 0x35d   :  { %v1634_v15 = vmul.f32 %v7753_v8, %v9472_v13  ;;  %v6340_v51 = vld [vmem:[%s9289_s7 + $0x124] ss:$8 sps:$4 sm:$0xff]  }
 0x35e   :  { %v1526_v2 = vpop.f32.mrb[56].mxu0 }
 0x35f   :  { %v7777_v60 = vrot.slane %v1526_v2, %v9461_v9  ;;  %v1528_v35 = vpop.f32.mrb[57].mxu0 }
 0x360   :  { %v7786_v42 = vrot.slane %v1528_v35, %v9461_v9 }
 0x361   :  { %v1697_v55 = vadd.f32 %v7777_v60, %v1613_v52  ;;  %v1700_v48 = vadd.f32 %v7777_v60, %v1616_v16  ;;  %v7797_v43 = vadd.f32 %v7777_v60, %v1619_v18  ;;  %v7800_v41 = vadd.f32 %v7777_v60, %v1622_v61  ;;  %v9473_v52 = vld [vmem:[#allocation36_spill] sm:$0xff] }
 0x362   :  { %v1698_v6 = vadd.f32 %v7786_v42, %v1614_v62  ;;  %v1701_v20 = vadd.f32 %v7786_v42, %v1617_v38  ;;  %v1704_v30 = vadd.f32 %v7786_v42, %v1620_v37  ;;  %v7806_v28 = vadd.f32 %v7786_v42, %v1623_v46 }
 0x363   :  { %v1638_v14 = vmul.f32 %v7756_v10, %v9473_v52  ;;  %v1769_v18 = vmax.f32 %v1697_v55, 0.0  ;;  %v1637_v62 = vmul.f32 %v7753_v8, %v9474_v17  ;;  %v7825_v31 = vadd.f32 %v7786_v42, %v1626_v40  ;;  %v9475_v40 = vld [vmem:[#allocation39_spill] sm:$0xff] }
 0x364   :  { %v1770_v16 = vmax.f32 %v1698_v6, 0.0  ;;  %v1773_v2 = vmax.f32 %v1701_v20, 0.0  ;;  %v7828_v38 = vadd.f32 %v7777_v60, %v1625_v53  ;;  %v7831_v44 = vadd.f32 %v7786_v42, %v1629_v39  ;;  %v9476_v53 = vld [vmem:[#allocation38_spill] sm:$0xff]  ;;  %v9478_v20 = vld [vmem:[#allocation44_spill] sm:$0xff]  ;;  %v9481_v17 = vld [vmem:[#allocation47_spill] sm:$0xff] }
 0x365   :  { %v7834_v37 = vadd.f32 %v7777_v60, %v1628_v25  ;;  %v7837_v61 = vadd.f32 %v7786_v42, %v1632_v32  ;;  %v7840_v35 = vadd.f32 %v7777_v60, %v1631_v34  ;;  %v7843_v33 = vadd.f32 %v7786_v42, %v1635_v7  ;;  %v9477_v25 = vld [vmem:[#allocation41_spill] sm:$0xff]  ;;  %v6339_v6 = vld [vmem:[%s9289_s7 + $0x110] ss:$8 sps:$4 sm:$0xff]  }
 0x366   :  { %2049 = vmatprep.mubr.f32.mxu0 %v1770_v16  ;;  %v7846_v46 = vadd.f32 %v7777_v60, %v1634_v15  ;;  %v1641_v27 = vmul.f32 %v7756_v10, %v9475_v40  ;;  %v1640_v39 = vmul.f32 %v7753_v8, %v9476_v53  ;;  %v1643_v63 = vmul.f32 %v7753_v8, %v9477_v25  ;;  %v9479_v34 = vld [vmem:[#allocation43_spill] sm:$0xff] }
 0x367   :  { %2050 = vmatmul.mubr.f32.vlgmr.msra.gmra.mrb[58].mxu0 %v1769_v18  ;;  %v1772_v32 = vmax.f32 %v1700_v48, 0.0  ;;  %v1776_v55 = vmax.f32 %v1704_v30, 0.0  ;;  %v1647_v5 = vmul.f32 %v7756_v10, %v9478_v20  ;;  %v1646_v7 = vmul.f32 %v7753_v8, %v9479_v34  ;;  %v9480_v18 = vld [vmem:[#allocation46_spill] sm:$0xff] }
 0x368   :  { %5766 = vmatpush1.bf16.msra.mxu0 %v6336_v29  ;;  %2055 = vmatprep.mubr.f32.mxu0 %v1773_v2  ;;  %v7867_v13 = vadd.f32 %v7786_v42, %v1638_v14  ;;  %v7870_v48 = vadd.f32 %v7777_v60, %v1637_v62  ;;  %v7873_v30 = vadd.f32 %v7786_v42, %v1641_v27  ;;  %v1775_v53 = vmax.f32 %v7797_v43, 0.0 }
 0x369   :  { %5768 = vmatprep.subr.bf16.mxu0 %v6337_v22  ;;  %v7876_v15 = vadd.f32 %v7777_v60, %v1640_v39  ;;  %v7879_v52 = vadd.f32 %v7786_v42, %v1644_v26  ;;  %v7882_v16 = vadd.f32 %v7777_v60, %v1643_v63  ;;  %v7885_v29 = vadd.f32 %v7786_v42, %v1647_v5  ;;  %v9482_v22 = vld [vmem:[#allocation48_spill] sm:$0xff]  ;;  %v6343_v26 = vld [vmem:[%s9289_s7 + $0x134] ss:$8 sps:$4 sm:$0xff]  }
 0x36a   :  { %v7888_v14 = vadd.f32 %v7777_v60, %v1646_v7  ;;  %v1650_v2 = vmul.f32 %v7756_v10, %v9480_v18  ;;  %v1649_v62 = vmul.f32 %v7753_v8, %v9481_v17  ;;  %v1653_v40 = vmul.f32 %v7756_v10, %v9482_v22  ;;  %v6342_v39 = vld [vmem:[%s9289_s7 + $0x120] ss:$8 sps:$4 sm:$0xff]   ;;  %v9485_v7 = vld [vmem:[#allocation54_spill] sm:$0xff]  ;;  %v9486_v22 = vld [vmem:[#allocation55_spill] sm:$0xff] }
 0x36b   :  { %2056 = vmatmul.mubr.f32.gmra.mrb[60].mxu0 %v1772_v32  ;;  %v1652_v27 = vmul.f32 %v7753_v8, %v7380_v21  ;;  %v1779_v32 = vmax.f32 %v7806_v28, 0.0  ;;  %v1655_v20 = vmul.f32 %v7753_v8, %v7399_v54  ;;  %v9484_v5 = vld [vmem:[#allocation52_spill] sm:$0xff]  ;;  %v1778_v18 = vmax.f32 %v7800_v41, 0.0  ;;  %v6345_v28 = vld [vmem:[%s9289_s7 + $0x130] ss:$8 sps:$4 sm:$0xff]  }
 0x36c   :  { %2061 = vmatprep.mubr.f32.mxu0 %v1776_v55  ;;  %5770 = vmatpush1.bf16.msra.mxu0 %v6339_v6  ;;  %v7906_v25 = vadd.f32 %v7786_v42, %v1650_v2  ;;  %v7909_v63 = vadd.f32 %v7777_v60, %v1649_v62  ;;  %v7912_v21 = vadd.f32 %v7786_v42, %v1653_v40  ;;  %v9483_v55 = vld [vmem:[#allocation50_spill] sm:$0xff]  ;;  %v6346_v62 = vld [vmem:[%s9289_s7 + $0x144] ss:$8 sps:$4 sm:$0xff]  }
 0x36d   :  { %5772 = vmatprep.subr.bf16.mxu0 %v6340_v51  ;;  %v7915_v43 = vadd.f32 %v7777_v60, %v1652_v27  ;;  %v1656_v6 = vmul.f32 %v7756_v10, %v9483_v55  ;;  %v1659_v34 = vmul.f32 %v7756_v10, %v9484_v5  ;;  %v1658_v51 = vmul.f32 %v7753_v8, %v9485_v7  ;;  %v9487_v27 = vld [vmem:[#allocation57_spill] sm:$0xff] }
 0x36e   :  { %v7934_v54 = vadd.f32 %v7777_v60, %v1655_v20  ;;  %v1662_v40 = vmul.f32 %v7756_v10, %v9486_v22  ;;  %v1782_v55 = vmax.f32 %v7825_v31, 0.0  ;;  %v9490_v22 = vld [vmem:[#allocation60_spill] sm:$0xff] }
 0x36f   :  { %2062 = vmatmul.mubr.f32.gmra.mrb[62].mxu0 %v1775_v53  ;;  %v7931_v2 = vadd.f32 %v7786_v42, %v1656_v6  ;;  %v7937_v17 = vadd.f32 %v7786_v42, %v1659_v34  ;;  %v7943_v41 = vadd.f32 %v7777_v60, %v1658_v51  ;;  %v1661_v53 = vmul.f32 %v7753_v8, %v9487_v27  ;;  %v6348_v34 = vld [vmem:[%s9289_s7 + $0x140] ss:$8 sps:$4 sm:$0xff]  }
 0x370   :  { %2067 = vmatprep.mubr.f32.mxu0 %v1779_v32  ;;  %5774 = vmatpush1.bf16.msra.mxu0 %v6342_v39  ;;  %v9488_v39 = vld [vmem:[#allocation58_spill] sm:$0xff]  ;;  %v7955_v6 = vadd.f32 %v7786_v42, %v1662_v40  ;;  %v1667_v51 = vmul.f32 %v7753_v8, %v7465_v0  ;;  %v1671_v40 = vmul.f32 %v7756_v10, %v9490_v22  ;;  %v1785_v27 = vmax.f32 %v7831_v44, 0.0 }
 0x371   :  { %5776 = vmatprep.subr.bf16.mxu0 %v6343_v26  ;;  %v1665_v32 = vmul.f32 %v7756_v10, %v9488_v39  ;;  %v1664_v26 = vmul.f32 %v7753_v8, %v7451_v56  ;;  %v7958_v20 = vadd.f32 %v7777_v60, %v1661_v53  ;;  %v9489_v56 = vld [vmem:[#allocation59_spill] sm:$0xff]  ;;  %v1670_v0 = vmul.f32 %v7753_v8, %v7479_v24  ;;  %v9492_v44 = vld [vmem:[#allocation62_spill] sm:$0xff] }
 0x372   :  { %v1668_v7 = vmul.f32 %v7756_v10, %v9489_v56  ;;  %v7984_v39 = vadd.f32 %v7777_v60, %v1667_v51  ;;  %v7999_v56 = vrot.slane %v7758_v11, %v9461_v9  ;;  %v6351_v24 = vld [vmem:[%s9289_s7 + $0x150] ss:$8 sps:$4 sm:$0xff]   ;;  %v1676_v51 = vmul.f32 %v7753_v8, %v7507_v59  ;;  %v6352_v11 = vld [vmem:[%s9289_s7 + $0x164] ss:$8 sps:$4 sm:$0xff]  }
 0x373   :  { %2068 = vmatmul.mubr.f32.gmra.mrb[64].mxu0 %v1778_v18  ;;  %v7961_v5 = vadd.f32 %v7786_v42, %v1665_v32  ;;  %v7967_v31 = vadd.f32 %v7777_v60, %v1664_v26  ;;  %v1781_v18 = vmax.f32 %v7828_v38, 0.0  ;;  %v7989_v38 = vadd.f32 %v7786_v42, %v1671_v40 }
 0x374   :  { %2073 = vmatprep.mubr.f32.mxu0 %v1782_v55  ;;  %5778 = vmatpush1.bf16.msra.mxu0 %v6345_v28  ;;  %v6349_v28 = vld [vmem:[%s9289_s7 + $0x154] ss:$8 sps:$4 sm:$0xff]   ;;  %v7981_v53 = vadd.f32 %v7786_v42, %v1668_v7  ;;  %v1673_v55 = vmul.f32 %v7753_v8, %v7493_v23  ;;  %v1677_v26 = vmul.f32 %v7756_v10, %v9492_v44  ;;  %v1784_v23 = vmax.f32 %v7834_v37, 0.0 }
 0x375   :  { %5780 = vmatprep.subr.bf16.mxu0 %v6346_v62  ;;  %v9491_v62 = vld [vmem:[#allocation61_spill] sm:$0xff]  ;;  %v8005_v7 = vadd.f32 %v7777_v60, %v1670_v0  ;;  %v1788_v40 = vmax.f32 %v7837_v61, 0.0  ;;  %v8024_v59 = vadd.f32 %v7777_v60, %v1676_v51  ;;  %v9493_v37 = vld [vmem:[#allocation63_spill] sm:$0xff]  ;;  %v8032_v0 = vrot.slane %v7760_v12, %v9461_v9  ;;  %v9496_v51 = vld [vmem:[#allocation16_spill] sm:$0xff] }
 0x376   :  { %v1674_v32 = vmul.f32 %v7756_v10, %v9491_v62  ;;  %v8020_v22 = vadd.f32 %v7786_v42, %v1677_v26  ;;  %v9494_v62 = vld [vmem:[#allocation64_spill] sm:$0xff]  ;;  %v1787_v61 = vmax.f32 %v7840_v35, 0.0  ;;  %v1682_v12 = vmul.f32 %v7753_v8, %v7545_v58  ;;  %v9495_v26 = vld [vmem:[#allocation15_spill] sm:$0xff] }
 0x377   :  { %2074 = vmatmul.mubr.f32.gmra.mrb[66].mxu0 %v1781_v18 }
 0x378   :  { %2079 = vmatprep.mubr.f32.mxu0 %v1785_v27  ;;  %5782 = vmatpush1.bf16.msra.mxu0 %v6348_v34  ;;  %v8014_v18 = vadd.f32 %v7786_v42, %v1674_v32  ;;  %v8017_v34 = vadd.f32 %v7777_v60, %v1673_v55  ;;  %v1679_v27 = vmul.f32 %v7753_v8, %v7520_v3  ;;  %v6354_v55 = vld [vmem:[%s9289_s7 + $0x160] ss:$8 sps:$4 sm:$0xff]   ;;  %v9498_v8 = vld [vmem:[#allocation23_spill] sm:$0xff] }
 0x379   :  { %5784 = vmatprep.subr.bf16.mxu0 %v6349_v28  ;;  %v1680_v28 = vmul.f32 %v7756_v10, %v9493_v37  ;;  %v1683_v32 = vmul.f32 %v7756_v10, %v9494_v62  ;;  %v6355_v10 = vld [vmem:[%s9289_s7 + $0x174] ss:$8 sps:$4 sm:$0xff]   ;;  %v8062_v58 = vadd.f32 %v7777_v60, %v1682_v12 }
 0x37a   :  { %v8044_v3 = vadd.f32 %v7777_v60, %v1679_v27  ;;  %v6357_v60 = vld [vmem:[%s9289_s7 + $0x170] ss:$8 sps:$4 sm:$0xff]  }
 0x37b   :  { %2080 = vmatmul.mubr.f32.gmra.mrb[68].mxu0 %v1784_v23  ;;  %v8041_v44 = vadd.f32 %v7786_v42, %v1680_v28  ;;  %v8052_v35 = vadd.f32 %v7786_v42, %v1683_v32  ;;  %v1618_v23 = vmul.f32 %v7999_v56, %v9496_v51  ;;  %v1791_v28 = vmax.f32 %v7843_v33, 0.0  ;;  %v9499_v32 = vld [vmem:[#allocation25_spill] sm:$0xff]  ;;  %v9500_v12 = vld [vmem:[#allocation27_spill] sm:$0xff] }
 0x37c   :  { %2085 = vmatprep.mubr.f32.mxu0 %v1788_v40  ;;  %5786 = vmatpush1.bf16.msra.mxu0 %v6351_v24  ;;  %v1615_v24 = vmul.f32 %v7999_v56, %v9495_v26  ;;  %v9497_v40 = vld [vmem:[#allocation20_spill] sm:$0xff]  ;;  %v1630_v26 = vmul.f32 %v7999_v56, %v9500_v12  ;;  %v9501_v51 = vld [vmem:[#allocation29_spill] sm:$0xff] }
 0x37d   :  { %5788 = vmatprep.subr.bf16.mxu0 %v6352_v11  ;;  %v1621_v37 = vmul.f32 %v7999_v56, %v9497_v40  ;;  %v1624_v11 = vmul.f32 %v7999_v56, %v9498_v8  ;;  %v8070_v27 = vadd.f32 %v8032_v0, %v1618_v23  ;;  %v1633_v23 = vmul.f32 %v7999_v56, %v9501_v51  ;;  %v9506_v51 = vld [vmem:[#allocation42_spill] sm:$0xff] }
 0x37e   :  { %v8067_v42 = vadd.f32 %v8032_v0, %v1615_v24  ;;  %v1790_v24 = vmax.f32 %v7846_v46, 0.0  ;;  %v9503_v46 = vld [vmem:[#allocation34_spill] sm:$0xff] }
 0x37f   :  { %2086 = vmatmul.mubr.f32.gmra.mrb[70].mxu0 %v1787_v61  ;;  %v8073_v62 = vadd.f32 %v8032_v0, %v1621_v37  ;;  %v8079_v33 = vadd.f32 %v8032_v0, %v1624_v11  ;;  %v1627_v61 = vmul.f32 %v7999_v56, %v9499_v32  ;;  %v8093_v37 = vadd.f32 %v8032_v0, %v1630_v26  ;;  %v9504_v32 = vld [vmem:[#allocation37_spill] sm:$0xff] }
 0x380   :  { %2091 = vmatprep.mubr.f32.mxu0 %v1791_v28  ;;  %5790 = vmatpush1.bf16.msra.mxu0 %v6354_v55  ;;  %v1794_v55 = vmax.f32 %v7867_v13, 0.0  ;;  %v9502_v28 = vld [vmem:[#allocation32_spill] sm:$0xff]  ;;  %v8098_v11 = vadd.f32 %v8032_v0, %v1633_v23  ;;  %v1642_v12 = vmul.f32 %v7999_v56, %v9504_v32  ;;  %v1793_v23 = vmax.f32 %v7870_v48, 0.0  ;;  %v9508_v48 = vld [vmem:[#allocation49_spill] sm:$0xff] }
 0x381   :  { %5792 = vmatprep.subr.bf16.mxu0 %v6355_v10  ;;  %v8090_v40 = vadd.f32 %v8032_v0, %v1627_v61  ;;  %v1636_v8 = vmul.f32 %v7999_v56, %v9502_v28  ;;  %v1639_v10 = vmul.f32 %v7999_v56, %v9503_v46  ;;  %v9505_v13 = vld [vmem:[#allocation40_spill] sm:$0xff] }
 0x382   :  { %v1645_v61 = vmul.f32 %v7999_v56, %v9505_v13  ;;  %v8116_v46 = vadd.f32 %v8032_v0, %v1642_v12 }
 0x383   :  { %2092 = vmatmul.mubr.f32.gmra.mrb[72].mxu0 %v1790_v24  ;;  %v8107_v26 = vadd.f32 %v8032_v0, %v1636_v8  ;;  %v1648_v24 = vmul.f32 %v7999_v56, %v9506_v51  ;;  %v8113_v28 = vadd.f32 %v8032_v0, %v1639_v10  ;;  %v9507_v8 = vld [vmem:[#allocation45_spill] sm:$0xff]  ;;  %v1654_v10 = vmul.f32 %v7999_v56, %v9508_v48  ;;  %v9509_v51 = vld [vmem:[#allocation51_spill] sm:$0xff]  ;;  %v9511_v48 = vld [vmem:[#allocation56_spill] sm:$0xff] }
 0x384   :  { %2097 = vmatprep.mubr.f32.mxu0 %v1794_v55  ;;  %5794 = vmatpush1.bf16.msra.mxu0 %v6357_v60  ;;  %v8119_v32 = vadd.f32 %v8032_v0, %v1645_v61  ;;  %v1797_v60 = vmax.f32 %v7873_v30, 0.0  ;;  %v1651_v13 = vmul.f32 %v7999_v56, %v9507_v8  ;;  %v1657_v12 = vmul.f32 %v7999_v56, %v9509_v51 }
 0x385   :  { %5879 = vmatprep.subr.bf16.mxu0 %v9447_v4  ;;  %v8124_v55 = vadd.f32 %v8032_v0, %v1648_v24  ;;  %v1796_v61 = vmax.f32 %v7876_v15, 0.0  ;;  %v8137_v30 = vadd.f32 %v8032_v0, %v1654_v10  ;;  %v9510_v24 = vld [vmem:[#allocation53_spill] sm:$0xff]  ;;  %v1669_v15 = vmul.f32 %v7999_v56, %v7462_v49 }
 0x386   :  { %v8134_v9 = vadd.f32 %v8032_v0, %v1651_v13  ;;  %v1660_v4 = vmul.f32 %v7999_v56, %v9510_v24  ;;  %v8142_v8 = vadd.f32 %v8032_v0, %v1657_v12  ;;  %v1800_v13 = vmax.f32 %v7879_v52, 0.0 }
 0x387   :  { %2098 = vmatmul.mubr.f32.gmra.mrb[74].mxu0 %v1793_v23  ;;  %v1663_v23 = vmul.f32 %v7999_v56, %v9511_v48  ;;  %v1672_v51 = vmul.f32 %v7999_v56, %v7476_v57  ;;  %v1678_v57 = vmul.f32 %v7999_v56, %v7504_v47  ;;  %v1799_v52 = vmax.f32 %v7882_v16, 0.0 }
 0x388   :  { %2103 = vmatprep.mubr.f32.mxu0 %v1797_v60  ;;  %v1666_v60 = vmul.f32 %v7999_v56, %v7448_v45  ;;  %v8152_v10 = vadd.f32 %v8032_v0, %v1660_v4  ;;  %v8163_v45 = vadd.f32 %v8032_v0, %v1669_v15  ;;  %v1675_v4 = vmul.f32 %v7999_v56, %v7490_v19 }
 0x389   :  { %v8157_v12 = vadd.f32 %v8032_v0, %v1663_v23  ;;  %v8166_v49 = vadd.f32 %v8032_v0, %v1672_v51  ;;  %v1803_v48 = vmax.f32 %v7885_v29, 0.0  ;;  %v1684_v15 = vmul.f32 %v7999_v56, %v7542_v1 }
 0x38a   :  { %v8160_v24 = vadd.f32 %v8032_v0, %v1666_v60  ;;  %v8177_v23 = vadd.f32 %v8032_v0, %v1675_v4  ;;  %v8180_v60 = vadd.f32 %v8032_v0, %v1678_v57  ;;  %v1806_v16 = vmax.f32 %v7906_v25, 0.0 }
 0x38b   :  { %2104 = vmatmul.mubr.f32.gmra.mrb[76].mxu0 %v1796_v61  ;;  %v1681_v61 = vmul.f32 %v7999_v56, %v7517_v50  ;;  %v8188_v47 = vadd.f32 %v8032_v0, %v1684_v15  ;;  %v1802_v50 = vmax.f32 %v7888_v14, 0.0  ;;  %v1805_v29 = vmax.f32 %v7909_v63, 0.0 }
 0x38c   :  { %2109 = vmatprep.mubr.f32.mxu0 %v1800_v13  ;;  %v1809_v13 = vmax.f32 %v7912_v21, 0.0  ;;  %v1808_v1 = vmax.f32 %v7915_v43, 0.0  ;;  %v1812_v56 = vmax.f32 %v7931_v2, 0.0  ;;  %v1815_v14 = vmax.f32 %v7937_v17, 0.0 }
 0x38d   :  { %v8185_v19 = vadd.f32 %v8032_v0, %v1681_v61  ;;  %v1811_v0 = vmax.f32 %v7934_v54, 0.0  ;;  %v1814_v25 = vmax.f32 %v7943_v41, 0.0  ;;  %v1818_v63 = vmax.f32 %v7955_v6, 0.0 }
 0x38e   :  { %v1817_v21 = vmax.f32 %v7958_v20, 0.0  ;;  %v1821_v43 = vmax.f32 %v7961_v5, 0.0  ;;  %v1820_v2 = vmax.f32 %v7967_v31, 0.0  ;;  %v1824_v54 = vmax.f32 %v7981_v53, 0.0 }
 0x38f   :  { %2110 = vmatmul.mubr.f32.gmra.mrb[78].mxu0 %v1799_v52  ;;  %v1823_v17 = vmax.f32 %v7984_v39, 0.0  ;;  %v1827_v41 = vmax.f32 %v7989_v38, 0.0  ;;  %v1826_v6 = vmax.f32 %v8005_v7, 0.0  ;;  %v1830_v20 = vmax.f32 %v8014_v18, 0.0 }
 0x390   :  { %2115 = vmatprep.mubr.f32.mxu0 %v1803_v48  ;;  %v1829_v5 = vmax.f32 %v8017_v34, 0.0  ;;  %v1833_v31 = vmax.f32 %v8020_v22, 0.0  ;;  %v1832_v53 = vmax.f32 %v8024_v59, 0.0  ;;  %v1836_v39 = vmax.f32 %v8041_v44, 0.0 }
 0x391   :  { %v1835_v38 = vmax.f32 %v8044_v3, 0.0  ;;  %v1839_v7 = vmax.f32 %v8052_v35, 0.0  ;;  %v1838_v18 = vmax.f32 %v8062_v58, 0.0  ;;  %v1771_v34 = vmax.f32 %v8067_v42, 0.0 }
 0x392   :  { %v1774_v22 = vmax.f32 %v8070_v27, 0.0  ;;  %v1777_v59 = vmax.f32 %v8073_v62, 0.0  ;;  %v1780_v44 = vmax.f32 %v8079_v33, 0.0  ;;  %v1783_v3 = vmax.f32 %v8090_v40, 0.0 }
 0x393   :  { %2116 = vmatmul.mubr.f32.gmra.mrb[80].mxu0 %v1802_v50  ;;  %v1786_v35 = vmax.f32 %v8093_v37, 0.0  ;;  %v1789_v58 = vmax.f32 %v8098_v11, 0.0  ;;  %v1792_v42 = vmax.f32 %v8107_v26, 0.0  ;;  %v1795_v27 = vmax.f32 %v8113_v28, 0.0 }
 0x394   :  { %2121 = vmatprep.mubr.f32.mxu0 %v1806_v16  ;;  %v1798_v62 = vmax.f32 %v8116_v46, 0.0  ;;  %v1801_v33 = vmax.f32 %v8119_v32, 0.0  ;;  %v1804_v40 = vmax.f32 %v8124_v55, 0.0  ;;  %v1807_v37 = vmax.f32 %v8134_v9, 0.0 }
 0x395   :  { %v1810_v11 = vmax.f32 %v8137_v30, 0.0  ;;  %v1813_v26 = vmax.f32 %v8142_v8, 0.0  ;;  %v1816_v28 = vmax.f32 %v8152_v10, 0.0  ;;  %v1819_v9 = vmax.f32 %v8157_v12, 0.0  ;;  %v8266_v12 = vld [vmem:[%s9290_s8] sm:$0xff] }
 0x396   :  { %v1822_v46 = vmax.f32 %v8160_v24, 0.0  ;;  %v1825_v32 = vmax.f32 %v8163_v45, 0.0  ;;  %v1828_v55 = vmax.f32 %v8166_v49, 0.0  ;;  %v1831_v30 = vmax.f32 %v8177_v23, 0.0 }
 0x397   :  { %2122 = vmatmul.mubr.f32.gmra.mrb[82].mxu0 %v1805_v29  ;;  %v1834_v8 = vmax.f32 %v8180_v60, 0.0  ;;  %v1837_v10 = vmax.f32 %v8185_v19, 0.0  ;;  %v1840_v51 = vmax.f32 %v8188_v47, 0.0  ;;  %v2444_v24 = vunpack.c.h.bf16 %v8266_v12 }
 0x398   :  { %2127 = vmatprep.mubr.f32.mxu0 %v1809_v13 }
 0x399   :  { %4682 = vmatprep.mubr.msk.f32.mxu1 %vm2523_vm6, %v2444_v24 }
 0x39b   :  { %2128 = vmatmul.mubr.f32.gmra.mrb[84].mxu0 %v1808_v1 }
 0x39c   :  { %2133 = vmatprep.mubr.f32.mxu0 %v1812_v56 }
 0x39f   :  { %2134 = vmatmul.mubr.f32.gmra.mrb[86].mxu0 %v1811_v0 }
 0x3a0   :  { %2139 = vmatprep.mubr.f32.mxu0 %v1815_v14 }
 0x3a3   :  { %2140 = vmatmul.mubr.f32.gmra.mrb[88].mxu0 %v1814_v25 }
 0x3a4   :  { %2145 = vmatprep.mubr.f32.mxu0 %v1818_v63 }
 0x3a7   :  { %2146 = vmatmul.mubr.f32.gmra.mrb[90].mxu0 %v1817_v21 }
 0x3a8   :  { %2151 = vmatprep.mubr.f32.mxu0 %v1821_v43 }
 0x3ab   :  { %2152 = vmatmul.mubr.f32.gmra.mrb[92].mxu0 %v1820_v2 }
 0x3ac   :  { %2157 = vmatprep.mubr.f32.mxu0 %v1824_v54 }
 0x3af   :  { %2158 = vmatmul.mubr.f32.gmra.mrb[94].mxu0 %v1823_v17 }
 0x3b0   :  { %2163 = vmatprep.mubr.f32.mxu0 %v1827_v41 }
 0x3b3   :  { %2164 = vmatmul.mubr.f32.gmra.mrb[96].mxu0 %v1826_v6 }
 0x3b4   :  { %2169 = vmatprep.mubr.f32.mxu0 %v1830_v20 }
 0x3b7   :  { %2170 = vmatmul.mubr.f32.gmra.mrb[98].mxu0 %v1829_v5 }
 0x3b8   :  { %2175 = vmatprep.mubr.f32.mxu0 %v1833_v31 }
 0x3bb   :  { %2176 = vmatmul.mubr.f32.gmra.mrb[100].mxu0 %v1832_v53 }
 0x3bc   :  { %2181 = vmatprep.mubr.f32.mxu0 %v1836_v39 }
 0x3bf   :  { %2182 = vmatmul.mubr.f32.gmra.mrb[102].mxu0 %v1835_v38 }
 0x3c0   :  { %2187 = vmatprep.mubr.f32.mxu0 %v1839_v7 }
 0x3c3   :  { %2188 = vmatmul.mubr.f32.gmra.mrb[104].mxu0 %v1838_v18 }
 0x3c4   :  { %2258 = vmatprep.mubr.f32.mxu0 %v9448_v36 }
 0x3c7   :  { %2259 = vmatmul.mubr.f32.vlgmr.msra.gmra.mrb[58].mxu0 %v1771_v34 }
 0x3c8   :  { %2264 = vmatprep.mubr.f32.mxu0 %v9448_v36 }
 0x3cb   :  { %2265 = vmatmul.mubr.f32.gmra.mrb[60].mxu0 %v1774_v22 }
 0x3cc   :  { %2270 = vmatprep.mubr.f32.mxu0 %v9448_v36 }
 0x3cf   :  { %2271 = vmatmul.mubr.f32.gmra.mrb[62].mxu0 %v1777_v59 }
 0x3d0   :  { %2276 = vmatprep.mubr.f32.mxu0 %v9448_v36 }
 0x3d3   :  { %2277 = vmatmul.mubr.f32.gmra.mrb[64].mxu0 %v1780_v44 }
 0x3d4   :  { %2282 = vmatprep.mubr.f32.mxu0 %v9448_v36 }
 0x3d7   :  { %2283 = vmatmul.mubr.f32.gmra.mrb[66].mxu0 %v1783_v3 }
 0x3d8   :  { %2288 = vmatprep.mubr.f32.mxu0 %v9448_v36 }
 0x3db   :  { %2289 = vmatmul.mubr.f32.gmra.mrb[68].mxu0 %v1786_v35 }
 0x3dc   :  { %2294 = vmatprep.mubr.f32.mxu0 %v9448_v36 }
 0x3df   :  { %2295 = vmatmul.mubr.f32.gmra.mrb[70].mxu0 %v1789_v58 }
 0x3e0   :  { %2300 = vmatprep.mubr.f32.mxu0 %v9448_v36 }
 0x3e3   :  { %2301 = vmatmul.mubr.f32.gmra.mrb[72].mxu0 %v1792_v42 }
 0x3e4   :  { %2306 = vmatprep.mubr.f32.mxu0 %v9448_v36 }
 0x3e7   :  { %2307 = vmatmul.mubr.f32.gmra.mrb[74].mxu0 %v1795_v27 }
 0x3e8   :  { %2312 = vmatprep.mubr.f32.mxu0 %v9448_v36 }
 0x3eb   :  { %2313 = vmatmul.mubr.f32.gmra.mrb[76].mxu0 %v1798_v62 }
 0x3ec   :  { %2318 = vmatprep.mubr.f32.mxu0 %v9448_v36 }
 0x3ef   :  { %2319 = vmatmul.mubr.f32.gmra.mrb[78].mxu0 %v1801_v33 }
 0x3f0   :  { %2324 = vmatprep.mubr.f32.mxu0 %v9448_v36 }
 0x3f3   :  { %2325 = vmatmul.mubr.f32.gmra.mrb[80].mxu0 %v1804_v40 }
 0x3f4   :  { %2330 = vmatprep.mubr.f32.mxu0 %v9448_v36 }
 0x3f7   :  { %2331 = vmatmul.mubr.f32.gmra.mrb[82].mxu0 %v1807_v37 }
 0x3f8   :  { %2336 = vmatprep.mubr.f32.mxu0 %v9448_v36 }
 0x3fb   :  { %2337 = vmatmul.mubr.f32.gmra.mrb[84].mxu0 %v1810_v11 }
 0x3fc   :  { %2342 = vmatprep.mubr.f32.mxu0 %v9448_v36 }
 0x3ff   :  { %2343 = vmatmul.mubr.f32.gmra.mrb[86].mxu0 %v1813_v26 }
 0x400   :  { %2348 = vmatprep.mubr.f32.mxu0 %v9448_v36 }
 0x403   :  { %2349 = vmatmul.mubr.f32.gmra.mrb[88].mxu0 %v1816_v28 }
 0x404   :  { %2354 = vmatprep.mubr.f32.mxu0 %v9448_v36 }
 0x407   :  { %2355 = vmatmul.mubr.f32.gmra.mrb[90].mxu0 %v1819_v9 }
 0x408   :  { %2360 = vmatprep.mubr.f32.mxu0 %v9448_v36 }
 0x40b   :  { %2361 = vmatmul.mubr.f32.gmra.mrb[92].mxu0 %v1822_v46 }
 0x40c   :  { %2366 = vmatprep.mubr.f32.mxu0 %v9448_v36 }
 0x40f   :  { %2367 = vmatmul.mubr.f32.gmra.mrb[94].mxu0 %v1825_v32 }
 0x410   :  { %2372 = vmatprep.mubr.f32.mxu0 %v9448_v36 }
 0x413   :  { %2373 = vmatmul.mubr.f32.gmra.mrb[96].mxu0 %v1828_v55 }
 0x414   :  { %2378 = vmatprep.mubr.f32.mxu0 %v9448_v36 }
 0x417   :  { %2379 = vmatmul.mubr.f32.gmra.mrb[98].mxu0 %v1831_v30 }
 0x418   :  { %2384 = vmatprep.mubr.f32.mxu0 %v9448_v36 }
 0x41b   :  { %2385 = vmatmul.mubr.f32.gmra.mrb[100].mxu0 %v1834_v8 }
 0x41c   :  { %2390 = vmatprep.mubr.f32.mxu0 %v9448_v36 }
 0x41f   :  { %2391 = vmatmul.mubr.f32.gmra.mrb[102].mxu0 %v1837_v10 }
 0x420   :  { %2396 = vmatprep.mubr.f32.mxu0 %v9448_v36 }
 0x423   :  { %2397 = vmatmul.mubr.f32.gmra.mrb[104].mxu0 %v1840_v51 }
 0x49a   :  { %v2260_v45 = vpop.f32.mrb[58].mxu0 }
 0x49b   :  { %v2262_v49 = vpop.f32.mrb[59].mxu0 }
 0x49e   :  { %v2266_v4 = vpop.f32.mrb[60].mxu0 }
 0x49f   :  { %v5797_v57 = vpack.c.bf16 %v2266_v4, %v2260_v45  ;;  %v2268_v52 = vpop.f32.mrb[61].mxu0 }
 0x4a0   :  { %v5795_v61 = vpack.c.bf16 %v2268_v52, %v2262_v49 }
 0x4a2   :  { %v2272_v48 = vpop.f32.mrb[62].mxu0  ;;  %5796 = vmatprep.subr.bf16.mxu1 %v5795_v61 }
 0x4a3   :  { %v2274_v23 = vpop.f32.mrb[63].mxu0  ;;  %5798 = vmatpush1.bf16.msra.mxu1 %v5797_v57 }
 0x4a6   :  { %v2278_v60 = vpop.f32.mrb[64].mxu0 }
 0x4a7   :  { %v5801_v15 = vpack.c.bf16 %v2278_v60, %v2272_v48  ;;  %v2280_v19 = vpop.f32.mrb[65].mxu0 }
 0x4a8   :  { %v5799_v47 = vpack.c.bf16 %v2280_v19, %v2274_v23  ;;  %v2404_v19 = vld [vmem:[%s9290_s8 + $0x8] sm:$0xff] }
 0x4aa   :  { %v2284_v50 = vpop.f32.mrb[66].mxu0  ;;  %5800 = vmatprep.subr.bf16.mxu1 %v5799_v47  ;;  %v4722_v47 = vld [vmem:[%s9291_s9 + $0xc0] sm:$0xff] }
 0x4ab   :  { %v2286_v16 = vpop.f32.mrb[67].mxu0  ;;  %5802 = vmatpush1.bf16.msra.mxu1 %v5801_v15 }
 0x4ae   :  { %v2290_v29 = vpop.f32.mrb[68].mxu0 }
 0x4af   :  { %v5805_v13 = vpack.c.bf16 %v2290_v29, %v2284_v50  ;;  %v2292_v1 = vpop.f32.mrb[69].mxu0  ;;  %v4723_v50 = vld [vmem:[%s9291_s9 + $0xc8] sm:$0xff]  ;;  %v2446_v29 = vunpack.c.h.bf16 %v2404_v19 }
 0x4b0   :  { %v5803_v56 = vpack.c.bf16 %v2292_v1, %v2286_v16  ;;  %v2443_v16 = vunpack.c.l.bf16 %v8266_v12  ;;  %v2405_v1 = vld [vmem:[%s9290_s8 + $0x10] sm:$0xff] }
 0x4b1   :  { %v2448_v12 = vunpack.c.h.bf16 %v2405_v1 }
 0x4b2   :  { %v2296_v0 = vpop.f32.mrb[70].mxu0  ;;  %5804 = vmatprep.subr.bf16.mxu1 %v5803_v56  ;;  %v9512_v56 = vmov 0.0|0.0  }
 0x4b3   :  { %v2298_v14 = vpop.f32.mrb[71].mxu0  ;;  %5806 = vmatpush1.bf16.msra.mxu1 %v5805_v13  ;;  %v5844_v13 = vpack.c.bf16 %v4723_v50, %v4722_v47  ;;  %v4738_v47 = vld [vmem:[%s9291_s9 + $0x140] sm:$0xff]  ;;  %v4739_v50 = vld [vmem:[%s9291_s9 + $0x148] sm:$0xff] }
 0x4b6   :  { %v2302_v25 = vpop.f32.mrb[72].mxu0 }
 0x4b7   :  { %v5809_v63 = vpack.c.bf16 %v2302_v25, %v2296_v0  ;;  %v2304_v21 = vpop.f32.mrb[73].mxu0  ;;  %v4724_v0 = vld [vmem:[%s9291_s9 + $0xd0] sm:$0xff]  ;;  %v2445_v25 = vunpack.c.l.bf16 %v2404_v19  ;;  %v2414_v19 = vld [vmem:[%s9290_s8 + $0x58] sm:$0xff] }
 0x4b8   :  { %v5807_v43 = vpack.c.bf16 %v2304_v21, %v2298_v14  ;;  %v4725_v14 = vld [vmem:[%s9291_s9 + $0xd8] sm:$0xff] }
 0x4b9   :  { %v2406_v21 = vld [vmem:[%s9290_s8 + $0x18] sm:$0xff] }
 0x4ba   :  { %v2308_v2 = vpop.f32.mrb[74].mxu0  ;;  %5808 = vmatprep.subr.bf16.mxu1 %v5807_v43  ;;  %v4726_v43 = vld [vmem:[%s9291_s9 + $0xe0] sm:$0xff] }
 0x4bb   :  { %v2310_v54 = vpop.f32.mrb[75].mxu0  ;;  %5810 = vmatpush1.bf16.msra.mxu1 %v5809_v63  ;;  %v5847_v63 = vpack.c.bf16 %v4725_v14, %v4724_v0  ;;  %v2466_v0 = vunpack.c.h.bf16 %v2414_v19  ;;  %v2955_v14 = vld [vmem:[%s9291_s9 + $0x30] sm:$0xff] }
 0x4be   :  { %v2314_v17 = vpop.f32.mrb[76].mxu0 }
 0x4bf   :  { %v5813_v41 = vpack.c.bf16 %v2314_v17, %v2308_v2  ;;  %v2316_v6 = vpop.f32.mrb[77].mxu0  ;;  %v4727_v2 = vld [vmem:[%s9291_s9 + $0xe8] sm:$0xff]  ;;  %v2450_v17 = vunpack.c.h.bf16 %v2406_v21 }
 0x4c0   :  { %v5811_v20 = vpack.c.bf16 %v2316_v6, %v2310_v54  ;;  %v2447_v54 = vunpack.c.l.bf16 %v2405_v1  ;;  %v2407_v6 = vld [vmem:[%s9290_s8 + $0x20] sm:$0xff]  ;;  %v4740_v1 = vld [vmem:[%s9291_s9 + $0x150] sm:$0xff] }
 0x4c2   :  { %v2320_v5 = vpop.f32.mrb[78].mxu0  ;;  %5812 = vmatprep.subr.bf16.mxu1 %v5811_v20  ;;  %v4728_v20 = vld [vmem:[%s9291_s9 + $0xf0] sm:$0xff] }
 0x4c3   :  { %v2322_v31 = vpop.f32.mrb[79].mxu0  ;;  %5814 = vmatpush1.bf16.msra.mxu1 %v5813_v41  ;;  %v5850_v41 = vpack.c.bf16 %v4727_v2, %v4726_v43  ;;  %v2465_v43 = vunpack.c.l.bf16 %v2414_v19 }
 0x4c6   :  { %v2326_v53 = vpop.f32.mrb[80].mxu0 }
 0x4c7   :  { %v5817_v39 = vpack.c.bf16 %v2326_v53, %v2320_v5  ;;  %v2328_v38 = vpop.f32.mrb[81].mxu0  ;;  %v4729_v5 = vld [vmem:[%s9291_s9 + $0xf8] sm:$0xff]  ;;  %v2452_v53 = vunpack.c.h.bf16 %v2407_v6 }
 0x4c8   :  { %v5815_v7 = vpack.c.bf16 %v2328_v38, %v2322_v31  ;;  %v2449_v31 = vunpack.c.l.bf16 %v2406_v21  ;;  %v2408_v38 = vld [vmem:[%s9290_s8 + $0x28] sm:$0xff] }
 0x4ca   :  { %v2332_v18 = vpop.f32.mrb[82].mxu0  ;;  %5816 = vmatprep.subr.bf16.mxu1 %v5815_v7  ;;  %v2451_v7 = vunpack.c.l.bf16 %v2407_v6  ;;  %v2416_v6 = vld [vmem:[%s9290_s8 + $0x68] sm:$0xff] }
 0x4cb   :  { %v2334_v34 = vpop.f32.mrb[83].mxu0  ;;  %5818 = vmatpush1.bf16.msra.mxu1 %v5817_v39  ;;  %v5853_v39 = vpack.c.bf16 %v4729_v5, %v4728_v20 }
 0x4ce   :  { %v2338_v22 = vpop.f32.mrb[84].mxu0 }
 0x4cf   :  { %v5821_v59 = vpack.c.bf16 %v2338_v22, %v2332_v18  ;;  %v2340_v44 = vpop.f32.mrb[85].mxu0  ;;  %v4730_v18 = vld [vmem:[%s9291_s9 + $0x100] sm:$0xff]  ;;  %v2454_v22 = vunpack.c.h.bf16 %v2408_v38 }
 0x4d0   :  { %v5819_v3 = vpack.c.bf16 %v2340_v44, %v2334_v34  ;;  %v4731_v34 = vld [vmem:[%s9291_s9 + $0x108] sm:$0xff]  ;;  %v2409_v44 = vld [vmem:[%s9290_s8 + $0x30] sm:$0xff] }
 0x4d2   :  { %v2344_v35 = vpop.f32.mrb[86].mxu0  ;;  %5820 = vmatprep.subr.bf16.mxu1 %v5819_v3  ;;  %v2453_v3 = vunpack.c.l.bf16 %v2408_v38  ;;  %v2417_v38 = vld [vmem:[%s9290_s8 + $0x70] sm:$0xff] }
 0x4d3   :  { %v2346_v58 = vpop.f32.mrb[87].mxu0  ;;  %5822 = vmatpush1.bf16.msra.mxu1 %v5821_v59  ;;  %v5856_v59 = vpack.c.bf16 %v4731_v34, %v4730_v18  ;;  %v2472_v34 = vunpack.c.h.bf16 %v2417_v38 }
 0x4d6   :  { %v2350_v42 = vpop.f32.mrb[88].mxu0 }
 0x4d7   :  { %v5825_v27 = vpack.c.bf16 %v2350_v42, %v2344_v35  ;;  %v2352_v62 = vpop.f32.mrb[89].mxu0  ;;  %v2456_v35 = vunpack.c.h.bf16 %v2409_v44  ;;  %v2455_v42 = vunpack.c.l.bf16 %v2409_v44  ;;  %v2418_v44 = vld [vmem:[%s9290_s8 + $0x78] sm:$0xff] }
 0x4d8   :  { %v5823_v33 = vpack.c.bf16 %v2352_v62, %v2346_v58  ;;  %v2410_v58 = vld [vmem:[%s9290_s8 + $0x38] sm:$0xff]  ;;  %v2411_v62 = vld [vmem:[%s9290_s8 + $0x40] sm:$0xff] }
 0x4da   :  { %v2356_v40 = vpop.f32.mrb[90].mxu0  ;;  %5824 = vmatprep.subr.bf16.mxu1 %v5823_v33  ;;  %v2457_v33 = vunpack.c.l.bf16 %v2410_v58 }
 0x4db   :  { %v2358_v37 = vpop.f32.mrb[91].mxu0  ;;  %5826 = vmatpush1.bf16.msra.mxu1 %v5825_v27  ;;  %v2458_v27 = vunpack.c.h.bf16 %v2410_v58  ;;  %v2474_v58 = vunpack.c.h.bf16 %v2418_v44 }
 0x4de   :  { %v2362_v11 = vpop.f32.mrb[92].mxu0 }
 0x4df   :  { %v5829_v26 = vpack.c.bf16 %v2362_v11, %v2356_v40  ;;  %v2364_v28 = vpop.f32.mrb[93].mxu0  ;;  %v4732_v40 = vld [vmem:[%s9291_s9 + $0x110] sm:$0xff]  ;;  %v2460_v11 = vunpack.c.h.bf16 %v2411_v62 }
 0x4e0   :  { %v5827_v9 = vpack.c.bf16 %v2364_v28, %v2358_v37  ;;  %v4733_v37 = vld [vmem:[%s9291_s9 + $0x118] sm:$0xff]  ;;  %v2412_v28 = vld [vmem:[%s9290_s8 + $0x48] sm:$0xff] }
 0x4e2   :  { %v2368_v46 = vpop.f32.mrb[94].mxu0  ;;  %5828 = vmatprep.subr.bf16.mxu1 %v5827_v9  ;;  %v2459_v9 = vunpack.c.l.bf16 %v2411_v62  ;;  %v2419_v62 = vld [vmem:[%s9290_s8 + $0x80] sm:$0xff] }
 0x4e3   :  { %v2370_v32 = vpop.f32.mrb[95].mxu0  ;;  %5830 = vmatpush1.bf16.msra.mxu1 %v5829_v26  ;;  %v5859_v26 = vpack.c.bf16 %v4733_v37, %v4732_v40  ;;  %v2476_v37 = vunpack.c.h.bf16 %v2419_v62 }
 0x4e6   :  { %v2374_v55 = vpop.f32.mrb[96].mxu0 }
 0x4e7   :  { %v5833_v30 = vpack.c.bf16 %v2374_v55, %v2368_v46  ;;  %v2376_v8 = vpop.f32.mrb[97].mxu0  ;;  %v4734_v46 = vld [vmem:[%s9291_s9 + $0x120] sm:$0xff] }
 0x4e8   :  { %v5831_v10 = vpack.c.bf16 %v2376_v8, %v2370_v32  ;;  %v4735_v32 = vld [vmem:[%s9291_s9 + $0x128] sm:$0xff]  ;;  %v2949_v55 = vld [vmem:[%s9291_s9] sm:$0xff] }
 0x4e9   :  { %v5862_v8 = vpack.c.bf16 %v4735_v32, %v4734_v46 }
 0x4ea   :  { %v2380_v51 = vpop.f32.mrb[98].mxu0  ;;  %5832 = vmatprep.subr.bf16.mxu1 %v5831_v10  ;;  %v2950_v10 = vld [vmem:[%s9291_s9 + $0x8] sm:$0xff] }
 0x4eb   :  { %v2382_v24 = vpop.f32.mrb[99].mxu0  ;;  %5834 = vmatpush1.bf16.msra.mxu1 %v5833_v30  ;;  %v2462_v30 = vunpack.c.h.bf16 %v2412_v28 }
 0x4ee   :  { %v2386_v45 = vpop.f32.mrb[100].mxu0 }
 0x4ef   :  { %v5837_v49 = vpack.c.bf16 %v2386_v45, %v2380_v51  ;;  %v2388_v4 = vpop.f32.mrb[101].mxu0  ;;  %v2951_v51 = vld [vmem:[%s9291_s9 + $0x10] sm:$0xff] }
 0x4f0   :  { %v5835_v57 = vpack.c.bf16 %v2388_v4, %v2382_v24  ;;  %v2952_v24 = vld [vmem:[%s9291_s9 + $0x18] sm:$0xff]  ;;  %v2413_v45 = vld [vmem:[%s9290_s8 + $0x50] sm:$0xff] }
 0x4f1   :  { %v4736_v4 = vld [vmem:[%s9291_s9 + $0x130] sm:$0xff] }
 0x4f2   :  { %v2392_v52 = vpop.f32.mrb[102].mxu0  ;;  %5836 = vmatprep.subr.bf16.mxu1 %v5835_v57  ;;  %v4737_v57 = vld [vmem:[%s9291_s9 + $0x138] sm:$0xff] }
 0x4f3   :  { %v2394_v61 = vpop.f32.mrb[103].mxu0  ;;  %5838 = vmatpush1.bf16.msra.mxu1 %v5837_v49  ;;  %v5880_v49 = vpack.c.bf16 %v2950_v10, %v2949_v55  ;;  %v2967_v55 = vld [vmem:[%s9291_s9 + $0x90] sm:$0xff] }
 0x4f5   :  { %5881 = vmatpush1.bf16.msra.mxu0 %v5880_v49  ;;  %v2970_v49 = vld [vmem:[%s9291_s9 + $0xa8] sm:$0xff] }
 0x4f6   :  { %v2398_v48 = vpop.f32.mrb[104].mxu0  ;;  %5882 = vmatprep.subr.bf16.mxu0 %v9512_v56 }
 0x4f7   :  { %v5841_v23 = vpack.c.bf16 %v2398_v48, %v2392_v52  ;;  %v2400_v60 = vpop.f32.mrb[105].mxu0  ;;  %v2461_v52 = vunpack.c.l.bf16 %v2412_v28  ;;  %v5865_v48 = vpack.c.bf16 %v4737_v57, %v4736_v4  ;;  %v2420_v28 = vld [vmem:[%s9290_s8 + $0x88] sm:$0xff]  ;;  %v2422_v4 = vld [vmem:[%s9290_s8 + $0x98] sm:$0xff] }
 0x4f8   :  { %v5839_v15 = vpack.c.bf16 %v2400_v60, %v2394_v61  ;;  %v5883_v61 = vpack.c.bf16 %v2952_v24, %v2951_v51  ;;  %v2953_v60 = vld [vmem:[%s9291_s9 + $0x20] sm:$0xff]  ;;  %v2478_v32 = vunpack.c.h.bf16 %v2420_v28  ;;  %v2477_v10 = vunpack.c.l.bf16 %v2420_v28 }
 0x4fa   :  { %5840 = vmatprep.subr.bf16.mxu1 %v5839_v15  ;;  %v2954_v15 = vld [vmem:[%s9291_s9 + $0x28] sm:$0xff]  ;;  %5884 = vmatpush1.bf16.msra.mxu0 %v5883_v61  ;;  %v2482_v61 = vunpack.c.h.bf16 %v2422_v4 }
 0x4fb   :  { %5842 = vmatpush1.bf16.msra.mxu1 %v5841_v23  ;;  %v2464_v23 = vunpack.c.h.bf16 %v2413_v45  ;;  %5885 = vmatprep.subr.bf16.mxu0 %v9512_v56 }
 0x4fc   :  { %5843 = vmatprep.subr.bf16.mxu1 %v9512_v56 }
 0x4fe   :  { %2709 = vmatmul.mubr.f32.vlgmr.msra.gmra.mrb[54].mxu1 %v2443_v16  ;;  %v5868_v16 = vpack.c.bf16 %v4739_v50, %v4738_v47  ;;  %v2425_v50 = vld [vmem:[%s9290_s8 + $0xb0] sm:$0xff] }
 0x4ff   :  { %4683 = vmatprep.mubr.msk.f32.mxu1 %vm2523_vm6, %v2446_v29  ;;  %5845 = vmatpush1.bf16.msra.mxu1 %v5844_v13  ;;  %v2463_v29 = vunpack.c.l.bf16 %v2413_v45  ;;  %v5886_v13 = vpack.c.bf16 %v2954_v15, %v2953_v60  ;;  %v2969_v45 = vld [vmem:[%s9291_s9 + $0xa0] sm:$0xff]  ;;  %v2424_v15 = vld [vmem:[%s9290_s8 + $0xa8] sm:$0xff] }
 0x500   :  { %5846 = vmatprep.subr.bf16.mxu1 %v9512_v56  ;;  %v2486_v47 = vunpack.c.h.bf16 %v2424_v15 }
 0x501   :  { %5887 = vmatpush1.bf16.msra.mxu0 %v5886_v13  ;;  %v2426_v13 = vld [vmem:[%s9290_s8 + $0xb8] sm:$0xff] }
 0x502   :  { %2715 = vmatmul.mubr.f32.gmra.mrb[56].mxu1 %v2445_v25  ;;  %v2956_v25 = vld [vmem:[%s9291_s9 + $0x38] sm:$0xff]  ;;  %5888 = vmatprep.subr.bf16.mxu0 %v9512_v56 }
 0x503   :  { %4684 = vmatprep.mubr.msk.f32.mxu1 %vm2523_vm6, %v2448_v12  ;;  %5848 = vmatpush1.bf16.msra.mxu1 %v5847_v63  ;;  %v4741_v12 = vld [vmem:[%s9291_s9 + $0x158] sm:$0xff]  ;;  %v2415_v63 = vld [vmem:[%s9290_s8 + $0x60] sm:$0xff]  ;;  %v5889_v2 = vpack.c.bf16 %v2956_v25, %v2955_v14  ;;  %v2487_v14 = vunpack.c.l.bf16 %v2425_v50 }
 0x504   :  { %5849 = vmatprep.subr.bf16.mxu1 %v9512_v56  ;;  %v5871_v21 = vpack.c.bf16 %v4741_v12, %v4740_v1  ;;  %v2467_v20 = vunpack.c.l.bf16 %v2415_v63  ;;  %v2971_v1 = vld [vmem:[%s9291_s9 + $0xb0] sm:$0xff]  ;;  %v2490_v12 = vunpack.c.h.bf16 %v2426_v13 }
 0x505   :  { %5890 = vmatpush1.bf16.msra.mxu0 %v5889_v2  ;;  %v2428_v2 = vld [vmem:[%s9290_s8 + $0xc8] sm:$0xff] }
 0x506   :  { %2721 = vmatmul.mubr.f32.gmra.mrb[58].mxu1 %v2447_v54  ;;  %v2468_v54 = vunpack.c.h.bf16 %v2415_v63  ;;  %5891 = vmatprep.subr.bf16.mxu0 %v9512_v56  ;;  %v2427_v63 = vld [vmem:[%s9290_s8 + $0xc0] sm:$0xff] }
 0x507   :  { %4685 = vmatprep.mubr.msk.f32.mxu1 %vm2523_vm6, %v2450_v17  ;;  %5851 = vmatpush1.bf16.msra.mxu1 %v5850_v41  ;;  %v2957_v17 = vld [vmem:[%s9291_s9 + $0x40] sm:$0xff]  ;;  %v2958_v41 = vld [vmem:[%s9291_s9 + $0x48] sm:$0xff] }
 0x508   :  { %5852 = vmatprep.subr.bf16.mxu1 %v9512_v56  ;;  %v5892_v5 = vpack.c.bf16 %v2958_v41, %v2957_v17  ;;  %v4742_v17 = vld [vmem:[%s9291_s9 + $0x160] sm:$0xff]  ;;  %v4743_v41 = vld [vmem:[%s9291_s9 + $0x168] sm:$0xff] }
 0x50a   :  { %2727 = vmatmul.mubr.f32.gmra.mrb[60].mxu1 %v2449_v31  ;;  %v2470_v31 = vunpack.c.h.bf16 %v2416_v6  ;;  %5893 = vmatpush1.bf16.msra.mxu0 %v5892_v5  ;;  %v2429_v5 = vld [vmem:[%s9290_s8 + $0xd0] sm:$0xff] }
 0x50b   :  { %4686 = vmatprep.mubr.msk.f32.mxu1 %vm2523_vm6, %v2452_v53  ;;  %5854 = vmatpush1.bf16.msra.mxu1 %v5853_v39  ;;  %v2959_v53 = vld [vmem:[%s9291_s9 + $0x50] sm:$0xff]  ;;  %v2960_v39 = vld [vmem:[%s9291_s9 + $0x58] sm:$0xff] }
 0x50c   :  { %5855 = vmatprep.subr.bf16.mxu1 %v9512_v56  ;;  %v5895_v18 = vpack.c.bf16 %v2960_v39, %v2959_v53  ;;  %5894 = vmatprep.subr.bf16.mxu0 %v9512_v56  ;;  %v2496_v53 = vunpack.c.h.bf16 %v2429_v5  ;;  %v2430_v39 = vld [vmem:[%s9290_s8 + $0xd8] sm:$0xff] }
 0x50e   :  { %2733 = vmatmul.mubr.f32.gmra.mrb[62].mxu1 %v2451_v7  ;;  %v2469_v7 = vunpack.c.l.bf16 %v2416_v6  ;;  %5896 = vmatpush1.bf16.msra.mxu0 %v5895_v18  ;;  %v2494_v6 = vunpack.c.h.bf16 %v2428_v2  ;;  %v2431_v18 = vld [vmem:[%s9290_s8 + $0xe0] sm:$0xff] }
 0x50f   :  { %4687 = vmatprep.mubr.msk.f32.mxu1 %vm2523_vm6, %v2454_v22  ;;  %5857 = vmatpush1.bf16.msra.mxu1 %v5856_v59  ;;  %v2961_v22 = vld [vmem:[%s9291_s9 + $0x60] sm:$0xff]  ;;  %v2962_v59 = vld [vmem:[%s9291_s9 + $0x68] sm:$0xff] }
 0x510   :  { %5858 = vmatprep.subr.bf16.mxu1 %v9512_v56  ;;  %5897 = vmatprep.subr.bf16.mxu0 %v9512_v56 }
 0x512   :  { %2739 = vmatmul.mubr.f32.gmra.mrb[64].mxu1 %v2453_v3  ;;  %v2471_v3 = vunpack.c.l.bf16 %v2417_v38  ;;  %v2495_v38 = vunpack.c.l.bf16 %v2429_v5  ;;  %v4801_v5 = vld [vmem:[%s9291_s9 + $0x278] sm:$0xff] }
 0x513   :  { %4688 = vmatprep.mubr.msk.f32.mxu1 %vm2523_vm6, %v2456_v35  ;;  %5860 = vmatpush1.bf16.msra.mxu1 %v5859_v26  ;;  %v5898_v35 = vpack.c.bf16 %v2962_v59, %v2961_v22  ;;  %v2966_v26 = vld [vmem:[%s9291_s9 + $0x88] sm:$0xff]  ;;  %v2500_v22 = vunpack.c.h.bf16 %v2431_v18  ;;  %v4744_v59 = vld [vmem:[%s9291_s9 + $0x170] sm:$0xff] }
 0x514   :  { %5861 = vmatprep.subr.bf16.mxu1 %v9512_v56 }
 0x515   :  { %5899 = vmatpush1.bf16.msra.mxu0 %v5898_v35 }
 0x516   :  { %2745 = vmatmul.mubr.f32.gmra.mrb[66].mxu1 %v2455_v42  ;;  %v2963_v42 = vld [vmem:[%s9291_s9 + $0x70] sm:$0xff]  ;;  %5900 = vmatprep.subr.bf16.mxu0 %v9512_v56 }
 0x517   :  { %4689 = vmatprep.mubr.msk.f32.mxu1 %vm2523_vm6, %v2458_v27  ;;  %5863 = vmatpush1.bf16.msra.mxu1 %v5862_v8  ;;  %v2964_v27 = vld [vmem:[%s9291_s9 + $0x78] sm:$0xff]  ;;  %v2421_v8 = vld [vmem:[%s9290_s8 + $0x90] sm:$0xff] }
 0x518   :  { %5864 = vmatprep.subr.bf16.mxu1 %v9512_v56  ;;  %v5901_v40 = vpack.c.bf16 %v2964_v27, %v2963_v42  ;;  %v2480_v24 = vunpack.c.h.bf16 %v2421_v8  ;;  %v2479_v57 = vunpack.c.l.bf16 %v2421_v8  ;;  %v2433_v27 = vld [vmem:[%s9290_s8 + $0xf0] sm:$0xff] }
 0x51a   :  { %2751 = vmatmul.mubr.f32.gmra.mrb[68].mxu1 %v2457_v33  ;;  %v2473_v33 = vunpack.c.l.bf16 %v2418_v44  ;;  %5902 = vmatpush1.bf16.msra.mxu0 %v5901_v40  ;;  %v4745_v44 = vld [vmem:[%s9291_s9 + $0x178] sm:$0xff] }
 0x51b   :  { %4690 = vmatprep.mubr.msk.f32.mxu1 %vm2523_vm6, %v2460_v11  ;;  %5866 = vmatpush1.bf16.msra.mxu1 %v5865_v48  ;;  %v2965_v11 = vld [vmem:[%s9291_s9 + $0x80] sm:$0xff]  ;;  %v5877_v35 = vpack.c.bf16 %v4745_v44, %v4744_v59  ;;  %v2434_v40 = vld [vmem:[%s9290_s8 + $0xf8] sm:$0xff]  ;;  %v4804_v59 = vld [vmem:[%s9291_s9 + $0x290] sm:$0xff] }
 0x51c   :  { %5867 = vmatprep.subr.bf16.mxu1 %v9512_v56  ;;  %v5904_v46 = vpack.c.bf16 %v2966_v26, %v2965_v11  ;;  %5903 = vmatprep.subr.bf16.mxu0 %v9512_v56  ;;  %v2423_v48 = vld [vmem:[%s9290_s8 + $0xa0] sm:$0xff]  ;;  %v2506_v11 = vunpack.c.h.bf16 %v2434_v40  ;;  %v2505_v28 = vunpack.c.l.bf16 %v2434_v40  ;;  %v4805_v44 = vld [vmem:[%s9291_s9 + $0x298] sm:$0xff] }
 0x51d   :  { %v2484_v60 = vunpack.c.h.bf16 %v2423_v48  ;;  %v2483_v19 = vunpack.c.l.bf16 %v2423_v48  ;;  %v2435_v26 = vld [vmem:[%s9290_s8 + $0x100] sm:$0xff] }
 0x51e   :  { %2757 = vmatmul.mubr.f32.gmra.mrb[70].mxu1 %v2459_v9  ;;  %v2475_v9 = vunpack.c.l.bf16 %v2419_v62  ;;  %5905 = vmatpush1.bf16.msra.mxu0 %v5904_v46  ;;  %v2436_v46 = vld [vmem:[%s9290_s8 + $0x108] sm:$0xff] }
 0x51f   :  { %4691 = vmatprep.mubr.msk.f32.mxu1 %vm2523_vm6, %v2462_v30  ;;  %5869 = vmatpush1.bf16.msra.mxu1 %v5868_v16  ;;  %v2968_v30 = vld [vmem:[%s9291_s9 + $0x98] sm:$0xff]  ;;  %v2485_v16 = vunpack.c.l.bf16 %v2424_v15  ;;  %v2509_v8 = vunpack.c.l.bf16 %v2436_v46 }
 0x520   :  { %5870 = vmatprep.subr.bf16.mxu1 %v9512_v56  ;;  %v5907_v51 = vpack.c.bf16 %v2968_v30, %v2967_v55  ;;  %5906 = vmatprep.subr.bf16.mxu0 %v9512_v56  ;;  %v2510_v55 = vunpack.c.h.bf16 %v2436_v46  ;;  %v2437_v30 = vld [vmem:[%s9290_s8 + $0x110] sm:$0xff] }
 0x522   :  { %2763 = vmatmul.mubr.f32.gmra.mrb[72].mxu1 %v2461_v52  ;;  %5908 = vmatpush1.bf16.msra.mxu0 %v5907_v51  ;;  %v5910_v52 = vpack.c.bf16 %v2970_v49, %v2969_v45  ;;  %v2438_v51 = vld [vmem:[%s9290_s8 + $0x118] sm:$0xff]  ;;  %v2439_v49 = vld [vmem:[%s9290_s8 + $0x120] sm:$0xff] }
 0x523   :  { %4692 = vmatprep.mubr.msk.f32.mxu1 %vm2523_vm6, %v2464_v23  ;;  %5872 = vmatpush1.bf16.msra.mxu1 %v5871_v21  ;;  %v2481_v23 = vunpack.c.l.bf16 %v2422_v4  ;;  %v2489_v21 = vunpack.c.l.bf16 %v2426_v13  ;;  %v2514_v45 = vunpack.c.h.bf16 %v2438_v51  ;;  %v2513_v4 = vunpack.c.l.bf16 %v2438_v51  ;;  %v4795_v13 = vld [vmem:[%s9291_s9 + $0x248] sm:$0xff]  ;;  %v4764_v51 = vld [vmem:[%s9291_s9 + $0x190] sm:$0xff] }
 0x524   :  { %5873 = vmatprep.subr.bf16.mxu1 %v9512_v56  ;;  %5909 = vmatprep.subr.bf16.mxu0 %v9512_v56 }
 0x526   :  { %2769 = vmatmul.mubr.f32.gmra.mrb[74].mxu1 %v2463_v29  ;;  %5911 = vmatpush1.bf16.msra.mxu0 %v5910_v52  ;;  %v2488_v29 = vunpack.c.h.bf16 %v2425_v50  ;;  %v2440_v52 = vld [vmem:[%s9290_s8 + $0x128] sm:$0xff] }
 0x527   :  { %4693 = vmatprep.mubr.msk.f32.mxu1 %vm2523_vm6, %v2466_v0  ;;  %5912 = vmatprep.subr.bf16.mxu0 %v9512_v56  ;;  %v2972_v0 = vld [vmem:[%s9291_s9 + $0xb8] sm:$0xff]  ;;  %v2518_v48 = vunpack.c.h.bf16 %v2440_v52 }
 0x528   :  { %v5913_v25 = vpack.c.bf16 %v2972_v0, %v2971_v1 }
 0x52a   :  { %2775 = vmatmul.mubr.f32.gmra.mrb[76].mxu1 %v2465_v43  ;;  %5914 = vmatpush1.bf16.msra.mxu0 %v5913_v25  ;;  %v2492_v43 = vunpack.c.h.bf16 %v2427_v63  ;;  %v4796_v25 = vld [vmem:[%s9291_s9 + $0x250] sm:$0xff] }
 0x52b   :  { %4694 = vmatprep.mubr.msk.f32.mxu1 %vm2523_vm6, %v2468_v54  ;;  %5951 = vmatprep.subr.bf16.mxu0 %v9512_v56  ;;  %v2491_v54 = vunpack.c.l.bf16 %v2427_v63 }
 0x52e   :  { %2781 = vmatmul.mubr.f32.gmra.mrb[78].mxu1 %v2467_v20  ;;  %v5874_v20 = vpack.c.bf16 %v4743_v41, %v4742_v17 }
 0x52f   :  { %4695 = vmatprep.mubr.msk.f32.mxu1 %vm2523_vm6, %v2470_v31  ;;  %v2493_v31 = vunpack.c.l.bf16 %v2428_v2  ;;  %v4798_v2 = vld [vmem:[%s9291_s9 + $0x260] sm:$0xff] }
 0x530   :  { %5875 = vmatpush1.bf16.msra.mxu1 %v5874_v20  ;;  %v4800_v20 = vld [vmem:[%s9291_s9 + $0x270] sm:$0xff] }
 0x531   :  { %5876 = vmatprep.subr.bf16.mxu1 %v9512_v56 }
 0x532   :  { %2787 = vmatmul.mubr.f32.gmra.mrb[80].mxu1 %v2469_v7  ;;  %v2498_v7 = vunpack.c.h.bf16 %v2430_v39 }
 0x533   :  { %4696 = vmatprep.mubr.msk.f32.mxu1 %vm2523_vm6, %v2472_v34  ;;  %v2497_v34 = vunpack.c.l.bf16 %v2430_v39 }
 0x534   :  { %5878 = vmatpush1.bf16.msra.mxu1 %v5877_v35  ;;  %v5967_v35 = vpack.c.bf16 %v4805_v44, %v4804_v59  ;;  %v4776_v59 = vld [vmem:[%s9291_s9 + $0x1f0] sm:$0xff]  ;;  %v4777_v44 = vld [vmem:[%s9291_s9 + $0x1f8] sm:$0xff] }
 0x535   :  { %5915 = vmatprep.subr.bf16.mxu1 %v9512_v56 }
 0x536   :  { %2793 = vmatmul.mubr.f32.gmra.mrb[82].mxu1 %v2471_v3  ;;  %v2432_v3 = vld [vmem:[%s9290_s8 + $0xe8] sm:$0xff] }
 0x537   :  { %4697 = vmatprep.mubr.msk.f32.mxu1 %vm2523_vm6, %v2474_v58  ;;  %v2499_v58 = vunpack.c.l.bf16 %v2431_v18  ;;  %v2502_v42 = vunpack.c.h.bf16 %v2432_v3  ;;  %v2501_v62 = vunpack.c.l.bf16 %v2432_v3 }
 0x53a   :  { %2799 = vmatmul.mubr.f32.gmra.mrb[84].mxu1 %v2473_v33  ;;  %v2504_v33 = vunpack.c.h.bf16 %v2433_v27 }
 0x53b   :  { %4698 = vmatprep.mubr.msk.f32.mxu1 %vm2523_vm6, %v2476_v37  ;;  %v2503_v37 = vunpack.c.l.bf16 %v2433_v27  ;;  %v4807_v27 = vld [vmem:[%s9291_s9 + $0x2a8] sm:$0xff] }
 0x53e   :  { %2805 = vmatmul.mubr.f32.gmra.mrb[86].mxu1 %v2475_v9  ;;  %v2508_v9 = vunpack.c.h.bf16 %v2435_v26 }
 0x53f   :  { %4699 = vmatprep.mubr.msk.f32.mxu1 %vm2523_vm6, %v2478_v32  ;;  %v2507_v32 = vunpack.c.l.bf16 %v2435_v26 }
 0x542   :  { %2811 = vmatmul.mubr.f32.gmra.mrb[88].mxu1 %v2477_v10  ;;  %v2512_v10 = vunpack.c.h.bf16 %v2437_v30 }
 0x543   :  { %4700 = vmatprep.mubr.msk.f32.mxu1 %vm2523_vm6, %v2480_v24  ;;  %v2511_v24 = vunpack.c.l.bf16 %v2437_v30  ;;  %v4811_v30 = vld [vmem:[%s9291_s9 + $0x2c8] sm:$0xff] }
 0x546   :  { %2817 = vmatmul.mubr.f32.gmra.mrb[90].mxu1 %v2479_v57  ;;  %v2516_v57 = vunpack.c.h.bf16 %v2439_v49 }
 0x547   :  { %4701 = vmatprep.mubr.msk.f32.mxu1 %vm2523_vm6, %v2482_v61  ;;  %v2515_v61 = vunpack.c.l.bf16 %v2439_v49  ;;  %v4765_v49 = vld [vmem:[%s9291_s9 + $0x198] sm:$0xff] }
 0x54a   :  { %2823 = vmatmul.mubr.f32.gmra.mrb[92].mxu1 %v2481_v23  ;;  %v2441_v23 = vld [vmem:[%s9290_s8 + $0x130] sm:$0xff] }
 0x54b   :  { %4702 = vmatprep.mubr.msk.f32.mxu1 %vm2523_vm6, %v2484_v60  ;;  %v2517_v60 = vunpack.c.l.bf16 %v2440_v52  ;;  %v2520_v15 = vunpack.c.h.bf16 %v2441_v23 }
 0x54e   :  { %2829 = vmatmul.mubr.f32.gmra.mrb[94].mxu1 %v2483_v19  ;;  %v2442_v19 = vld [vmem:[%s9290_s8 + $0x138] sm:$0xff] }
 0x54f   :  { %4703 = vmatprep.mubr.msk.f32.mxu1 %vm2523_vm6, %v2486_v47  ;;  %v2519_v47 = vunpack.c.l.bf16 %v2441_v23  ;;  %v2522_v50 = vunpack.c.h.bf16 %v2442_v19 }
 0x552   :  { %2835 = vmatmul.mubr.f32.gmra.mrb[96].mxu1 %v2485_v16  ;;  %v2521_v16 = vunpack.c.l.bf16 %v2442_v19  ;;  %v4814_v19 = vld [vmem:[%s9291_s9 + $0x2e0] sm:$0xff] }
 0x553   :  { %4704 = vmatprep.mubr.msk.f32.mxu1 %vm2523_vm6, %v2488_v29  ;;  %v4794_v29 = vld [vmem:[%s9291_s9 + $0x240] sm:$0xff] }
 0x554   :  { %v5952_v0 = vpack.c.bf16 %v4795_v13, %v4794_v29  ;;  %v4768_v29 = vld [vmem:[%s9291_s9 + $0x1b0] sm:$0xff] }
 0x556   :  { %2841 = vmatmul.mubr.f32.gmra.mrb[98].mxu1 %v2487_v14 }
 0x557   :  { %4705 = vmatprep.mubr.msk.f32.mxu1 %vm2523_vm6, %v2490_v12  ;;  %v4797_v12 = vld [vmem:[%s9291_s9 + $0x258] sm:$0xff] }
 0x55a   :  { %2847 = vmatmul.mubr.f32.gmra.mrb[100].mxu1 %v2489_v21  ;;  %v5955_v21 = vpack.c.bf16 %v4797_v12, %v4796_v25  ;;  %v4817_v25 = vld [vmem:[%s9291_s9 + $0x2f8] sm:$0xff] }
 0x55b   :  { %4706 = vmatprep.mubr.msk.f32.mxu1 %vm2523_vm6, %v2492_v43 }
 0x55e   :  { %2853 = vmatmul.mubr.f32.gmra.mrb[102].mxu1 %v2491_v54  ;;  %v4799_v54 = vld [vmem:[%s9291_s9 + $0x268] sm:$0xff] }
 0x55f   :  { %4707 = vmatprep.mubr.msk.f32.mxu1 %vm2523_vm6, %v2494_v6  ;;  %v5958_v41 = vpack.c.bf16 %v4799_v54, %v4798_v2  ;;  %v4770_v2 = vld [vmem:[%s9291_s9 + $0x1c0] sm:$0xff]  ;;  %v4771_v54 = vld [vmem:[%s9291_s9 + $0x1c8] sm:$0xff] }
 0x562   :  { %2859 = vmatmul.mubr.f32.gmra.mrb[104].mxu1 %v2493_v31 }
 0x563   :  { %4708 = vmatprep.mubr.msk.f32.mxu1 %vm2523_vm6, %v2496_v53  ;;  %v5961_v53 = vpack.c.bf16 %v4801_v5, %v4800_v20  ;;  %v4772_v20 = vld [vmem:[%s9291_s9 + $0x1d0] sm:$0xff]  ;;  %v4773_v5 = vld [vmem:[%s9291_s9 + $0x1d8] sm:$0xff] }
 0x566   :  { %2865 = vmatmul.mubr.f32.gmra.mrb[106].mxu1 %v2495_v38  ;;  %v4802_v38 = vld [vmem:[%s9291_s9 + $0x280] sm:$0xff] }
 0x567   :  { %4709 = vmatprep.mubr.msk.f32.mxu1 %vm2523_vm6, %v2498_v7  ;;  %v4803_v7 = vld [vmem:[%s9291_s9 + $0x288] sm:$0xff] }
 0x56a   :  { %2871 = vmatmul.mubr.f32.gmra.mrb[108].mxu1 %v2497_v34  ;;  %v5964_v34 = vpack.c.bf16 %v4803_v7, %v4802_v38  ;;  %v4774_v38 = vld [vmem:[%s9291_s9 + $0x1e0] sm:$0xff]  ;;  %v4775_v7 = vld [vmem:[%s9291_s9 + $0x1e8] sm:$0xff] }
 0x56b   :  { %4710 = vmatprep.mubr.msk.f32.mxu1 %vm2523_vm6, %v2500_v22 }
 0x56e   :  { %2877 = vmatmul.mubr.f32.gmra.mrb[110].mxu1 %v2499_v58 }
 0x56f   :  { %4711 = vmatprep.mubr.msk.f32.mxu1 %vm2523_vm6, %v2502_v42  ;;  %v4806_v42 = vld [vmem:[%s9291_s9 + $0x2a0] sm:$0xff] }
 0x572   :  { %2883 = vmatmul.mubr.f32.gmra.mrb[112].mxu1 %v2501_v62 }
 0x573   :  { %4712 = vmatprep.mubr.msk.f32.mxu1 %vm2523_vm6, %v2504_v33  ;;  %v5970_v33 = vpack.c.bf16 %v4807_v27, %v4806_v42  ;;  %v4778_v42 = vld [vmem:[%s9291_s9 + $0x200] sm:$0xff]  ;;  %v4779_v27 = vld [vmem:[%s9291_s9 + $0x208] sm:$0xff] }
 0x576   :  { %2889 = vmatmul.mubr.f32.gmra.mrb[114].mxu1 %v2503_v37  ;;  %v4808_v37 = vld [vmem:[%s9291_s9 + $0x2b0] sm:$0xff] }
 0x577   :  { %4713 = vmatprep.mubr.msk.f32.mxu1 %vm2523_vm6, %v2506_v11  ;;  %v4809_v11 = vld [vmem:[%s9291_s9 + $0x2b8] sm:$0xff] }
 0x57a   :  { %2895 = vmatmul.mubr.f32.gmra.mrb[116].mxu1 %v2505_v28  ;;  %v4762_v28 = vld [vmem:[%s9291_s9 + $0x180] sm:$0xff] }
 0x57b   :  { %4714 = vmatprep.mubr.msk.f32.mxu1 %vm2523_vm6, %v2508_v9  ;;  %v5973_v9 = vpack.c.bf16 %v4809_v11, %v4808_v37  ;;  %v4780_v37 = vld [vmem:[%s9291_s9 + $0x210] sm:$0xff]  ;;  %v4781_v11 = vld [vmem:[%s9291_s9 + $0x218] sm:$0xff] }
 0x57e   :  { %2901 = vmatmul.mubr.f32.gmra.mrb[118].mxu1 %v2507_v32  ;;  %v4763_v32 = vld [vmem:[%s9291_s9 + $0x188] sm:$0xff] }
 0x57f   :  { %4715 = vmatprep.mubr.msk.f32.mxu1 %vm2523_vm6, %v2510_v55  ;;  %v4810_v55 = vld [vmem:[%s9291_s9 + $0x2c0] sm:$0xff] }
 0x582   :  { %2907 = vmatmul.mubr.f32.gmra.mrb[120].mxu1 %v2509_v8 }
 0x583   :  { %4716 = vmatprep.mubr.msk.f32.mxu1 %vm2523_vm6, %v2512_v10  ;;  %v5916_v10 = vpack.c.bf16 %v4763_v32, %v4762_v28  ;;  %v5943_v28 = vpack.c.bf16 %v4781_v11, %v4780_v37  ;;  %v4783_v32 = vld [vmem:[%s9291_s9 + $0x228] sm:$0xff] }
 0x586   :  { %2913 = vmatmul.mubr.f32.gmra.mrb[122].mxu1 %v2511_v24  ;;  %v5976_v24 = vpack.c.bf16 %v4811_v30, %v4810_v55 }
 0x587   :  { %4717 = vmatprep.mubr.msk.f32.mxu1 %vm2523_vm6, %v2514_v45 }
 0x58a   :  { %2919 = vmatmul.mubr.f32.gmra.mrb[124].mxu1 %v2513_v4  ;;  %v4812_v4 = vld [vmem:[%s9291_s9 + $0x2d0] sm:$0xff] }
 0x58b   :  { %4718 = vmatprep.mubr.msk.f32.mxu1 %vm2523_vm6, %v2516_v57  ;;  %v4813_v57 = vld [vmem:[%s9291_s9 + $0x2d8] sm:$0xff] }
 0x58c   :  { %v5979_v23 = vpack.c.bf16 %v4813_v57, %v4812_v4  ;;  %v4826_v4 = vld [vmem:[%s9291_s9 + $0x300] sm:$0xff]  ;;  %v4827_v57 = vld [vmem:[%s9291_s9 + $0x308] sm:$0xff] }
 0x58e   :  { %2925 = vmatmul.mubr.f32.gmra.mrb[126].mxu1 %v2515_v61  ;;  %v5919_v61 = vpack.c.bf16 %v4765_v49, %v4764_v51  ;;  %v4785_v51 = vld [vmem:[%s9291_s9 + $0x238] sm:$0xff] }
 0x58f   :  { %4719 = vmatprep.mubr.msk.f32.mxu1 %vm2523_vm6, %v2518_v48  ;;  %v4766_v48 = vld [vmem:[%s9291_s9 + $0x1a0] sm:$0xff] }
 0x592   :  { %2931 = vmatmul.mubr.f32.gmra.mrb[128].mxu1 %v2517_v60 }
 0x593   :  { %4720 = vmatprep.mubr.msk.f32.mxu1 %vm2523_vm6, %v2520_v15  ;;  %v4767_v15 = vld [vmem:[%s9291_s9 + $0x1a8] sm:$0xff] }
 0x596   :  { %2937 = vmatmul.mubr.f32.gmra.mrb[130].mxu1 %v2519_v47  ;;  %v4815_v47 = vld [vmem:[%s9291_s9 + $0x2e8] sm:$0xff] }
 0x597   :  { %4721 = vmatprep.mubr.msk.f32.mxu1 %vm2523_vm6, %v2522_v50  ;;  %v5982_v13 = vpack.c.bf16 %v4815_v47, %v4814_v19 }
 0x59a   :  { %2943 = vmatmul.mubr.f32.gmra.mrb[132].mxu1 %v2521_v16  ;;  %v5922_v16 = vpack.c.bf16 %v4767_v15, %v4766_v48 }
 0x5d1   :  { %v2710_v1 = vpop.f32.mrb[54].mxu1 }
 0x5d2   :  { %v2712_v14 = vpop.f32.mrb[55].mxu1 }
 0x5d3   :  { %4754 = vmatprep.mubr.msk.f32.mxu0 %vm2523_vm6, %v2712_v14  ;;  %v4816_v14 = vld [vmem:[%s9291_s9 + $0x2f0] sm:$0xff] }
 0x5d4   :  { %3216 = vmatmul.mubr.f32.vlgmr.msra.gmra.mrb[106].mxu0 %v2710_v1 }
 0x5d5   :  { %v2716_v63 = vpop.f32.mrb[56].mxu1  ;;  %5953 = vmatpush1.bf16.msra.mxu0 %v5952_v0  ;;  %v4769_v0 = vld [vmem:[%s9291_s9 + $0x1b8] sm:$0xff] }
 0x5d6   :  { %v2718_v43 = vpop.f32.mrb[57].mxu1  ;;  %5954 = vmatprep.subr.bf16.mxu0 %v9512_v56 }
 0x5d7   :  { %4755 = vmatprep.mubr.msk.f32.mxu0 %vm2523_vm6, %v2718_v43 }
 0x5d8   :  { %3221 = vmatmul.mubr.f32.gmra.mrb[108].mxu0 %v2716_v63  ;;  %v5925_v63 = vpack.c.bf16 %v4769_v0, %v4768_v29  ;;  %v4832_v0 = vld [vmem:[%s9291_s9 + $0x330] sm:$0xff] }
 0x5d9   :  { %v2722_v17 = vpop.f32.mrb[58].mxu1  ;;  %5956 = vmatpush1.bf16.msra.mxu0 %v5955_v21  ;;  %v5985_v21 = vpack.c.bf16 %v4817_v25, %v4816_v14  ;;  %v4833_v14 = vld [vmem:[%s9291_s9 + $0x338] sm:$0xff] }
 0x5da   :  { %v2724_v6 = vpop.f32.mrb[59].mxu1  ;;  %5957 = vmatprep.subr.bf16.mxu0 %v9512_v56 }
 0x5db   :  { %4756 = vmatprep.mubr.msk.f32.mxu0 %vm2523_vm6, %v2724_v6 }
 0x5dc   :  { %3226 = vmatmul.mubr.f32.gmra.mrb[110].mxu0 %v2722_v17 }
 0x5dd   :  { %v2728_v31 = vpop.f32.mrb[60].mxu1  ;;  %5959 = vmatpush1.bf16.msra.mxu0 %v5958_v41  ;;  %v5928_v41 = vpack.c.bf16 %v4771_v54, %v4770_v2 }
 0x5de   :  { %v2730_v39 = vpop.f32.mrb[61].mxu1  ;;  %5960 = vmatprep.subr.bf16.mxu0 %v9512_v56 }
 0x5df   :  { %4757 = vmatprep.mubr.msk.f32.mxu0 %vm2523_vm6, %v2730_v39 }
 0x5e0   :  { %3231 = vmatmul.mubr.f32.gmra.mrb[112].mxu0 %v2728_v31 }
 0x5e1   :  { %v2734_v18 = vpop.f32.mrb[62].mxu1  ;;  %5962 = vmatpush1.bf16.msra.mxu0 %v5961_v53  ;;  %v5931_v53 = vpack.c.bf16 %v4773_v5, %v4772_v20 }
 0x5e2   :  { %v2736_v22 = vpop.f32.mrb[63].mxu1  ;;  %5963 = vmatprep.subr.bf16.mxu0 %v9512_v56 }
 0x5e3   :  { %4758 = vmatprep.mubr.msk.f32.mxu0 %vm2523_vm6, %v2736_v22 }
 0x5e4   :  { %3236 = vmatmul.mubr.f32.gmra.mrb[114].mxu0 %v2734_v18 }
 0x5e5   :  { %v2740_v3 = vpop.f32.mrb[64].mxu1  ;;  %5965 = vmatpush1.bf16.msra.mxu0 %v5964_v34  ;;  %v5934_v34 = vpack.c.bf16 %v4775_v7, %v4774_v38 }
 0x5e6   :  { %v2742_v58 = vpop.f32.mrb[65].mxu1  ;;  %5966 = vmatprep.subr.bf16.mxu0 %v9512_v56 }
 0x5e7   :  { %4759 = vmatprep.mubr.msk.f32.mxu0 %vm2523_vm6, %v2742_v58 }
 0x5e8   :  { %3241 = vmatmul.mubr.f32.gmra.mrb[116].mxu0 %v2740_v3 }
 0x5e9   :  { %v2746_v62 = vpop.f32.mrb[66].mxu1  ;;  %5968 = vmatpush1.bf16.msra.mxu0 %v5967_v35  ;;  %v5937_v35 = vpack.c.bf16 %v4777_v44, %v4776_v59 }
 0x5ea   :  { %v2748_v40 = vpop.f32.mrb[67].mxu1  ;;  %5969 = vmatprep.subr.bf16.mxu0 %v9512_v56 }
 0x5eb   :  { %4760 = vmatprep.mubr.msk.f32.mxu0 %vm2523_vm6, %v2748_v40 }
 0x5ec   :  { %3246 = vmatmul.mubr.f32.gmra.mrb[118].mxu0 %v2746_v62 }
 0x5ed   :  { %v2752_v26 = vpop.f32.mrb[68].mxu1  ;;  %5971 = vmatpush1.bf16.msra.mxu0 %v5970_v33  ;;  %v5940_v33 = vpack.c.bf16 %v4779_v27, %v4778_v42 }
 0x5ee   :  { %v2754_v46 = vpop.f32.mrb[69].mxu1  ;;  %5972 = vmatprep.subr.bf16.mxu0 %v9512_v56 }
 0x5ef   :  { %4761 = vmatprep.mubr.msk.f32.mxu0 %vm2523_vm6, %v2754_v46  ;;  %v4782_v46 = vld [vmem:[%s9291_s9 + $0x220] sm:$0xff] }
 0x5f0   :  { %3251 = vmatmul.mubr.f32.gmra.mrb[120].mxu0 %v2752_v26  ;;  %v5946_v30 = vpack.c.bf16 %v4783_v32, %v4782_v46 }
 0x5f1   :  { %v2758_v8 = vpop.f32.mrb[70].mxu1  ;;  %5974 = vmatpush1.bf16.msra.mxu0 %v5973_v9 }
 0x5f2   :  { %v2760_v45 = vpop.f32.mrb[71].mxu1  ;;  %5975 = vmatprep.subr.bf16.mxu0 %v9512_v56 }
 0x5f3   :  { %4746 = vmatprep.mubr.msk.f32.mxu1 %vm2523_vm6, %v2760_v45 }
 0x5f4   :  { %3087 = vmatmul.mubr.f32.vlgmr.msra.gmra.mrb[134].mxu1 %v2758_v8 }
 0x5f5   :  { %5917 = vmatpush1.bf16.msra.mxu1 %v5916_v10  ;;  %v2764_v52 = vpop.f32.mrb[72].mxu1  ;;  %5977 = vmatpush1.bf16.msra.mxu0 %v5976_v24  ;;  %v4784_v10 = vld [vmem:[%s9291_s9 + $0x230] sm:$0xff] }
 0x5f6   :  { %v2766_v60 = vpop.f32.mrb[73].mxu1  ;;  %5918 = vmatprep.subr.bf16.mxu1 %v9512_v56  ;;  %5978 = vmatprep.subr.bf16.mxu0 %v9512_v56  ;;  %v5949_v45 = vpack.c.bf16 %v4785_v51, %v4784_v10 }
 0x5f7   :  { %4747 = vmatprep.mubr.msk.f32.mxu1 %vm2523_vm6, %v2766_v60  ;;  %v4829_v60 = vld [vmem:[%s9291_s9 + $0x318] sm:$0xff] }
 0x5f8   :  { %3092 = vmatmul.mubr.f32.gmra.mrb[136].mxu1 %v2764_v52 }
 0x5f9   :  { %5920 = vmatpush1.bf16.msra.mxu1 %v5919_v61  ;;  %v2770_v50 = vpop.f32.mrb[74].mxu1  ;;  %5980 = vmatpush1.bf16.msra.mxu0 %v5979_v23  ;;  %v5988_v61 = vpack.c.bf16 %v4827_v57, %v4826_v4  ;;  %v4828_v23 = vld [vmem:[%s9291_s9 + $0x310] sm:$0xff] }
 0x5fa   :  { %v2772_v1 = vpop.f32.mrb[75].mxu1  ;;  %5921 = vmatprep.subr.bf16.mxu1 %v9512_v56  ;;  %5981 = vmatprep.subr.bf16.mxu0 %v9512_v56  ;;  %v5991_v19 = vpack.c.bf16 %v4829_v60, %v4828_v23 }
 0x5fb   :  { %4748 = vmatprep.mubr.msk.f32.mxu1 %vm2523_vm6, %v2772_v1 }
 0x5fc   :  { %3097 = vmatmul.mubr.f32.gmra.mrb[138].mxu1 %v2770_v50  ;;  %v4830_v50 = vld [vmem:[%s9291_s9 + $0x320] sm:$0xff] }
 0x5fd   :  { %5923 = vmatpush1.bf16.msra.mxu1 %v5922_v16  ;;  %v2776_v12 = vpop.f32.mrb[76].mxu1  ;;  %5983 = vmatpush1.bf16.msra.mxu0 %v5982_v13  ;;  %v4831_v16 = vld [vmem:[%s9291_s9 + $0x328] sm:$0xff] }
 0x5fe   :  { %v2778_v43 = vpop.f32.mrb[77].mxu1  ;;  %5924 = vmatprep.subr.bf16.mxu1 %v9512_v56  ;;  %5984 = vmatprep.subr.bf16.mxu0 %v9512_v56  ;;  %v5994_v13 = vpack.c.bf16 %v4831_v16, %v4830_v50 }
 0x5ff   :  { %4749 = vmatprep.mubr.msk.f32.mxu1 %vm2523_vm6, %v2778_v43  ;;  %v4835_v43 = vld [vmem:[%s9291_s9 + $0x348] sm:$0xff] }
 0x600   :  { %3102 = vmatmul.mubr.f32.gmra.mrb[140].mxu1 %v2776_v12  ;;  %v5997_v12 = vpack.c.bf16 %v4833_v14, %v4832_v0 }
 0x601   :  { %5926 = vmatpush1.bf16.msra.mxu1 %v5925_v63  ;;  %v2782_v17 = vpop.f32.mrb[78].mxu1  ;;  %5986 = vmatpush1.bf16.msra.mxu0 %v5985_v21  ;;  %v4834_v21 = vld [vmem:[%s9291_s9 + $0x340] sm:$0xff] }
 0x602   :  { %v2784_v6 = vpop.f32.mrb[79].mxu1  ;;  %5927 = vmatprep.subr.bf16.mxu1 %v9512_v56  ;;  %6023 = vmatprep.subr.bf16.mxu0 %v9512_v56  ;;  %v6000_v54 = vpack.c.bf16 %v4835_v43, %v4834_v21 }
 0x603   :  { %4750 = vmatprep.mubr.msk.f32.mxu1 %vm2523_vm6, %v2784_v6  ;;  %v4837_v6 = vld [vmem:[%s9291_s9 + $0x358] sm:$0xff] }
 0x604   :  { %3107 = vmatmul.mubr.f32.gmra.mrb[142].mxu1 %v2782_v17 }
 0x605   :  { %5929 = vmatpush1.bf16.msra.mxu1 %v5928_v41  ;;  %v2788_v31 = vpop.f32.mrb[80].mxu1  ;;  %v4836_v41 = vld [vmem:[%s9291_s9 + $0x350] sm:$0xff] }
 0x606   :  { %v2790_v39 = vpop.f32.mrb[81].mxu1  ;;  %5930 = vmatprep.subr.bf16.mxu1 %v9512_v56  ;;  %v6003_v5 = vpack.c.bf16 %v4837_v6, %v4836_v41 }
 0x607   :  { %4751 = vmatprep.mubr.msk.f32.mxu1 %vm2523_vm6, %v2790_v39  ;;  %v4839_v39 = vld [vmem:[%s9291_s9 + $0x368] sm:$0xff] }
 0x608   :  { %3112 = vmatmul.mubr.f32.gmra.mrb[144].mxu1 %v2788_v31 }
 0x609   :  { %5932 = vmatpush1.bf16.msra.mxu1 %v5931_v53  ;;  %v2794_v18 = vpop.f32.mrb[82].mxu1  ;;  %v4838_v53 = vld [vmem:[%s9291_s9 + $0x360] sm:$0xff] }
 0x60a   :  { %v2796_v22 = vpop.f32.mrb[83].mxu1  ;;  %5933 = vmatprep.subr.bf16.mxu1 %v9512_v56  ;;  %v6006_v7 = vpack.c.bf16 %v4839_v39, %v4838_v53  ;;  %v5035_v53 = vld [vmem:[%s9295_s13 + $0x10] sm:$0xff]  }
 0x60b   :  { %4752 = vmatprep.mubr.msk.f32.mxu1 %vm2523_vm6, %v2796_v22  ;;  %v4841_v22 = vld [vmem:[%s9291_s9 + $0x378] sm:$0xff] }
 0x60c   :  { %3117 = vmatmul.mubr.f32.gmra.mrb[146].mxu1 %v2794_v18 }
 0x60d   :  { %5935 = vmatpush1.bf16.msra.mxu1 %v5934_v34  ;;  %v2800_v3 = vpop.f32.mrb[84].mxu1  ;;  %v4840_v34 = vld [vmem:[%s9291_s9 + $0x370] sm:$0xff] }
 0x60e   :  { %v2802_v58 = vpop.f32.mrb[85].mxu1  ;;  %5936 = vmatprep.subr.bf16.mxu1 %v9512_v56  ;;  %v6009_v44 = vpack.c.bf16 %v4841_v22, %v4840_v34 }
 0x60f   :  { %4753 = vmatprep.mubr.msk.f32.mxu1 %vm2523_vm6, %v2802_v58  ;;  %v4843_v58 = vld [vmem:[%s9291_s9 + $0x388] sm:$0xff] }
 0x610   :  { %3122 = vmatmul.mubr.f32.gmra.mrb[148].mxu1 %v2800_v3 }
 0x611   :  { %5938 = vmatpush1.bf16.msra.mxu1 %v5937_v35  ;;  %v2806_v62 = vpop.f32.mrb[86].mxu1  ;;  %v4842_v35 = vld [vmem:[%s9291_s9 + $0x380] sm:$0xff] }
 0x612   :  { %v2808_v40 = vpop.f32.mrb[87].mxu1  ;;  %5939 = vmatprep.subr.bf16.mxu1 %v9512_v56  ;;  %v6012_v27 = vpack.c.bf16 %v4843_v58, %v4842_v35 }
 0x613   :  { %4786 = vmatprep.mubr.msk.f32.mxu1 %vm2523_vm6, %v2808_v40  ;;  %v4845_v40 = vld [vmem:[%s9291_s9 + $0x398] sm:$0xff] }
 0x615   :  { %5941 = vmatpush1.bf16.msra.mxu1 %v5940_v33  ;;  %v2812_v26 = vpop.f32.mrb[88].mxu1  ;;  %v4844_v33 = vld [vmem:[%s9291_s9 + $0x390] sm:$0xff] }
 0x616   :  { %v2814_v9 = vpop.f32.mrb[89].mxu1  ;;  %5942 = vmatprep.subr.bf16.mxu1 %v9512_v56  ;;  %v6015_v11 = vpack.c.bf16 %v4845_v40, %v4844_v33 }
 0x619   :  { %5944 = vmatpush1.bf16.msra.mxu1 %v5943_v28  ;;  %v2818_v55 = vpop.f32.mrb[90].mxu1  ;;  %v4846_v28 = vld [vmem:[%s9291_s9 + $0x3a0] sm:$0xff] }
 0x61a   :  { %v2820_v8 = vpop.f32.mrb[91].mxu1  ;;  %5945 = vmatprep.subr.bf16.mxu1 %v9512_v56 }
 0x61d   :  { %5947 = vmatpush1.bf16.msra.mxu1 %v5946_v30  ;;  %v2824_v24 = vpop.f32.mrb[92].mxu1  ;;  %v4848_v30 = vld [vmem:[%s9291_s9 + $0x3b0] sm:$0xff] }
 0x61e   :  { %v2826_v49 = vpop.f32.mrb[93].mxu1  ;;  %5948 = vmatprep.subr.bf16.mxu1 %v9512_v56 }
 0x621   :  { %5950 = vmatpush1.bf16.msra.mxu1 %v5949_v45  ;;  %v2830_v52 = vpop.f32.mrb[94].mxu1 }
 0x622   :  { %v2832_v48 = vpop.f32.mrb[95].mxu1  ;;  %5987 = vmatprep.subr.bf16.mxu1 %v9512_v56 }
 0x624   :  { %3370 = vmatmul.mubr.f32.vlgmr.msra.gmra.mrb[150].mxu1 %v2806_v62 }
 0x625   :  { %4787 = vmatprep.mubr.msk.f32.mxu1 %vm2523_vm6, %v2814_v9  ;;  %v2836_v15 = vpop.f32.mrb[96].mxu1  ;;  %5989 = vmatpush1.bf16.msra.mxu1 %v5988_v61  ;;  %v4847_v9 = vld [vmem:[%s9291_s9 + $0x3a8] sm:$0xff] }
 0x626   :  { %v2838_v47 = vpop.f32.mrb[97].mxu1  ;;  %5990 = vmatprep.subr.bf16.mxu1 %v9512_v56  ;;  %v6018_v32 = vpack.c.bf16 %v4847_v9, %v4846_v28  ;;  %v5039_v9 = vld [vmem:[%s9295_s13 + $0x30] sm:$0xff]  }
 0x628   :  { %3375 = vmatmul.mubr.f32.gmra.mrb[152].mxu1 %v2812_v26 }
 0x629   :  { %4788 = vmatprep.mubr.msk.f32.mxu1 %vm2523_vm6, %v2820_v8  ;;  %v2842_v29 = vpop.f32.mrb[98].mxu1  ;;  %5992 = vmatpush1.bf16.msra.mxu1 %v5991_v19  ;;  %v4849_v8 = vld [vmem:[%s9291_s9 + $0x3b8] sm:$0xff] }
 0x62a   :  { %v2844_v1 = vpop.f32.mrb[99].mxu1  ;;  %5993 = vmatprep.subr.bf16.mxu1 %v9512_v56  ;;  %v6021_v51 = vpack.c.bf16 %v4849_v8, %v4848_v30  ;;  %v5040_v30 = vld [vmem:[%s9295_s13 + $0x38] sm:$0xff]  }
 0x62c   :  { %3380 = vmatmul.mubr.f32.gmra.mrb[154].mxu1 %v2818_v55 }
 0x62d   :  { %4789 = vmatprep.mubr.msk.f32.mxu1 %vm2523_vm6, %v2826_v49  ;;  %v2848_v25 = vpop.f32.mrb[100].mxu1  ;;  %5995 = vmatpush1.bf16.msra.mxu1 %v5994_v13 }
 0x62e   :  { %v2850_v63 = vpop.f32.mrb[101].mxu1  ;;  %5996 = vmatprep.subr.bf16.mxu1 %v9512_v56 }
 0x630   :  { %3385 = vmatmul.mubr.f32.gmra.mrb[156].mxu1 %v2824_v24 }
 0x631   :  { %4790 = vmatprep.mubr.msk.f32.mxu1 %vm2523_vm6, %v2832_v48  ;;  %v2854_v2 = vpop.f32.mrb[102].mxu1  ;;  %5998 = vmatpush1.bf16.msra.mxu1 %v5997_v12 }
 0x632   :  { %v2856_v17 = vpop.f32.mrb[103].mxu1  ;;  %5999 = vmatprep.subr.bf16.mxu1 %v9512_v56 }
 0x633   :  { %4818 = vmatprep.mubr.msk.f32.mxu0 %vm2523_vm6, %v2856_v17  ;;  %v4968_v17 = vld [vmem:[%s9295_s13] sm:$0xff]  }
 0x634   :  { %3390 = vmatmul.mubr.f32.gmra.mrb[158].mxu1 %v2830_v52  ;;  %3532 = vmatmul.mubr.f32.vlgmr.msra.gmra.mrb[122].mxu0 %v2854_v2 }
 0x635   :  { %4791 = vmatprep.mubr.msk.f32.mxu1 %vm2523_vm6, %v2838_v47  ;;  %v2860_v20 = vpop.f32.mrb[104].mxu1  ;;  %6001 = vmatpush1.bf16.msra.mxu1 %v6000_v54 }
 0x636   :  { %v2862_v31 = vpop.f32.mrb[105].mxu1  ;;  %6002 = vmatprep.subr.bf16.mxu1 %v9512_v56  ;;  %6025 = vmatpush3.bf16.msra.mxu0 %v4968_v17 }
 0x637   :  { %4819 = vmatprep.mubr.msk.f32.mxu0 %vm2523_vm6, %v2862_v31  ;;  %6026 = vmatprep.subr.bf16.mxu0 %v9512_v56 }
 0x638   :  { %3395 = vmatmul.mubr.f32.gmra.mrb[160].mxu1 %v2836_v15  ;;  %3537 = vmatmul.mubr.f32.gmra.mrb[124].mxu0 %v2860_v20  ;;  %v5034_v20 = vld [vmem:[%s9295_s13 + $0x8] sm:$0xff]  }
 0x639   :  { %4792 = vmatprep.mubr.msk.f32.mxu1 %vm2523_vm6, %v2844_v1  ;;  %v2866_v38 = vpop.f32.mrb[106].mxu1  ;;  %6004 = vmatpush1.bf16.msra.mxu1 %v6003_v5 }
 0x63a   :  { %v2868_v18 = vpop.f32.mrb[107].mxu1  ;;  %6005 = vmatprep.subr.bf16.mxu1 %v9512_v56  ;;  %6028 = vmatpush3.bf16.msra.mxu0 %v5034_v20 }
 0x63b   :  { %4820 = vmatprep.mubr.msk.f32.mxu0 %vm2523_vm6, %v2868_v18  ;;  %6029 = vmatprep.subr.bf16.mxu0 %v9512_v56 }
 0x63c   :  { %3400 = vmatmul.mubr.f32.gmra.mrb[162].mxu1 %v2842_v29  ;;  %3542 = vmatmul.mubr.f32.gmra.mrb[126].mxu0 %v2866_v38 }
 0x63d   :  { %4793 = vmatprep.mubr.msk.f32.mxu1 %vm2523_vm6, %v2850_v63  ;;  %v2872_v59 = vpop.f32.mrb[108].mxu1  ;;  %6007 = vmatpush1.bf16.msra.mxu1 %v6006_v7  ;;  %v5036_v7 = vld [vmem:[%s9295_s13 + $0x18] sm:$0xff]  }
 0x63e   :  { %v2874_v3 = vpop.f32.mrb[109].mxu1  ;;  %6008 = vmatprep.subr.bf16.mxu1 %v9512_v56  ;;  %6031 = vmatpush3.bf16.msra.mxu0 %v5035_v53 }
 0x63f   :  { %4821 = vmatprep.mubr.msk.f32.mxu0 %vm2523_vm6, %v2874_v3  ;;  %6032 = vmatprep.subr.bf16.mxu0 %v9512_v56 }
 0x640   :  { %3405 = vmatmul.mubr.f32.gmra.mrb[164].mxu1 %v2848_v25  ;;  %3547 = vmatmul.mubr.f32.gmra.mrb[128].mxu0 %v2872_v59 }
 0x641   :  { %v2878_v42 = vpop.f32.mrb[110].mxu1  ;;  %6010 = vmatpush1.bf16.msra.mxu1 %v6009_v44 }
 0x642   :  { %v2880_v62 = vpop.f32.mrb[111].mxu1  ;;  %6011 = vmatprep.subr.bf16.mxu1 %v9512_v56  ;;  %6034 = vmatpush3.bf16.msra.mxu0 %v5036_v7 }
 0x643   :  { %4822 = vmatprep.mubr.msk.f32.mxu0 %vm2523_vm6, %v2880_v62  ;;  %6035 = vmatprep.subr.bf16.mxu0 %v9512_v56 }
 0x644   :  { %3552 = vmatmul.mubr.f32.gmra.mrb[130].mxu0 %v2878_v42 }
 0x645   :  { %v2884_v37 = vpop.f32.mrb[112].mxu1  ;;  %6013 = vmatpush1.bf16.msra.mxu1 %v6012_v27  ;;  %v5037_v27 = vld [vmem:[%s9295_s13 + $0x20] sm:$0xff]  }
 0x646   :  { %v2886_v26 = vpop.f32.mrb[113].mxu1  ;;  %6014 = vmatprep.subr.bf16.mxu1 %v9512_v56  ;;  %6037 = vmatpush3.bf16.msra.mxu0 %v5037_v27 }
 0x647   :  { %4823 = vmatprep.mubr.msk.f32.mxu0 %vm2523_vm6, %v2886_v26  ;;  %6038 = vmatprep.subr.bf16.mxu0 %v9512_v56 }
 0x648   :  { %3557 = vmatmul.mubr.f32.gmra.mrb[132].mxu0 %v2884_v37  ;;  %v5038_v37 = vld [vmem:[%s9295_s13 + $0x28] sm:$0xff]  }
 0x649   :  { %v2890_v46 = vpop.f32.mrb[114].mxu1  ;;  %6016 = vmatpush1.bf16.msra.mxu1 %v6015_v11 }
 0x64a   :  { %v2892_v55 = vpop.f32.mrb[115].mxu1  ;;  %6017 = vmatprep.subr.bf16.mxu1 %v9512_v56  ;;  %6040 = vmatpush3.bf16.msra.mxu0 %v5038_v37 }
 0x64b   :  { %4824 = vmatprep.mubr.msk.f32.mxu0 %vm2523_vm6, %v2892_v55  ;;  %6041 = vmatprep.subr.bf16.mxu0 %v9512_v56 }
 0x64c   :  { %3562 = vmatmul.mubr.f32.gmra.mrb[134].mxu0 %v2890_v46 }
 0x64d   :  { %v2896_v10 = vpop.f32.mrb[116].mxu1  ;;  %6019 = vmatpush1.bf16.msra.mxu1 %v6018_v32 }
 0x64e   :  { %v2898_v24 = vpop.f32.mrb[117].mxu1  ;;  %6020 = vmatprep.subr.bf16.mxu1 %v9512_v56  ;;  %6043 = vmatpush3.bf16.msra.mxu0 %v5039_v9 }
 0x64f   :  { %4825 = vmatprep.mubr.msk.f32.mxu0 %vm2523_vm6, %v2898_v24  ;;  %6044 = vmatprep.subr.bf16.mxu0 %v9512_v56 }
 0x650   :  { %3567 = vmatmul.mubr.f32.gmra.mrb[136].mxu0 %v2896_v10 }
 0x651   :  { %v2902_v45 = vpop.f32.mrb[118].mxu1  ;;  %6022 = vmatpush1.bf16.msra.mxu1 %v6021_v51  ;;  %5404 = vmatprep.mubr.msk.f32.mxu0 %vm6390_vm4, %v9448_v36 }
 0x652   :  { %v2904_v49 = vpop.f32.mrb[119].mxu1  ;;  %6047 = vmatprep.subr.bf16.mxu1 %v9512_v56  ;;  %6046 = vmatpush3.bf16.msra.mxu0 %v5040_v30 }
 0x653   :  { %4850 = vmatprep.mubr.msk.f32.mxu1 %vm2523_vm6, %v2904_v49  ;;  %6071 = vmatprep.subr.bf16.mxu0 %v9512_v56 }
 0x654   :  { %3694 = vmatmul.mubr.f32.vlgmr.msra.gmra.mrb[166].mxu1 %v2902_v45 }
 0x655   :  { %v2908_v4 = vpop.f32.mrb[120].mxu1  ;;  %6049 = vmatpush3.bf16.msra.mxu1 %v4968_v17 }
 0x656   :  { %v2910_v57 = vpop.f32.mrb[121].mxu1  ;;  %6050 = vmatprep.subr.bf16.mxu1 %v9512_v56 }
 0x657   :  { %4851 = vmatprep.mubr.msk.f32.mxu1 %vm2523_vm6, %v2910_v57 }
 0x658   :  { %3699 = vmatmul.mubr.f32.gmra.mrb[168].mxu1 %v2908_v4 }
 0x659   :  { %v2914_v52 = vpop.f32.mrb[122].mxu1  ;;  %6052 = vmatpush3.bf16.msra.mxu1 %v5034_v20 }
 0x65a   :  { %v2916_v61 = vpop.f32.mrb[123].mxu1  ;;  %6053 = vmatprep.subr.bf16.mxu1 %v9512_v56 }
 0x65b   :  { %4852 = vmatprep.mubr.msk.f32.mxu1 %vm2523_vm6, %v2916_v61 }
 0x65c   :  { %3704 = vmatmul.mubr.f32.gmra.mrb[170].mxu1 %v2914_v52 }
 0x65d   :  { %v2920_v48 = vpop.f32.mrb[124].mxu1  ;;  %6055 = vmatpush3.bf16.msra.mxu1 %v5035_v53 }
 0x65e   :  { %v2922_v23 = vpop.f32.mrb[125].mxu1  ;;  %6056 = vmatprep.subr.bf16.mxu1 %v9512_v56 }
 0x65f   :  { %4853 = vmatprep.mubr.msk.f32.mxu1 %vm2523_vm6, %v2922_v23 }
 0x660   :  { %3709 = vmatmul.mubr.f32.gmra.mrb[172].mxu1 %v2920_v48 }
 0x661   :  { %v2926_v60 = vpop.f32.mrb[126].mxu1  ;;  %6058 = vmatpush3.bf16.msra.mxu1 %v5036_v7 }
 0x662   :  { %v2928_v15 = vpop.f32.mrb[127].mxu1  ;;  %6059 = vmatprep.subr.bf16.mxu1 %v9512_v56 }
 0x663   :  { %4854 = vmatprep.mubr.msk.f32.mxu1 %vm2523_vm6, %v2928_v15 }
 0x664   :  { %3714 = vmatmul.mubr.f32.gmra.mrb[174].mxu1 %v2926_v60 }
 0x665   :  { %v2932_v19 = vpop.f32.mrb[128].mxu1  ;;  %6061 = vmatpush3.bf16.msra.mxu1 %v5037_v27 }
 0x666   :  { %v2934_v47 = vpop.f32.mrb[129].mxu1  ;;  %6062 = vmatprep.subr.bf16.mxu1 %v9512_v56 }
 0x667   :  { %4855 = vmatprep.mubr.msk.f32.mxu1 %vm2523_vm6, %v2934_v47 }
 0x668   :  { %3719 = vmatmul.mubr.f32.gmra.mrb[176].mxu1 %v2932_v19 }
 0x669   :  { %v2938_v50 = vpop.f32.mrb[130].mxu1  ;;  %6064 = vmatpush3.bf16.msra.mxu1 %v5038_v37 }
 0x66a   :  { %v2940_v16 = vpop.f32.mrb[131].mxu1  ;;  %6065 = vmatprep.subr.bf16.mxu1 %v9512_v56 }
 0x66b   :  { %4856 = vmatprep.mubr.msk.f32.mxu1 %vm2523_vm6, %v2940_v16 }
 0x66c   :  { %3724 = vmatmul.mubr.f32.gmra.mrb[178].mxu1 %v2938_v50 }
 0x66d   :  { %v2944_v29 = vpop.f32.mrb[132].mxu1  ;;  %6067 = vmatpush3.bf16.msra.mxu1 %v5039_v9 }
 0x66e   :  { %v2946_v13 = vpop.f32.mrb[133].mxu1  ;;  %6068 = vmatprep.subr.bf16.mxu1 %v9512_v56 }
 0x66f   :  { %4857 = vmatprep.mubr.msk.f32.mxu1 %vm2523_vm6, %v2946_v13 }
 0x670   :  { %3729 = vmatmul.mubr.f32.gmra.mrb[180].mxu1 %v2944_v29 }
 0x671   :  { %5439 = vmatprep.mubr.msk.f32.mxu1 %vm6390_vm4, %v9448_v36  ;;  %6070 = vmatpush3.bf16.msra.mxu1 %v5040_v30 }
 0x672   :  { %6074 = vmatprep.subr.bf16.mxu1 %v9512_v56 }
 0x6a7   :  { %v3217_v1 = vpop.f32.mrb[106].mxu0 }
 0x6a8   :  { %v3219_v0 = vpop.f32.mrb[107].mxu0 }
 0x6ab   :  { %v3222_v14 = vpop.f32.mrb[108].mxu0 }
 0x6ac   :  { %v3224_v25 = vpop.f32.mrb[109].mxu0 }
 0x6af   :  { %v3227_v12 = vpop.f32.mrb[110].mxu0 }
 0x6b0   :  { %v3229_v63 = vpop.f32.mrb[111].mxu0 }
 0x6b3   :  { %v3232_v21 = vpop.f32.mrb[112].mxu0 }
 0x6b4   :  { %v3234_v43 = vpop.f32.mrb[113].mxu0 }
 0x6b7   :  { %v3237_v2 = vpop.f32.mrb[114].mxu0 }
 0x6b8   :  { %v3239_v54 = vpop.f32.mrb[115].mxu0 }
 0x6bb   :  { %v3242_v41 = vpop.f32.mrb[116].mxu0 }
 0x6bc   :  { %v3244_v6 = vpop.f32.mrb[117].mxu0 }
 0x6bf   :  { %v3247_v5 = vpop.f32.mrb[118].mxu0 }
 0x6c0   :  { %v3249_v31 = vpop.f32.mrb[119].mxu0 }
 0x6c3   :  { %v3252_v39 = vpop.f32.mrb[120].mxu0 }
 0x6c4   :  { %v3254_v38 = vpop.f32.mrb[121].mxu0 }
 0x6c7   :  { %v3088_v18 = vpop.f32.mrb[134].mxu1 }
 0x6c8   :  { %v3218_v34 = vadd.f32 %v3217_v1, %v3088_v18  ;;  %v3090_v22 = vpop.f32.mrb[135].mxu1 }
 0x6cb   :  { %v3093_v59 = vpop.f32.mrb[136].mxu1 }
 0x6cc   :  { %v3223_v44 = vadd.f32 %v3222_v14, %v3093_v59  ;;  %v3095_v3 = vpop.f32.mrb[137].mxu1 }
 0x6cf   :  { %v3098_v35 = vpop.f32.mrb[138].mxu1 }
 0x6d0   :  { %v3228_v58 = vadd.f32 %v3227_v12, %v3098_v35  ;;  %v3100_v42 = vpop.f32.mrb[139].mxu1 }
 0x6d3   :  { %v3103_v62 = vpop.f32.mrb[140].mxu1 }
 0x6d4   :  { %v3233_v33 = vadd.f32 %v3232_v21, %v3103_v62  ;;  %v3105_v40 = vpop.f32.mrb[141].mxu1 }
 0x6d7   :  { %v3108_v11 = vpop.f32.mrb[142].mxu1 }
 0x6d8   :  { %v3238_v26 = vadd.f32 %v3237_v2, %v3108_v11  ;;  %v3110_v28 = vpop.f32.mrb[143].mxu1 }
 0x6db   :  { %v3113_v46 = vpop.f32.mrb[144].mxu1 }
 0x6dc   :  { %v3243_v32 = vadd.f32 %v3242_v41, %v3113_v46  ;;  %v3115_v55 = vpop.f32.mrb[145].mxu1 }
 0x6df   :  { %v3118_v8 = vpop.f32.mrb[146].mxu1 }
 0x6e0   :  { %v3248_v10 = vadd.f32 %v3247_v5, %v3118_v8  ;;  %v3120_v51 = vpop.f32.mrb[147].mxu1 }
 0x6e1   :  { %v4858_v51 = vld [vmem:[%s9292_s10] ss:$0 sm:$0xff] }
 0x6e3   :  { %v3123_v24 = vpop.f32.mrb[148].mxu1 }
 0x6e4   :  { %v3253_v45 = vadd.f32 %v3252_v39, %v3123_v24  ;;  %v3125_v49 = vpop.f32.mrb[149].mxu1 }
 0x6f7   :  { %v3371_v4 = vpop.f32.mrb[150].mxu1 }
 0x6f8   :  { %v3410_v57 = vadd.f32 %v3371_v4, %v3218_v34  ;;  %v3373_v52 = vpop.f32.mrb[151].mxu1 }
 0x6fb   :  { %v3376_v61 = vpop.f32.mrb[152].mxu1 }
 0x6fc   :  { %v3411_v48 = vadd.f32 %v3376_v61, %v3223_v44  ;;  %v3378_v23 = vpop.f32.mrb[153].mxu1 }
 0x6ff   :  { %v3381_v60 = vpop.f32.mrb[154].mxu1 }
 0x700   :  { %v3412_v15 = vadd.f32 %v3381_v60, %v3228_v58  ;;  %v3383_v19 = vpop.f32.mrb[155].mxu1 }
 0x703   :  { %v3386_v47 = vpop.f32.mrb[156].mxu1 }
 0x704   :  { %v3413_v50 = vadd.f32 %v3386_v47, %v3233_v33  ;;  %v3388_v16 = vpop.f32.mrb[157].mxu1 }
 0x707   :  { %v3391_v29 = vpop.f32.mrb[158].mxu1  ;;  %v3533_v13 = vpop.f32.mrb[122].mxu0 }
 0x708   :  { %v3414_v1 = vadd.f32 %v3391_v29, %v3238_v26  ;;  %v3393_v0 = vpop.f32.mrb[159].mxu1  ;;  %v3572_v14 = vadd.f32 %v3533_v13, %v3410_v57  ;;  %v3535_v25 = vpop.f32.mrb[123].mxu0 }
 0x70b   :  { %v3396_v12 = vpop.f32.mrb[160].mxu1  ;;  %v3538_v63 = vpop.f32.mrb[124].mxu0 }
 0x70c   :  { %v3415_v21 = vadd.f32 %v3396_v12, %v3243_v32  ;;  %v3398_v43 = vpop.f32.mrb[161].mxu1  ;;  %v3573_v2 = vadd.f32 %v3538_v63, %v3411_v48  ;;  %v3540_v54 = vpop.f32.mrb[125].mxu0 }
 0x70f   :  { %v3401_v17 = vpop.f32.mrb[162].mxu1  ;;  %v3543_v41 = vpop.f32.mrb[126].mxu0 }
 0x710   :  { %v3416_v6 = vadd.f32 %v3401_v17, %v3248_v10  ;;  %v3403_v20 = vpop.f32.mrb[163].mxu1  ;;  %v3574_v5 = vadd.f32 %v3543_v41, %v3412_v15  ;;  %v3545_v31 = vpop.f32.mrb[127].mxu0 }
 0x713   :  { %v3406_v53 = vpop.f32.mrb[164].mxu1  ;;  %v3548_v39 = vpop.f32.mrb[128].mxu0 }
 0x714   :  { %v3417_v38 = vadd.f32 %v3406_v53, %v3253_v45  ;;  %v3408_v7 = vpop.f32.mrb[165].mxu1  ;;  %v3575_v18 = vadd.f32 %v3548_v39, %v3413_v50  ;;  %v3550_v34 = vpop.f32.mrb[129].mxu0 }
 0x717   :  { %v3553_v22 = vpop.f32.mrb[130].mxu0 }
 0x718   :  { %v3576_v59 = vadd.f32 %v3553_v22, %v3414_v1  ;;  %v3555_v44 = vpop.f32.mrb[131].mxu0 }
 0x71b   :  { %v3558_v3 = vpop.f32.mrb[132].mxu0 }
 0x71c   :  { %v3577_v35 = vadd.f32 %v3558_v3, %v3415_v21  ;;  %v3560_v58 = vpop.f32.mrb[133].mxu0 }
 0x71f   :  { %v3563_v42 = vpop.f32.mrb[134].mxu0 }
 0x720   :  { %v3578_v27 = vadd.f32 %v3563_v42, %v3416_v6  ;;  %v3565_v62 = vpop.f32.mrb[135].mxu0 }
 0x723   :  { %v3568_v33 = vpop.f32.mrb[136].mxu0 }
 0x724   :  { %v3579_v40 = vadd.f32 %v3568_v33, %v3417_v38  ;;  %v3570_v37 = vpop.f32.mrb[137].mxu0 }
 0x727   :  { %v3695_v11 = vpop.f32.mrb[166].mxu1 }
 0x728   :  { %v3734_v26 = vadd.f32 %v3695_v11, %v3572_v14  ;;  %v3697_v28 = vpop.f32.mrb[167].mxu1 }
 0x72a   :  { %v8937_v4 = vadd.f32 %v4858_v51, %v3734_v26 }
 0x72b   :  { %v3700_v9 = vpop.f32.mrb[168].mxu1 }
 0x72c   :  { %v3735_v46 = vadd.f32 %v3700_v9, %v3573_v2  ;;  %v3702_v32 = vpop.f32.mrb[169].mxu1  ;;  %v3808_v15 = vmul.f32 %v8937_v4, %v8937_v4 }
 0x72d   :  { %v5000_v32 = vld [vmem:[%s9296_s14] sm:$0xff]  }
 0x72e   :  { %v8935_v49 = vadd.f32 %v4858_v51, %v3735_v46 }
 0x72f   :  { %v3705_v55 = vpop.f32.mrb[170].mxu1 }
 0x730   :  { %v3736_v30 = vadd.f32 %v3705_v55, %v3574_v5  ;;  %v3707_v8 = vpop.f32.mrb[171].mxu1  ;;  %v3809_v23 = vmul.f32 %v8935_v49, %v8935_v49  ;;  %v3795_v47 = vadd.f32 %v8935_v49, %v8937_v4 }
 0x732   :  { %v8939_v52 = vadd.f32 %v4858_v51, %v3736_v30  ;;  %v3816_v1 = vadd.f32 %v3809_v23, %v3808_v15 }
 0x733   :  { %v3710_v10 = vpop.f32.mrb[172].mxu1 }
 0x734   :  { %v3737_v24 = vadd.f32 %v3710_v10, %v3575_v18  ;;  %v3712_v45 = vpop.f32.mrb[173].mxu1  ;;  %v3810_v50 = vmul.f32 %v8939_v52, %v8939_v52  ;;  %v3796_v0 = vadd.f32 %v3795_v47, %v8939_v52 }
 0x736   :  { %v8943_v60 = vadd.f32 %v4858_v51, %v3737_v24  ;;  %v3817_v63 = vadd.f32 %v3816_v1, %v3810_v50  ;;  %v4278_v1 = vld [vmem:[%s9298_s16 + $0x80] sm:$0xff] }
 0x737   :  { %v3715_v57 = vpop.f32.mrb[174].mxu1 }
 0x738   :  { %v3738_v61 = vadd.f32 %v3715_v57, %v3576_v59  ;;  %v3717_v48 = vpop.f32.mrb[175].mxu1  ;;  %v3811_v14 = vmul.f32 %v8943_v60, %v8943_v60  ;;  %v3797_v21 = vadd.f32 %v3796_v0, %v8943_v60  ;;  %v4279_v0 = vld [vmem:[%s9298_s16 + $0x88] sm:$0xff] }
 0x739   :  { %v3757_v48 = vld [vmem:[%s9293_s11] sm:$0x1] }
 0x73a   :  { %v8951_v16 = vadd.f32 %v4858_v51, %v3738_v61  ;;  %v3818_v17 = vadd.f32 %v3817_v63, %v3811_v14  ;;  %v4262_v14 = vld [vmem:[%s9298_s16] sm:$0xff]  ;;  %v4263_v63 = vld [vmem:[%s9298_s16 + $0x8] sm:$0xff] }
 0x73b   :  { %v3720_v19 = vpop.f32.mrb[176].mxu1 }
 0x73c   :  { %v3739_v29 = vadd.f32 %v3720_v19, %v3577_v35  ;;  %v3722_v13 = vpop.f32.mrb[177].mxu1  ;;  %v3812_v43 = vmul.f32 %v8951_v16, %v8951_v16  ;;  %v3798_v41 = vadd.f32 %v3797_v21, %v8951_v16  ;;  %v3758_v19 = vld [vmem:[%s9294_s12] sm:$0x1]  ;;  %v4280_v21 = vld [vmem:[%s9298_s16 + $0x90] sm:$0xff] }
 0x73e   :  { %v8956_v25 = vadd.f32 %v4858_v51, %v3739_v29  ;;  %v3819_v31 = vadd.f32 %v3818_v17, %v3812_v43  ;;  %v8993_v29 = vld [vmem:[%s9297_s15] sm:$0xff]   ;;  %v4281_v43 = vld [vmem:[%s9298_s16 + $0x98] sm:$0xff]  ;;  %v4264_v17 = vld [vmem:[%s9298_s16 + $0x10] sm:$0xff] }
 0x73f   :  { %v3725_v12 = vpop.f32.mrb[178].mxu1  ;;  %v5005_v13 = vunpack.c.l.bf16 %v8993_v29 }
 0x740   :  { %v3740_v2 = vadd.f32 %v3725_v12, %v3578_v27  ;;  %v3727_v54 = vpop.f32.mrb[179].mxu1  ;;  %v3813_v6 = vmul.f32 %v8956_v25, %v8956_v25  ;;  %v3799_v53 = vadd.f32 %v3798_v41, %v8956_v25  ;;  %v6093_v12 = vpack.c.bf16 %v4279_v0, %v4278_v1  ;;  %v4265_v41 = vld [vmem:[%s9298_s16 + $0x18] sm:$0xff] }
 0x741   :  { %v6097_v54 = vpack.c.bf16 %v4281_v43, %v4280_v21 }
 0x742   :  { %v8964_v20 = vadd.f32 %v4858_v51, %v3740_v2  ;;  %v3820_v18 = vadd.f32 %v3819_v31, %v3813_v6  ;;  %v6095_v2 = vpack.c.bf16 %v4263_v63, %v4262_v14  ;;  %v6099_v6 = vpack.c.bf16 %v4265_v41, %v4264_v17  ;;  %v4283_v31 = vld [vmem:[%s9298_s16 + $0xa8] sm:$0xff] }
 0x743   :  { %v3730_v5 = vpop.f32.mrb[180].mxu1 }
 0x744   :  { %v3814_v39 = vmul.f32 %v8964_v20, %v8964_v20  ;;  %v3741_v38 = vadd.f32 %v3730_v5, %v3579_v40  ;;  %v3732_v7 = vpop.f32.mrb[181].mxu1  ;;  %v3800_v34 = vadd.f32 %v3799_v53, %v8964_v20  ;;  %v4282_v5 = vld [vmem:[%s9298_s16 + $0xa0] sm:$0xff] }
 0x745   :  { %v6101_v53 = vpack.c.bf16 %v4283_v31, %v4282_v5  ;;  %v4284_v7 = vld [vmem:[%s9298_s16 + $0xb0] sm:$0xff] }
 0x746   :  { %v8970_v22 = vadd.f32 %v4858_v51, %v3741_v38  ;;  %v3821_v59 = vadd.f32 %v3820_v18, %v3814_v39  ;;  %v4266_v39 = vld [vmem:[%s9298_s16 + $0x20] sm:$0xff]  ;;  %v4267_v38 = vld [vmem:[%s9298_s16 + $0x28] sm:$0xff]  ;;  %v4285_v18 = vld [vmem:[%s9298_s16 + $0xb8] sm:$0xff] }
 0x748   :  { %v3801_v44 = vadd.f32 %v3800_v34, %v8970_v22  ;;  %v3815_v3 = vmul.f32 %v8970_v22, %v8970_v22  ;;  %v6103_v34 = vpack.c.bf16 %v4267_v38, %v4266_v39 }
 0x74a   :  { %v3802_v35 = vrot.slane %v3801_v44, 4  ;;  %v3822_v58 = vadd.f32 %v3821_v59, %v3815_v3  ;;  %v6105_v59 = vpack.c.bf16 %v4285_v18, %v4284_v7  ;;  %v4269_v3 = vld [vmem:[%s9298_s16 + $0x38] sm:$0xff] }
 0x74c   :  { %v3803_v42 = vadd.f32 %v3802_v35, %v3801_v44  ;;  %v3823_v27 = vrot.slane %v3822_v58, 4  ;;  %v4268_v44 = vld [vmem:[%s9298_s16 + $0x30] sm:$0xff]  ;;  %v4286_v35 = vld [vmem:[%s9298_s16 + $0xc0] sm:$0xff] }
 0x74e   :  { %v3804_v62 = vrot.slane %v3803_v42, 2  ;;  %v3824_v33 = vadd.f32 %v3823_v27, %v3822_v58  ;;  %v4287_v58 = vld [vmem:[%s9298_s16 + $0xc8] sm:$0xff] }
 0x74f   :  { %v6109_v27 = vpack.c.bf16 %v4287_v58, %v4286_v35  ;;  %v4311_v35 = vld [vmem:[%s9298_s16 + $0x188] sm:$0xff] }
 0x750   :  { %v3805_v37 = vadd.f32 %v3804_v62, %v3803_v42  ;;  %v3825_v40 = vrot.slane %v3824_v33, 2  ;;  %v6107_v42 = vpack.c.bf16 %v4269_v3, %v4268_v44  ;;  %v4270_v62 = vld [vmem:[%s9298_s16 + $0x40] sm:$0xff]  ;;  %v5041_v58 = vld [vmem:[%s9297_s15 + $0x8] sm:$0xff]  }
 0x751   :  { %v4310_v3 = vld [vmem:[%s9298_s16 + $0x180] sm:$0xff] }
 0x752   :  { %v3806_v11 = vrot.slane %v3805_v37, 1  ;;  %v3826_v26 = vadd.f32 %v3825_v40, %v3824_v33  ;;  %v4271_v33 = vld [vmem:[%s9298_s16 + $0x48] sm:$0xff]  ;;  %v4289_v40 = vld [vmem:[%s9298_s16 + $0xd8] sm:$0xff] }
 0x754   :  { %v3807_v28 = vadd.f32 %v3806_v11, %v3805_v37  ;;  %v3827_v9 = vrot.slane %v3826_v26, 1  ;;  %v4288_v37 = vld [vmem:[%s9298_s16 + $0xd0] sm:$0xff]  ;;  %v6111_v11 = vpack.c.bf16 %v4271_v33, %v4270_v62  ;;  %v4295_v62 = vld [vmem:[%s9298_s16 + $0x108] sm:$0xff] }
 0x755   :  { %v4312_v33 = vld [vmem:[%s9298_s16 + $0x190] sm:$0xff] }
 0x756   :  { %5405 = vmatmul.mubr.f32.vlgmr.msra.gmra.mrb[138].mxu0 %v3807_v28  ;;  %v3828_v46 = vadd.f32 %v3827_v9, %v3826_v26  ;;  %v6113_v26 = vpack.c.bf16 %v4289_v40, %v4288_v37  ;;  %v4272_v28 = vld [vmem:[%s9298_s16 + $0x50] sm:$0xff]  ;;  %v4273_v9 = vld [vmem:[%s9298_s16 + $0x58] sm:$0xff]  ;;  %v5006_v40 = vunpack.c.h.bf16 %v8993_v29  ;;  %v4315_v29 = vld [vmem:[%s9298_s16 + $0x1a8] sm:$0xff] }
 0x757   :  { %5446 = vmatprep.mubr.msk.f32.mxu0 %vm6390_vm4, %v9448_v36  ;;  %6073 = vmatpush3.bf16.msra.mxu0 %v5000_v32  ;;  %v4313_v37 = vld [vmem:[%s9298_s16 + $0x198] sm:$0xff] }
 0x758   :  { %5440 = vmatmul.mubr.f32.vlgmr.msra.gmra.mrb[182].mxu1 %v3828_v46  ;;  %v4290_v46 = vld [vmem:[%s9298_s16 + $0xe0] sm:$0xff] }
 0x759   :  { %5453 = vmatprep.mubr.msk.f32.mxu1 %vm6390_vm4, %v9448_v36  ;;  %6076 = vmatpush3.bf16.msra.mxu1 %v5000_v32  ;;  %v4291_v32 = vld [vmem:[%s9298_s16 + $0xe8] sm:$0xff] }
 0x75a   :  { %6094 = vmatprep.subr.bf16.mxu1 %v6093_v12 }
 0x829   :  { %v3895_v55 = vpop.f32.mrb[138].mxu0 }
 0x82a   :  { %v3900_v30 = vmul.f32 0.001953125, %v3895_v55  ;;  %v5406_v8 = vpop.f32.mrb[139].mxu0  ;;  %v6115_v55 = vpack.c.bf16 %v4273_v9, %v4272_v28  ;;  %v6129_v28 = vpack.c.bf16 %v4313_v37, %v4312_v33  ;;  %v4296_v9 = vld [vmem:[%s9298_s16 + $0x110] sm:$0xff]  ;;  %v4523_v33 = vld [vmem:[%s9302_s20 + $0x40] sm:$0xff]  ;;  %v4524_v37 = vld [vmem:[%s9302_s20 + $0x48] sm:$0xff] }
 0x82b   :  { %v3967_v10 = vpop.f32.mrb[182].mxu1  ;;  %v4274_v8 = vld [vmem:[%s9298_s16 + $0x60] sm:$0xff] }
 0x82c   :  { %v3972_v51 = vmul.f32 %v3900_v30, %v3900_v30  ;;  %v3971_v24 = vmul.f32 0.001953125, %v3967_v10  ;;  %v5441_v45 = vpop.f32.mrb[183].mxu1  ;;  %v4275_v10 = vld [vmem:[%s9298_s16 + $0x68] sm:$0xff] }
 0x82d   :  { %v6119_v45 = vpack.c.bf16 %v4275_v10, %v4274_v8  ;;  %v4298_v10 = vld [vmem:[%s9298_s16 + $0x120] sm:$0xff] }
 0x82e   :  { %v3973_v57 = vsub.f32 %v3971_v24, %v3972_v51  ;;  %v4292_v51 = vld [vmem:[%s9298_s16 + $0xf0] sm:$0xff]  ;;  %v4293_v24 = vld [vmem:[%s9298_s16 + $0xf8] sm:$0xff] }
 0x830   :  { %v3974_v61 = vadd.f32 1e-05, %v3973_v57  ;;  %v6121_v57 = vpack.c.bf16 %v4293_v24, %v4292_v51  ;;  %v4299_v51 = vld [vmem:[%s9298_s16 + $0x128] sm:$0xff]  ;;  %v4316_v24 = vld [vmem:[%s9298_s16 + $0x1b0] sm:$0xff] }
 0x832   :  { %6360 = vrsqrt.f32 %v3974_v61  ;;  %v4276_v61 = vld [vmem:[%s9298_s16 + $0x70] sm:$0xff] }
 0x83c   :  { %v6361_v23 = vpop.eup %6360 }
 0x83d   :  { %v3976_v15 = vmul.f32 %v6361_v23, %v3757_v48  ;;  %v4277_v48 = vld [vmem:[%s9298_s16 + $0x78] sm:$0xff] }
 0x83e   :  { %v6123_v23 = vpack.c.bf16 %v4277_v48, %v4276_v61  ;;  %v4300_v48 = vld [vmem:[%s9298_s16 + $0x130] sm:$0xff] }
 0x83f   :  { %5447 = vmatmul.mubr.msk.f32.vlgmr.msra.gmra.mrb[140].mxu0 %vm1312_vm5, %v3976_v15  ;;  %v3977_v47 = vmul.f32 %v3976_v15, %v3900_v30  ;;  %v6117_v30 = vpack.c.bf16 %v4291_v32, %v4290_v46  ;;  %v4297_v46 = vld [vmem:[%s9298_s16 + $0x118] sm:$0xff]  ;;  %v4314_v32 = vld [vmem:[%s9298_s16 + $0x1a0] sm:$0xff] }
 0x840   :  { %5472 = vmatprep.mubr.msk.f32.mxu0 %vm2523_vm6, %v5005_v13  ;;  %v6133_v8 = vpack.c.bf16 %v4315_v29, %v4314_v32 }
 0x841   :  { %v3978_v50 = vsub.f32 %v3758_v19, %v3977_v47  ;;  %v9513_v19 = vld [vmem:[#allocation14_spill] sm:$0xff] }
 0x843   :  { %5454 = vmatmul.mubr.msk.f32.vlgmr.msra.gmra.mrb[184].mxu1 %vm1312_vm5, %v3978_v50 }
 0x844   :  { %6096 = vmatpush3.bf16.msra.mxu1 %v6095_v2 }
 0x845   :  { %6098 = vmatprep.subr.bf16.mxu1 %v6097_v54 }
 0x848   :  { %6100 = vmatpush3.bf16.msra.mxu1 %v6099_v6 }
 0x849   :  { %6102 = vmatprep.subr.bf16.mxu1 %v6101_v53 }
 0x84c   :  { %6104 = vmatpush3.bf16.msra.mxu1 %v6103_v34 }
 0x84d   :  { %6106 = vmatprep.subr.bf16.mxu1 %v6105_v59 }
 0x850   :  { %6108 = vmatpush3.bf16.msra.mxu1 %v6107_v42  ;;  %v6125_v42 = vpack.c.bf16 %v4311_v35, %v4310_v3  ;;  %v4519_v3 = vld [vmem:[%s9302_s20 + $0x20] sm:$0xff]  ;;  %v4520_v35 = vld [vmem:[%s9302_s20 + $0x28] sm:$0xff] }
 0x851   :  { %6110 = vmatprep.subr.bf16.mxu1 %v6109_v27  ;;  %v4294_v27 = vld [vmem:[%s9298_s16 + $0x100] sm:$0xff] }
 0x854   :  { %6112 = vmatpush3.bf16.msra.mxu1 %v6111_v11  ;;  %v5009_v11 = vunpack.c.l.bf16 %v5041_v58 }
 0x855   :  { %6114 = vmatprep.subr.bf16.mxu1 %v6113_v26  ;;  %v6127_v26 = vpack.c.bf16 %v4295_v62, %v4294_v27  ;;  %v4522_v27 = vld [vmem:[%s9302_s20 + $0x38] sm:$0xff] }
 0x858   :  { %6116 = vmatpush3.bf16.msra.mxu1 %v6115_v55  ;;  %v5010_v55 = vunpack.c.h.bf16 %v5041_v58  ;;  %v6164_v58 = vpack.c.bf16 %v4520_v35, %v4519_v3 }
 0x859   :  { %6118 = vmatprep.subr.bf16.mxu1 %v6117_v30  ;;  %v6131_v30 = vpack.c.bf16 %v4297_v46, %v4296_v9  ;;  %v4527_v9 = vld [vmem:[%s9302_s20 + $0x60] sm:$0xf] }
 0x85c   :  { %6120 = vmatpush3.bf16.msra.mxu1 %v6119_v45  ;;  %v4317_v45 = vld [vmem:[%s9298_s16 + $0x1b8] sm:$0xff] }
 0x85d   :  { %6122 = vmatprep.subr.bf16.mxu1 %v6121_v57  ;;  %v6135_v57 = vpack.c.bf16 %v4299_v51, %v4298_v10  ;;  %v6137_v61 = vpack.c.bf16 %v4317_v45, %v4316_v24 }
 0x860   :  { %6124 = vmatpush3.bf16.msra.mxu1 %v6123_v23  ;;  %v4301_v23 = vld [vmem:[%s9298_s16 + $0x138] sm:$0xff] }
 0x861   :  { %6157 = vmatprep.subr.bf16.mxu1 %v9512_v56 }
 0x912   :  { %v4048_v15 = vpop.f32.mrb[140].mxu0 }
 0x913   :  { %v4128_v47 = vrot.slane %v4048_v15, %v9513_v19  ;;  %v5448_v50 = vpop.f32.mrb[141].mxu0  ;;  %v4318_v15 = vld [vmem:[%s9298_s16 + $0x1c0] sm:$0xff] }
 0x915   :  { %v4129_v1 = vmul.f32 %v4128_v47, %v8937_v4  ;;  %v4130_v12 = vmul.f32 %v4128_v47, %v8935_v49  ;;  %v4131_v63 = vmul.f32 %v4128_v47, %v8939_v52  ;;  %v4132_v21 = vmul.f32 %v4128_v47, %v8943_v60 }
 0x916   :  { %v4121_v13 = vpop.f32.mrb[184].mxu1  ;;  %v4133_v43 = vmul.f32 %v4128_v47, %v8951_v16  ;;  %v4134_v2 = vmul.f32 %v4128_v47, %v8956_v25  ;;  %v4135_v54 = vmul.f32 %v4128_v47, %v8964_v20  ;;  %v4136_v17 = vmul.f32 %v4128_v47, %v8970_v22 }
 0x917   :  { %v4140_v0 = vrot.slane %v4121_v13, %v9513_v19  ;;  %v5455_v14 = vpop.f32.mrb[185].mxu1  ;;  %v4319_v19 = vld [vmem:[%s9298_s16 + $0x1c8] sm:$0xff]  ;;  %v6139_v47 = vpack.c.bf16 %v4301_v23, %v4300_v48  ;;  %v4302_v13 = vld [vmem:[%s9298_s16 + $0x140] sm:$0xff] }
 0x918   :  { %v6141_v50 = vpack.c.bf16 %v4319_v19, %v4318_v15  ;;  %v4321_v14 = vld [vmem:[%s9298_s16 + $0x1d8] sm:$0xff] }
 0x919   :  { %v4141_v41 = vadd.f32 %v4140_v0, %v4129_v1  ;;  %v4142_v6 = vadd.f32 %v4140_v0, %v4130_v12  ;;  %v4143_v4 = vadd.f32 %v4140_v0, %v4131_v63  ;;  %v4144_v5 = vadd.f32 %v4140_v0, %v4132_v21  ;;  %v4303_v1 = vld [vmem:[%s9298_s16 + $0x148] sm:$0xff]  ;;  %v4304_v21 = vld [vmem:[%s9298_s16 + $0x150] sm:$0xff] }
 0x91a   :  { %v4145_v31 = vadd.f32 %v4140_v0, %v4133_v43  ;;  %v4146_v53 = vadd.f32 %v4140_v0, %v4134_v2  ;;  %v4147_v39 = vadd.f32 %v4140_v0, %v4135_v54  ;;  %v4148_v49 = vadd.f32 %v4140_v0, %v4136_v17  ;;  %v4320_v0 = vld [vmem:[%s9298_s16 + $0x1d0] sm:$0xff]  ;;  %v4305_v43 = vld [vmem:[%s9298_s16 + $0x158] sm:$0xff]  ;;  %v4322_v2 = vld [vmem:[%s9298_s16 + $0x1e0] sm:$0xff] }
 0x91b   :  { %v4149_v38 = vmax.f32 %v4141_v41, 0.0  ;;  %v4150_v52 = vmax.f32 %v4142_v6, 0.0  ;;  %v4151_v7 = vmax.f32 %v4143_v4, 0.0  ;;  %v4152_v60 = vmax.f32 %v4144_v5, 0.0  ;;  %v4323_v54 = vld [vmem:[%s9298_s16 + $0x1e8] sm:$0xff]  ;;  %v4306_v6 = vld [vmem:[%s9298_s16 + $0x160] sm:$0xff] }
 0x91c   :  { %v4153_v18 = vmax.f32 %v4145_v31, 0.0  ;;  %v4154_v16 = vmax.f32 %v4146_v53, 0.0  ;;  %v4155_v34 = vmax.f32 %v4147_v39, 0.0  ;;  %v4156_v25 = vmax.f32 %v4148_v49, 0.0  ;;  %v4307_v4 = vld [vmem:[%s9298_s16 + $0x168] sm:$0xff]  ;;  %v4324_v31 = vld [vmem:[%s9298_s16 + $0x1f0] sm:$0xff] }
 0x91d   :  { %v6077_v59 = vpack.c.bf16 %v4150_v52, %v4149_v38  ;;  %v6081_v20 = vpack.c.bf16 %v4152_v60, %v4151_v7  ;;  %v6143_v12 = vpack.c.bf16 %v4303_v1, %v4302_v13  ;;  %v6145_v63 = vpack.c.bf16 %v4321_v14, %v4320_v0  ;;  %v4325_v53 = vld [vmem:[%s9298_s16 + $0x1f8] sm:$0xff]  ;;  %v4308_v39 = vld [vmem:[%s9298_s16 + $0x170] sm:$0xff] }
 0x91e   :  { %v6085_v44 = vpack.c.bf16 %v4154_v16, %v4153_v18  ;;  %v6089_v22 = vpack.c.bf16 %v4156_v25, %v4155_v34  ;;  %v6147_v17 = vpack.c.bf16 %v4305_v43, %v4304_v21  ;;  %v6149_v41 = vpack.c.bf16 %v4323_v54, %v4322_v2  ;;  %v4309_v38 = vld [vmem:[%s9298_s16 + $0x178] sm:$0xff]  ;;  %v4515_v34 = vld [vmem:[%s9302_s20] sm:$0xff]  ;;  %v4516_v25 = vld [vmem:[%s9302_s20 + $0x8] sm:$0xff] }
 0x91f   :  { %6078 = vmatprep.subr.bf16.mxu0 %v6077_v59  ;;  %v6151_v5 = vpack.c.bf16 %v4307_v4, %v4306_v6  ;;  %v6153_v49 = vpack.c.bf16 %v4325_v53, %v4324_v31  ;;  %v6155_v52 = vpack.c.bf16 %v4309_v38, %v4308_v39  ;;  %v4867_v4 = vld [vmem:[%s9301_s19] ss:$0 sm:$0xff] }
 0x920   :  { %6080 = vmatpush3.bf16.msra.mxu0 %v6077_v59  ;;  %v4517_v59 = vld [vmem:[%s9302_s20 + $0x10] sm:$0xff]  ;;  %v4868_v39 = vld [vmem:[%s9303_s21] ss:$0 sm:$0xff] }
 0x921   :  { %6082 = vmatprep.subr.bf16.mxu0 %v6081_v20 }
 0x924   :  { %6084 = vmatpush3.bf16.msra.mxu0 %v6081_v20  ;;  %v6158_v20 = vpack.c.bf16 %v4516_v25, %v4515_v34 }
 0x925   :  { %6086 = vmatprep.subr.bf16.mxu0 %v6085_v44 }
 0x928   :  { %6088 = vmatpush3.bf16.msra.mxu0 %v6085_v44  ;;  %v4518_v44 = vld [vmem:[%s9302_s20 + $0x18] sm:$0xff] }
 0x929   :  { %6090 = vmatprep.subr.bf16.mxu0 %v6089_v22 }
 0x92c   :  { %6092 = vmatpush3.bf16.msra.mxu0 %v6089_v22  ;;  %v6161_v22 = vpack.c.bf16 %v4518_v44, %v4517_v59 }
 0x92d   :  { %6126 = vmatprep.subr.bf16.mxu0 %v6125_v42  ;;  %v4521_v42 = vld [vmem:[%s9302_s20 + $0x30] sm:$0xff] }
 0x92e   :  { %v6167_v62 = vpack.c.bf16 %v4522_v27, %v4521_v42 }
 0x92f   :  { %5473 = vmatmul.mubr.msk.f32.vlgmr.msra.gmra.mrb[142].mxu0 %vm2523_vm6, %v5006_v40  ;;  %v6170_v40 = vpack.c.bf16 %v4524_v37, %v4523_v33 }
 0x930   :  { %5475 = vmatprep.mubr.msk.f32.mxu0 %vm2523_vm6, %v5009_v11  ;;  %6128 = vmatpush3.bf16.msra.mxu0 %v6127_v26  ;;  %v4525_v11 = vld [vmem:[%s9302_s20 + $0x50] sm:$0xff]  ;;  %v4526_v26 = vld [vmem:[%s9302_s20 + $0x58] sm:$0xff] }
 0x931   :  { %6130 = vmatprep.subr.bf16.mxu0 %v6129_v28  ;;  %v6173_v28 = vpack.c.bf16 %v4526_v26, %v4525_v11 }
 0x933   :  { %5476 = vmatmul.mubr.msk.f32.gmra.mrb[144].mxu0 %vm2523_vm6, %v5010_v55  ;;  %v4865_v55 = vld [vmem:[%s9299_s17] ss:$0 sm:$0xff] }
 0x934   :  { %6132 = vmatpush3.bf16.msra.mxu0 %v6131_v30 }
 0x935   :  { %6134 = vmatprep.subr.bf16.mxu0 %v6133_v8 }
 0x938   :  { %6136 = vmatpush3.bf16.msra.mxu0 %v6135_v57 }
 0x939   :  { %6138 = vmatprep.subr.bf16.mxu0 %v6137_v61 }
 0x93c   :  { %6140 = vmatpush3.bf16.msra.mxu0 %v6139_v47 }
 0x93d   :  { %6142 = vmatprep.subr.bf16.mxu0 %v6141_v50 }
 0x940   :  { %6144 = vmatpush3.bf16.msra.mxu0 %v6143_v12 }
 0x941   :  { %6146 = vmatprep.subr.bf16.mxu0 %v6145_v63 }
 0x944   :  { %6148 = vmatpush3.bf16.msra.mxu0 %v6147_v17 }
 0x945   :  { %6150 = vmatprep.subr.bf16.mxu0 %v6149_v41  ;;  %v4866_v41 = vld [vmem:[%s9300_s18] ss:$0 sm:$0xff]  ;;  %s6364_s18 = scalar_lea.vmem %s4620_s4, 128 }
 0x946   :  { %p6365_p0 = scmp.ne.s32.totalorder %s4620_s4, %s6364_s18  ;;  %p6370_p2 = scmp.lt.s32.totalorder %s6364_s18, %s6364_s18 }
 0x948   :  { %6152 = vmatpush3.bf16.msra.mxu0 %v6151_v5  ;;  %p6371_p3 = por %p6370_p2, %p6369_p1 }
 0x949   :  { %6154 = vmatprep.subr.bf16.mxu0 %v6153_v49 }
 0x94a   :  { %p6372_p4 = pnand %p6371_p3, %p6365_p0 }
 0x94c   :  { %6156 = vmatpush3.bf16.msra.mxu0 %v6155_v52 }
 0xa02   :  { %v5474_v7 = vpop.f32.mrb[142].mxu0 }
 0xa03   :  { %v4243_v60 = vpop.f32.mrb[143].mxu0  ;;  %4397 = vmatprep.mubr.f32.mxu1 %v5474_v7 }
 0xa04   :  { %4398 = vmatmul.mubr.f32.vlgmr.msra.gmra.mrb[186].mxu1 %v4243_v60 }
 0xa05   :  { %5504 = vmatprep.mubr.msk.f32.mxu1 %vm6390_vm4, %v9448_v36  ;;  %6159 = vmatpush3.bf16.msra.mxu1 %v6158_v20 }
 0xa06   :  { %v5477_v18 = vpop.f32.mrb[144].mxu0  ;;  %6160 = vmatprep.subr.bf16.mxu1 %v9512_v56 }
 0xa07   :  { %v4253_v16 = vpop.f32.mrb[145].mxu0  ;;  %4467 = vmatprep.mubr.f32.mxu0 %v5477_v18 }
 0xa08   :  { %4468 = vmatmul.mubr.f32.vlgmr.msra.gmra.mrb[146].mxu0 %v4253_v16 }
 0xa09   :  { %6162 = vmatpush3.bf16.msra.mxu1 %v6161_v22 }
 0xa0a   :  { %6163 = vmatprep.subr.bf16.mxu1 %v9512_v56 }
 0xa0d   :  { %6165 = vmatpush3.bf16.msra.mxu1 %v6164_v58 }
 0xa0e   :  { %6166 = vmatprep.subr.bf16.mxu1 %v9512_v56 }
 0xa11   :  { %6168 = vmatpush3.bf16.msra.mxu1 %v6167_v62 }
 0xa12   :  { %6169 = vmatprep.subr.bf16.mxu1 %v9512_v56 }
 0xa15   :  { %6171 = vmatpush3.bf16.msra.mxu1 %v6170_v40 }
 0xa16   :  { %6172 = vmatprep.subr.bf16.mxu1 %v9512_v56 }
 0xa19   :  { %6174 = vmatpush3.bf16.msra.mxu1 %v6173_v28 }
 0xa1a   :  { %5502 = vmatprep.subr.mxu1 %v9448_v36 }
 0xa1d   :  { %5503 = vmatpush3.msk.msra.mxu1 %vm264_vm1, %v4527_v9 }
 0xad7   :  { %v5236_v46 = vpop.f32.mrb[186].mxu1 }
 0xad8   :  { %v5237_v32 = vpop.f32.mrb[187].mxu1 }
 0xad9   :  { %v5238_v29 = vadd.f32 %v5237_v32, %v5236_v46 }
 0xadb   :  { %v5271_v30 = vpop.f32.mrb[146].mxu0  ;;  %v4400_v10 = vadd.f32 %v5238_v29, %v4865_v55 }
 0xadc   :  { %v5272_v8 = vpop.f32.mrb[147].mxu0 }
 0xadd   :  { %v5273_v56 = vadd.f32 %v5272_v8, %v5271_v30 }
 0xadf   :  { %v4470_v51 = vadd.f32 %v5273_v56, %v4400_v10 }
 0xae1   :  { %v4483_v36 = vmul.f32 %v4470_v51, %v4470_v51  ;;  %v4474_v24 = vsel %vm4473_vm7, %v4470_v51, 0.0 }
 0xae2   :  { %v4475_v45 = vrot.slane %v4474_v24, 4 }
 0xae3   :  { %v4484_v57 = vsel %vm4473_vm7, %v4483_v36, 0.0 }
 0xae4   :  { %v4476_v61 = vadd.f32 %v4475_v45, %v4474_v24  ;;  %v4485_v48 = vrot.slane %v4484_v57, 4 }
 0xae6   :  { %v4477_v23 = vrot.slane %v4476_v61, 2  ;;  %v4486_v15 = vadd.f32 %v4485_v48, %v4484_v57 }
 0xae8   :  { %v4478_v19 = vadd.f32 %v4477_v23, %v4476_v61  ;;  %v4487_v47 = vrot.slane %v4486_v15, 2 }
 0xaea   :  { %v4479_v50 = vrot.slane %v4478_v19, 1  ;;  %v4488_v13 = vadd.f32 %v4487_v47, %v4486_v15 }
 0xaec   :  { %v4480_v1 = vadd.f32 %v4479_v50, %v4478_v19  ;;  %v4489_v0 = vrot.slane %v4488_v13, 1 }
 0xaee   :  { %v4482_v14 = vmul.f32 0.125, %v4480_v1  ;;  %v4490_v12 = vadd.f32 %v4489_v0, %v4488_v13 }
 0xaf0   :  { %v4491_v63 = vmul.f32 0.125, %v4490_v12  ;;  %v4492_v21 = vmul.f32 %v4482_v14, %v4482_v14  ;;  %v4494_v54 = vsub.f32 %v4470_v51, %v4482_v14 }
 0xaf2   :  { %v4493_v43 = vsub.f32 %v4491_v63, %v4492_v21 }
 0xaf4   :  { %v4495_v2 = vadd.f32 1e-05, %v4493_v43 }
 0xaf6   :  { %6362 = vrsqrt.f32 %v4495_v2 }
 0xb00   :  { %v6363_v17 = vpop.eup %6362 }
 0xb01   :  { %v4497_v6 = vmul.f32 %v6363_v17, %v4494_v54 }
 0xb03   :  { %v4505_v5 = vmul.f32 %v4866_v41, %v4497_v6 }
 0xb05   :  { %v4513_v31 = vadd.f32 %v4867_v4, %v4505_v5 }
 0xb07   :  { %v4514_v53 = vmax.f32 %v4513_v31, 0.0 }
 0xb09   :  { %5505 = vmatmul.mubr.msk.f32.vlgmr.msra.gmra.mrb[188].mxu1 %vm4473_vm7, %v4514_v53 }
 0xbdc   :  { %v4607_v49 = vpop.f32.mrb[188].mxu1 }
 0xbdd   :  { %v4608_v38 = vadd.f32 %v4868_v39, %v4607_v49  ;;  %v5506_v52 = vpop.f32.mrb[189].mxu1 }
 0xbdf   :  { %4612 = vst.msk [vmem:[#allocation2] sm:$0xff] %vm4611_vm8, %v4608_v38 }
 0xbe0   :  { %6375 = shalt.err (!%p6372_p4)
}
 0xbe1   :  { %s6376_s27 = scalar_lea.hbm %s9304_s22, 128 }
 0xbe2   :  { %p6377_p5 = scmp.ne.s32.totalorder %s9304_s22, %s6376_s27  ;;  %p6380_p6 = scmp.lt.u32.totalorder %s6376_s27, %s9304_s22 }
 0xbe4   :  { %p6382_p7 = pnand %p6380_p6, %p6377_p5 }
 0xbe6   :  { %6385 = shalt.err (!%p6382_p7)
}
 0xbe7   :  { %4622 = dma.vmem_to_hbm [thread:$0]  %s4620_s4, 128, %s9304_s22, [#allocation3]  }
 0xbe8   :  { %6386 = dma.done.wait [#allocation3], 128  }
 0xbe9   :  { %6387 = vsyncadd [#allocation3], 4294967168 }
 0xbea   :  { %4626 = vsyncpa [#allocation3], 1 }

</bundles_post_ra>
